<compile_context>
chip_gen: v5e
topology: v5e:2x2
jax: 0.10.0
libtpu: 0.0.40
codegen_flags: <defaults>
</compile_context>

<pallas_src>
import numpy as np
import jax
import jax.numpy as jnp
from jax.experimental import pallas as pl
from jax.experimental.pallas import tpu as pltpu

EPS = 1e-5
NEG_SLOPE = 0.01          # PyTorch nn.LeakyReLU default negative_slope

MARGIN1 = 64              # zero margin around the flat 32x32 input  (needs >= 33)
MARGIN2 = 32              # zero margin around the flat 16x16 pool-1 output (>= 17)


# ----------------------------------------------------------------------------
# Pallas kernel (whole network, one batch element per grid step)
# ----------------------------------------------------------------------------
def _leaky(v):
    return jnp.where(v >= 0.0, v, NEG_SLOPE * v)


def _conv3x3(xm, w_ref, cout, H, W, margin):
    """3x3 / stride 1 / pad 1 conv on a zero-margined flat slab.

    xm:    (Cin, margin + H*W + margin) f32 value, spatial row-major in the middle,
           zero margins wide enough that row over/under-flow reads land on zeros.
    w_ref: (9, Cout, Cin) bf16 ref, tap-major (k = ky*3 + kx), BN scale pre-folded.
    """
    HW = H * W
    col = jax.lax.broadcasted_iota(jnp.int32, (1, HW), 1) % W
    ok_right = col < (W - 1)        # reading neighbour at w+1 is valid
    ok_left = col >= 1              # reading neighbour at w-1 is valid

    acc = jnp.zeros((cout, HW), jnp.float32)
    k = 0
    for oy in (-1, 0, 1):
        for ox in (-1, 0, 1):
            start = margin + oy * W + ox
            slab = xm[:, start:start + HW]          # static lane-window slice
            if ox == 1:
                slab = jnp.where(ok_right, slab, 0.0)
            elif ox == -1:
                slab = jnp.where(ok_left, slab, 0.0)
            acc = acc + jnp.dot(w_ref[k], slab.astype(jnp.bfloat16),
                                preferred_element_type=jnp.float32)
            k += 1
    return acc


def net_shallow_kernel(x_ref, w1_ref, b1_ref, pool1_ref,
                       w2_ref, b2_ref, pool2_ref,
                       wf1_ref, t3_ref, wf2_ref, t4_ref, wf3_ref, b3_ref,
                       o_ref):
    # conv1 + BN1 + LeakyReLU : (3, 32, 32) -> (8, 1024)
    a1 = _leaky(_conv3x3(x_ref[...], w1_ref, 8, 32, 32, MARGIN1) + b1_ref[...])

    # AvgPool 2x2 as a selection matmul whose matrix also emits conv2's zero margins
    p1 = jnp.dot(a1.astype(jnp.bfloat16), pool1_ref[...],
                 preferred_element_type=jnp.float32)          # (8, 32+256+32)

    # conv2 + BN2 + LeakyReLU : (8, 16, 16) -> (16, 256)
    a2 = _leaky(_conv3x3(p1, w2_ref, 16, 16, 16, MARGIN2) + b2_ref[...])

    # AvgPool 2x2 -> (16, 64)
    p2 = jnp.dot(a2.astype(jnp.bfloat16), pool2_ref[...],
                 preferred_element_type=jnp.float32)

    # flatten (channel-major, matches PyTorch x.view(B, -1)) + fc1 + BN3 + LeakyReLU.
    # Done as 16 per-channel matmuls so no sublane->lane reshape is needed.
    h = jnp.zeros((1, 64), jnp.float32)
    for c in range(16):
        h = h + jnp.dot(p2[c:c + 1, :].astype(jnp.bfloat16), wf1_ref[c],
                        preferred_element_type=jnp.float32)
    h = _leaky(h + t3_ref[...])

    # fc2 + BN4 + LeakyReLU
    h = _leaky(jnp.dot(h.astype(jnp.bfloat16), wf2_ref[...],
                       preferred_element_type=jnp.float32) + t4_ref[...])

    # fc3 (lane-padded to 128; wrapper slices back to 10)
    out = jnp.dot(h.astype(jnp.bfloat16), wf3_ref[...],
                  preferred_element_type=jnp.float32) + b3_ref[...]
    o_ref[...] = out


# ----------------------------------------------------------------------------
# Host-side constants / folding helpers
# ----------------------------------------------------------------------------
def _avgpool_matrix(H, W, margin=0):
    """(H*W, margin + (H/2)*(W/2) + margin) selection matrix for 2x2 average pool."""
    Hp, Wp = H // 2, W // 2
    P = np.zeros((H * W, margin + Hp * Wp + margin), np.float32)
    for h in range(H):
        for w in range(W):
            P[h * W + w, margin + (h // 2) * Wp + (w // 2)] = 0.25
    return P


_POOL1_NP = _avgpool_matrix(32, 32, margin=MARGIN2)   # (1024, 320)  (margins for conv2)
_POOL2_NP = _avgpool_matrix(16, 16, margin=0)         # (256, 64)


def fold_bn(gamma, beta, mean, var, bias):
    # (x + bias -> BN inference)  ==  x * s + t
    s = gamma / jnp.sqrt(var + EPS)
    t = (bias - mean) * s + beta
    return s, t


# ----------------------------------------------------------------------------
# Forward pass (Pallas) and pure-JAX reference
# ----------------------------------------------------------------------------
@jax.jit
def net_shallow_forward(params, x):
    B = x.shape[0]

    s1, t1 = fold_bn(params["bn1_gamma"], params["bn1_beta"],
                     params["bn1_mean"], params["bn1_var"], params["conv1_b"])
    s2, t2 = fold_bn(params["bn2_gamma"], params["bn2_beta"],
                     params["bn2_mean"], params["bn2_var"], params["conv2_b"])
    s3, t3 = fold_bn(params["bn3_gamma"], params["bn3_beta"],
                     params["bn3_mean"], params["bn3_var"], params["fc1_b"])
    s4, t4 = fold_bn(params["bn4_gamma"], params["bn4_beta"],
                     params["bn4_mean"], params["bn4_var"], params["fc2_b"])

    # BN scale folded into weights; bf16 storage, f32 accumulation in-kernel.
    w1 = (params["conv1_w"] * s1[:, None, None, None]).transpose(2, 3, 0, 1) \
        .reshape(9, 8, 3).astype(jnp.bfloat16)                       # tap-major
    w2 = (params["conv2_w"] * s2[:, None, None, None]).transpose(2, 3, 0, 1) \
        .reshape(9, 16, 8).astype(jnp.bfloat16)
    wf1 = (params["fc1_w"] * s3[:, None]).T.reshape(16, 64, 64).astype(jnp.bfloat16)
    wf2 = (params["fc2_w"] * s4[:, None]).T.astype(jnp.bfloat16)
    wf3 = jnp.zeros((64, 128), jnp.float32).at[:, :10].set(params["fc3_w"].T) \
        .astype(jnp.bfloat16)
    b3 = jnp.zeros((1, 128), jnp.float32).at[:, :10].set(params["fc3_b"][None, :])

    pool1 = jnp.asarray(_POOL1_NP, jnp.bfloat16)
    pool2 = jnp.asarray(_POOL2_NP, jnp.bfloat16)

    # Flat NCHW input with zero margins -> in-kernel im2col is just window slicing.
    x_m = jnp.pad(x.reshape(B, 3, 32 * 32), ((0, 0), (0, 0), (MARGIN1, MARGIN1)))

    W1M = MARGIN1 + 1024 + MARGIN1        # 1152
    W2M = MARGIN2 + 256 + MARGIN2         # 320

    out = pl.pallas_call(
        net_shallow_kernel,
        out_shape=jax.ShapeDtypeStruct((B, 1, 128), jnp.float32),
        grid=(B,),
        in_specs=[
            pl.BlockSpec((None, 3, W1M), lambda b: (b, 0, 0)),     # x (per element)
            pl.BlockSpec((9, 8, 3), lambda b: (0, 0, 0)),          # conv1 taps
            pl.BlockSpec((8, 1), lambda b: (0, 0)),                # conv1+bn1 bias
            pl.BlockSpec((1024, W2M), lambda b: (0, 0)),           # pool1 matrix
            pl.BlockSpec((9, 16, 8), lambda b: (0, 0, 0)),         # conv2 taps
            pl.BlockSpec((16, 1), lambda b: (0, 0)),               # conv2+bn2 bias
            pl.BlockSpec((256, 64), lambda b: (0, 0)),             # pool2 matrix
            pl.BlockSpec((16, 64, 64), lambda b: (0, 0, 0)),       # fc1 (per channel)
            pl.BlockSpec((1, 64), lambda b: (0, 0)),               # fc1+bn3 bias
            pl.BlockSpec((64, 64), lambda b: (0, 0)),              # fc2
            pl.BlockSpec((1, 64), lambda b: (0, 0)),               # fc2+bn4 bias
            pl.BlockSpec((64, 128), lambda b: (0, 0)),             # fc3 (lane padded)
            pl.BlockSpec((1, 128), lambda b: (0, 0)),              # fc3 bias (padded)
        ],
        out_specs=pl.BlockSpec((None, 1, 128), lambda b: (b, 0, 0)),
        compiler_params=pltpu.CompilerParams(dimension_semantics=("parallel",)),
    )(x_m, w1, t1.reshape(8, 1), pool1, w2, t2.reshape(16, 1), pool2,
      wf1, t3.reshape(1, 64), wf2, t4.reshape(1, 64), wf3, b3)

    return out.reshape(B, 128)[:, :10]


def reference_forward(params, x):
    def conv_bn_pool(x, w, b, gamma, beta, mean, var):
        y = jax.lax.conv_general_dilated(
            x, w, window_strides=(1, 1), padding=((1, 1), (1, 1)),
            dimension_numbers=("NCHW", "OIHW", "NCHW"))
        y = y + b[None, :, None, None]
        y = (y - mean[None, :, None, None]) * (gamma[None, :, None, None] /
             jnp.sqrt(var[None, :, None, None] + EPS)) + beta[None, :, None, None]
        y = jnp.where(y >= 0, y, NEG_SLOPE * y)
        B, C, H, W = y.shape
        return y.reshape(B, C, H // 2, 2, W // 2, 2).mean(axis=(3, 5))

    def lin_bn(h, w, b, gamma, beta, mean, var):
        h = h @ w.T + b
        h = (h - mean) * (gamma / jnp.sqrt(var + EPS)) + beta
        return jnp.where(h >= 0, h, NEG_SLOPE * h)

    y = conv_bn_pool(x, params["conv1_w"], params["conv1_b"], params["bn1_gamma"],
                     params["bn1_beta"], params["bn1_mean"], params["bn1_var"])
    y = conv_bn_pool(y, params["conv2_w"], params["conv2_b"], params["bn2_gamma"],
                     params["bn2_beta"], params["bn2_mean"], params["bn2_var"])
    h = y.reshape(y.shape[0], -1)
    h = lin_bn(h, params["fc1_w"], params["fc1_b"], params["bn3_gamma"],
               params["bn3_beta"], params["bn3_mean"], params["bn3_var"])
    h = lin_bn(h, params["fc2_w"], params["fc2_b"], params["bn4_gamma"],
               params["bn4_beta"], params["bn4_mean"], params["bn4_var"])
    return h @ params["fc3_w"].T + params["fc3_b"]


def init_params(key):
    ks = jax.random.split(key, 26)
    n = lambda k, shape, s=0.1: s * jax.random.normal(k, shape, jnp.float32)
    p = {}
    # conv1: Conv2d(3, 8, 3, 1, pad=1) + BatchNorm2d(8)
    p["conv1_w"] = n(ks[0], (8, 3, 3, 3));   p["conv1_b"] = n(ks[1], (8,))
    p["bn1_gamma"] = 1.0 + n(ks[2], (8,));   p["bn1_beta"] = n(ks[3], (8,))
    p["bn1_mean"] = n(ks[4], (8,));          p["bn1_var"] = 1.0 + 0.5 * jax.random.uniform(ks[5], (8,))
    # conv2: Conv2d(8, 16, 3, 1, pad=1) + BatchNorm2d(16)
    p["conv2_w"] = n(ks[6], (16, 8, 3, 3));  p["conv2_b"] = n(ks[7], (16,))
    p["bn2_gamma"] = 1.0 + n(ks[8], (16,));  p["bn2_beta"] = n(ks[9], (16,))
    p["bn2_mean"] = n(ks[10], (16,));        p["bn2_var"] = 1.0 + 0.5 * jax.random.uniform(ks[11], (16,))
    # fc1: Linear(1024, 64) + BatchNorm1d(64)
    p["fc1_w"] = n(ks[12], (64, 1024), 0.05); p["fc1_b"] = n(ks[13], (64,))
    p["bn3_gamma"] = 1.0 + n(ks[14], (64,));  p["bn3_beta"] = n(ks[15], (64,))
    p["bn3_mean"] = n(ks[16], (64,));         p["bn3_var"] = 1.0 + 0.5 * jax.random.uniform(ks[17], (64,))
    # fc2: Linear(64, 64) + BatchNorm1d(64)
    p["fc2_w"] = n(ks[18], (64, 64));         p["fc2_b"] = n(ks[19], (64,))
    p["bn4_gamma"] = 1.0 + n(ks[20], (64,));  p["bn4_beta"] = n(ks[21], (64,))
    p["bn4_mean"] = n(ks[22], (64,));         p["bn4_var"] = 1.0 + 0.5 * jax.random.uniform(ks[23], (64,))
    # fc3: Linear(64, 10)
    p["fc3_w"] = n(ks[24], (10, 64));         p["fc3_b"] = n(ks[25], (10,))
    return p


if __name__ == "__main__":
    key = jax.random.PRNGKey(0)
    pkey, xkey = jax.random.split(key)
    params = init_params(pkey)
    # 16*8*8 flatten in the module implies a 3x32x32 input (CIFAR-like), NCHW.
    x = jax.random.normal(xkey, (2, 3, 32, 32), jnp.float32)

    out = jax.block_until_ready(net_shallow_forward(params, x))
    ref = jax.block_until_ready(reference_forward(params, x))

    assert out.shape == (2, 10) and out.dtype == jnp.float32
    np.testing.assert_allclose(np.asarray(out), np.asarray(ref), rtol=5e-2, atol=5e-2)
    print("KERNEL_OK")
</pallas_src>

<mosaic_0001>
module attributes {stable_mosaic.version = 11 : i64} {
  func.func @net_shallow_kernel(%arg0: i32, %arg1: memref<1x3x1152xf32, #tpu.memory_space<vmem>>, %arg2: memref<9x8x3xbf16, #tpu.memory_space<vmem>>, %arg3: memref<8x1xf32, #tpu.memory_space<vmem>>, %arg4: memref<1024x320xbf16, #tpu.memory_space<vmem>>, %arg5: memref<9x16x8xbf16, #tpu.memory_space<vmem>>, %arg6: memref<16x1xf32, #tpu.memory_space<vmem>>, %arg7: memref<256x64xbf16, #tpu.memory_space<vmem>>, %arg8: memref<16x64x64xbf16, #tpu.memory_space<vmem>>, %arg9: memref<1x64xf32, #tpu.memory_space<vmem>>, %arg10: memref<64x64xbf16, #tpu.memory_space<vmem>>, %arg11: memref<1x64xf32, #tpu.memory_space<vmem>>, %arg12: memref<64x128xbf16, #tpu.memory_space<vmem>>, %arg13: memref<1x128xf32, #tpu.memory_space<vmem>>, %arg14: memref<1x1x128xf32, #tpu.memory_space<vmem>>) attributes {dimension_semantics = [#tpu.dimension_semantics<parallel>], iteration_bounds = array<i64: 2>, scalar_prefetch = 0 : i64, scratch_operands = 0 : i64, tpu.core_type = #tpu.core_type<tc>, window_params = [{transform_indices = @transform_0, window_bounds = array<i64: 1, 3, 1152>}, {pipeline_mode = #tpu.pipeline_mode<synchronous>, transform_indices = @transform_1, window_bounds = array<i64: 9, 8, 3>}, {pipeline_mode = #tpu.pipeline_mode<synchronous>, transform_indices = @transform_2, window_bounds = array<i64: 8, 1>}, {pipeline_mode = #tpu.pipeline_mode<synchronous>, transform_indices = @transform_3, window_bounds = array<i64: 1024, 320>}, {pipeline_mode = #tpu.pipeline_mode<synchronous>, transform_indices = @transform_4, window_bounds = array<i64: 9, 16, 8>}, {pipeline_mode = #tpu.pipeline_mode<synchronous>, transform_indices = @transform_5, window_bounds = array<i64: 16, 1>}, {pipeline_mode = #tpu.pipeline_mode<synchronous>, transform_indices = @transform_6, window_bounds = array<i64: 256, 64>}, {pipeline_mode = #tpu.pipeline_mode<synchronous>, transform_indices = @transform_7, window_bounds = array<i64: 16, 64, 64>}, {pipeline_mode = #tpu.pipeline_mode<synchronous>, transform_indices = @transform_8, window_bounds = array<i64: 1, 64>}, {pipeline_mode = #tpu.pipeline_mode<synchronous>, transform_indices = @transform_9, window_bounds = array<i64: 64, 64>}, {pipeline_mode = #tpu.pipeline_mode<synchronous>, transform_indices = @transform_10, window_bounds = array<i64: 1, 64>}, {pipeline_mode = #tpu.pipeline_mode<synchronous>, transform_indices = @transform_11, window_bounds = array<i64: 64, 128>}, {pipeline_mode = #tpu.pipeline_mode<synchronous>, transform_indices = @transform_12, window_bounds = array<i64: 1, 128>}, {transform_indices = @transform_13, window_bounds = array<i64: 1, 1, 128>}]} {
    %c0 = arith.constant 0 : index
    %c0_0 = arith.constant 0 : index
    %c0_1 = arith.constant 0 : index
    %0 = vector.load %arg1[%c0, %c0_0, %c0_1] : memref<1x3x1152xf32, #tpu.memory_space<vmem>>, vector<1x3x1152xf32>
    %1 = vector.shape_cast %0 : vector<1x3x1152xf32> to vector<3x1152xf32>
    %2 = tpu.iota {dimensions = array<i32: 1>} : vector<1x1024xi32>
    %c32_i32 = arith.constant 32 : i32
    %c0_i32 = arith.constant 0 : i32
    %3 = arith.cmpi eq, %c32_i32, %c0_i32 : i32
    %c1_i32 = arith.constant 1 : i32
    %4 = arith.select %3, %c1_i32, %c32_i32 : i32
    %5 = vector.broadcast %4 : i32 to vector<1x1024xi32>
    %6 = arith.remsi %2, %5 : vector<1x1024xi32>
    %c0_i32_2 = arith.constant 0 : i32
    %7 = vector.broadcast %c0_i32_2 : i32 to vector<1x1024xi32>
    %8 = arith.cmpi ne, %6, %7 : vector<1x1024xi32>
    %c0_i32_3 = arith.constant 0 : i32
    %9 = vector.broadcast %c0_i32_3 : i32 to vector<1x1024xi32>
    %10 = arith.cmpi slt, %6, %9 : vector<1x1024xi32>
    %c0_i32_4 = arith.constant 0 : i32
    %11 = arith.cmpi slt, %4, %c0_i32_4 : i32
    %12 = vector.broadcast %11 : i1 to vector<1x1024xi1>
    %13 = vector.broadcast %12 : vector<1x1024xi1> to vector<1x1024xi1>
    %14 = arith.xori %10, %13 : vector<1x1024xi1>
    %15 = arith.andi %14, %8 : vector<1x1024xi1>
    %16 = vector.broadcast %4 : i32 to vector<1x1024xi32>
    %17 = arith.addi %6, %16 : vector<1x1024xi32>
    %18 = arith.select %15, %17, %6 : vector<1x1024xi1>, vector<1x1024xi32>
    %c31_i32 = arith.constant 31 : i32
    %19 = vector.broadcast %c31_i32 : i32 to vector<1x1024xi32>
    %20 = arith.cmpi slt, %18, %19 : vector<1x1024xi32>
    %c1_i32_5 = arith.constant 1 : i32
    %21 = vector.broadcast %c1_i32_5 : i32 to vector<1x1024xi32>
    %22 = arith.cmpi sge, %18, %21 : vector<1x1024xi32>
    %cst = arith.constant 0.000000e+00 : f32
    %23 = vector.broadcast %cst : f32 to vector<8x1024xf32>
    %24 = vector.extract_strided_slice %1 {offsets = [0, 31], sizes = [3, 1024], strides = [1, 1]} : vector<3x1152xf32> to vector<3x1024xf32>
    %cst_6 = arith.constant 0.000000e+00 : f32
    %25 = vector.shape_cast %22 : vector<1x1024xi1> to vector<1x1024xi1>
    %26 = vector.broadcast %25 : vector<1x1024xi1> to vector<3x1024xi1>
    %27 = vector.broadcast %cst_6 : f32 to vector<3x1024xf32>
    %28 = arith.select %26, %24, %27 : vector<3x1024xi1>, vector<3x1024xf32>
    %c0_7 = arith.constant 0 : index
    %c0_8 = arith.constant 0 : index
    %c0_9 = arith.constant 0 : index
    %29 = vector.load %arg2[%c0_7, %c0_8, %c0_9] : memref<9x8x3xbf16, #tpu.memory_space<vmem>>, vector<1x8x3xbf16>
    %30 = vector.shape_cast %29 : vector<1x8x3xbf16> to vector<8x3xbf16>
    %31 = arith.truncf %28 : vector<3x1024xf32> to vector<3x1024xbf16>
    %cst_10 = arith.constant dense<0.000000e+00> : vector<8x1024xf32>
    %32 = tpu.matmul %30, %31, %cst_10 {dimension_numbers = #tpu.dot_dimension_numbers<[1], [0], [0], [1], [0, 0, 1, 1], [], []>} : vector<8x3xbf16>, vector<3x1024xbf16>, vector<8x1024xf32> -> vector<8x1024xf32>
    %33 = arith.addf %23, %32 : vector<8x1024xf32>
    %34 = vector.extract_strided_slice %1 {offsets = [0, 32], sizes = [3, 1024], strides = [1, 1]} : vector<3x1152xf32> to vector<3x1024xf32>
    %c1 = arith.constant 1 : index
    %c0_11 = arith.constant 0 : index
    %c0_12 = arith.constant 0 : index
    %35 = vector.load %arg2[%c1, %c0_11, %c0_12] : memref<9x8x3xbf16, #tpu.memory_space<vmem>>, vector<1x8x3xbf16>
    %36 = vector.shape_cast %35 : vector<1x8x3xbf16> to vector<8x3xbf16>
    %37 = arith.truncf %34 : vector<3x1024xf32> to vector<3x1024xbf16>
    %cst_13 = arith.constant dense<0.000000e+00> : vector<8x1024xf32>
    %38 = tpu.matmul %36, %37, %cst_13 {dimension_numbers = #tpu.dot_dimension_numbers<[1], [0], [0], [1], [0, 0, 1, 1], [], []>} : vector<8x3xbf16>, vector<3x1024xbf16>, vector<8x1024xf32> -> vector<8x1024xf32>
    %39 = arith.addf %33, %38 : vector<8x1024xf32>
    %40 = vector.extract_strided_slice %1 {offsets = [0, 33], sizes = [3, 1024], strides = [1, 1]} : vector<3x1152xf32> to vector<3x1024xf32>
    %cst_14 = arith.constant 0.000000e+00 : f32
    %41 = vector.shape_cast %20 : vector<1x1024xi1> to vector<1x1024xi1>
    %42 = vector.broadcast %41 : vector<1x1024xi1> to vector<3x1024xi1>
    %43 = vector.broadcast %cst_14 : f32 to vector<3x1024xf32>
    %44 = arith.select %42, %40, %43 : vector<3x1024xi1>, vector<3x1024xf32>
    %c2 = arith.constant 2 : index
    %c0_15 = arith.constant 0 : index
    %c0_16 = arith.constant 0 : index
    %45 = vector.load %arg2[%c2, %c0_15, %c0_16] : memref<9x8x3xbf16, #tpu.memory_space<vmem>>, vector<1x8x3xbf16>
    %46 = vector.shape_cast %45 : vector<1x8x3xbf16> to vector<8x3xbf16>
    %47 = arith.truncf %44 : vector<3x1024xf32> to vector<3x1024xbf16>
    %cst_17 = arith.constant dense<0.000000e+00> : vector<8x1024xf32>
    %48 = tpu.matmul %46, %47, %cst_17 {dimension_numbers = #tpu.dot_dimension_numbers<[1], [0], [0], [1], [0, 0, 1, 1], [], []>} : vector<8x3xbf16>, vector<3x1024xbf16>, vector<8x1024xf32> -> vector<8x1024xf32>
    %49 = arith.addf %39, %48 : vector<8x1024xf32>
    %50 = vector.extract_strided_slice %1 {offsets = [0, 63], sizes = [3, 1024], strides = [1, 1]} : vector<3x1152xf32> to vector<3x1024xf32>
    %cst_18 = arith.constant 0.000000e+00 : f32
    %51 = vector.shape_cast %22 : vector<1x1024xi1> to vector<1x1024xi1>
    %52 = vector.broadcast %51 : vector<1x1024xi1> to vector<3x1024xi1>
    %53 = vector.broadcast %cst_18 : f32 to vector<3x1024xf32>
    %54 = arith.select %52, %50, %53 : vector<3x1024xi1>, vector<3x1024xf32>
    %c3 = arith.constant 3 : index
    %c0_19 = arith.constant 0 : index
    %c0_20 = arith.constant 0 : index
    %55 = vector.load %arg2[%c3, %c0_19, %c0_20] : memref<9x8x3xbf16, #tpu.memory_space<vmem>>, vector<1x8x3xbf16>
    %56 = vector.shape_cast %55 : vector<1x8x3xbf16> to vector<8x3xbf16>
    %57 = arith.truncf %54 : vector<3x1024xf32> to vector<3x1024xbf16>
    %cst_21 = arith.constant dense<0.000000e+00> : vector<8x1024xf32>
    %58 = tpu.matmul %56, %57, %cst_21 {dimension_numbers = #tpu.dot_dimension_numbers<[1], [0], [0], [1], [0, 0, 1, 1], [], []>} : vector<8x3xbf16>, vector<3x1024xbf16>, vector<8x1024xf32> -> vector<8x1024xf32>
    %59 = arith.addf %49, %58 : vector<8x1024xf32>
    %60 = vector.extract_strided_slice %1 {offsets = [0, 64], sizes = [3, 1024], strides = [1, 1]} : vector<3x1152xf32> to vector<3x1024xf32>
    %c4 = arith.constant 4 : index
    %c0_22 = arith.constant 0 : index
    %c0_23 = arith.constant 0 : index
    %61 = vector.load %arg2[%c4, %c0_22, %c0_23] : memref<9x8x3xbf16, #tpu.memory_space<vmem>>, vector<1x8x3xbf16>
    %62 = vector.shape_cast %61 : vector<1x8x3xbf16> to vector<8x3xbf16>
    %63 = arith.truncf %60 : vector<3x1024xf32> to vector<3x1024xbf16>
    %cst_24 = arith.constant dense<0.000000e+00> : vector<8x1024xf32>
    %64 = tpu.matmul %62, %63, %cst_24 {dimension_numbers = #tpu.dot_dimension_numbers<[1], [0], [0], [1], [0, 0, 1, 1], [], []>} : vector<8x3xbf16>, vector<3x1024xbf16>, vector<8x1024xf32> -> vector<8x1024xf32>
    %65 = arith.addf %59, %64 : vector<8x1024xf32>
    %66 = vector.extract_strided_slice %1 {offsets = [0, 65], sizes = [3, 1024], strides = [1, 1]} : vector<3x1152xf32> to vector<3x1024xf32>
    %cst_25 = arith.constant 0.000000e+00 : f32
    %67 = vector.shape_cast %20 : vector<1x1024xi1> to vector<1x1024xi1>
    %68 = vector.broadcast %67 : vector<1x1024xi1> to vector<3x1024xi1>
    %69 = vector.broadcast %cst_25 : f32 to vector<3x1024xf32>
    %70 = arith.select %68, %66, %69 : vector<3x1024xi1>, vector<3x1024xf32>
    %c5 = arith.constant 5 : index
    %c0_26 = arith.constant 0 : index
    %c0_27 = arith.constant 0 : index
    %71 = vector.load %arg2[%c5, %c0_26, %c0_27] : memref<9x8x3xbf16, #tpu.memory_space<vmem>>, vector<1x8x3xbf16>
    %72 = vector.shape_cast %71 : vector<1x8x3xbf16> to vector<8x3xbf16>
    %73 = arith.truncf %70 : vector<3x1024xf32> to vector<3x1024xbf16>
    %cst_28 = arith.constant dense<0.000000e+00> : vector<8x1024xf32>
    %74 = tpu.matmul %72, %73, %cst_28 {dimension_numbers = #tpu.dot_dimension_numbers<[1], [0], [0], [1], [0, 0, 1, 1], [], []>} : vector<8x3xbf16>, vector<3x1024xbf16>, vector<8x1024xf32> -> vector<8x1024xf32>
    %75 = arith.addf %65, %74 : vector<8x1024xf32>
    %76 = vector.extract_strided_slice %1 {offsets = [0, 95], sizes = [3, 1024], strides = [1, 1]} : vector<3x1152xf32> to vector<3x1024xf32>
    %cst_29 = arith.constant 0.000000e+00 : f32
    %77 = vector.shape_cast %22 : vector<1x1024xi1> to vector<1x1024xi1>
    %78 = vector.broadcast %77 : vector<1x1024xi1> to vector<3x1024xi1>
    %79 = vector.broadcast %cst_29 : f32 to vector<3x1024xf32>
    %80 = arith.select %78, %76, %79 : vector<3x1024xi1>, vector<3x1024xf32>
    %c6 = arith.constant 6 : index
    %c0_30 = arith.constant 0 : index
    %c0_31 = arith.constant 0 : index
    %81 = vector.load %arg2[%c6, %c0_30, %c0_31] : memref<9x8x3xbf16, #tpu.memory_space<vmem>>, vector<1x8x3xbf16>
    %82 = vector.shape_cast %81 : vector<1x8x3xbf16> to vector<8x3xbf16>
    %83 = arith.truncf %80 : vector<3x1024xf32> to vector<3x1024xbf16>
    %cst_32 = arith.constant dense<0.000000e+00> : vector<8x1024xf32>
    %84 = tpu.matmul %82, %83, %cst_32 {dimension_numbers = #tpu.dot_dimension_numbers<[1], [0], [0], [1], [0, 0, 1, 1], [], []>} : vector<8x3xbf16>, vector<3x1024xbf16>, vector<8x1024xf32> -> vector<8x1024xf32>
    %85 = arith.addf %75, %84 : vector<8x1024xf32>
    %86 = vector.extract_strided_slice %1 {offsets = [0, 96], sizes = [3, 1024], strides = [1, 1]} : vector<3x1152xf32> to vector<3x1024xf32>
    %c7 = arith.constant 7 : index
    %c0_33 = arith.constant 0 : index
    %c0_34 = arith.constant 0 : index
    %87 = vector.load %arg2[%c7, %c0_33, %c0_34] : memref<9x8x3xbf16, #tpu.memory_space<vmem>>, vector<1x8x3xbf16>
    %88 = vector.shape_cast %87 : vector<1x8x3xbf16> to vector<8x3xbf16>
    %89 = arith.truncf %86 : vector<3x1024xf32> to vector<3x1024xbf16>
    %cst_35 = arith.constant dense<0.000000e+00> : vector<8x1024xf32>
    %90 = tpu.matmul %88, %89, %cst_35 {dimension_numbers = #tpu.dot_dimension_numbers<[1], [0], [0], [1], [0, 0, 1, 1], [], []>} : vector<8x3xbf16>, vector<3x1024xbf16>, vector<8x1024xf32> -> vector<8x1024xf32>
    %91 = arith.addf %85, %90 : vector<8x1024xf32>
    %92 = vector.extract_strided_slice %1 {offsets = [0, 97], sizes = [3, 1024], strides = [1, 1]} : vector<3x1152xf32> to vector<3x1024xf32>
    %cst_36 = arith.constant 0.000000e+00 : f32
    %93 = vector.shape_cast %20 : vector<1x1024xi1> to vector<1x1024xi1>
    %94 = vector.broadcast %93 : vector<1x1024xi1> to vector<3x1024xi1>
    %95 = vector.broadcast %cst_36 : f32 to vector<3x1024xf32>
    %96 = arith.select %94, %92, %95 : vector<3x1024xi1>, vector<3x1024xf32>
    %c8 = arith.constant 8 : index
    %c0_37 = arith.constant 0 : index
    %c0_38 = arith.constant 0 : index
    %97 = vector.load %arg2[%c8, %c0_37, %c0_38] : memref<9x8x3xbf16, #tpu.memory_space<vmem>>, vector<1x8x3xbf16>
    %98 = vector.shape_cast %97 : vector<1x8x3xbf16> to vector<8x3xbf16>
    %99 = arith.truncf %96 : vector<3x1024xf32> to vector<3x1024xbf16>
    %cst_39 = arith.constant dense<0.000000e+00> : vector<8x1024xf32>
    %100 = tpu.matmul %98, %99, %cst_39 {dimension_numbers = #tpu.dot_dimension_numbers<[1], [0], [0], [1], [0, 0, 1, 1], [], []>} : vector<8x3xbf16>, vector<3x1024xbf16>, vector<8x1024xf32> -> vector<8x1024xf32>
    %101 = arith.addf %91, %100 : vector<8x1024xf32>
    %c0_40 = arith.constant 0 : index
    %c0_41 = arith.constant 0 : index
    %102 = vector.load %arg3[%c0_40, %c0_41] : memref<8x1xf32, #tpu.memory_space<vmem>>, vector<8x1xf32>
    %103 = vector.broadcast %102 : vector<8x1xf32> to vector<8x1024xf32>
    %104 = arith.addf %101, %103 : vector<8x1024xf32>
    %cst_42 = arith.constant 0.000000e+00 : f32
    %105 = vector.broadcast %cst_42 : f32 to vector<8x1024xf32>
    %106 = arith.cmpf oge, %104, %105 : vector<8x1024xf32>
    %cst_43 = arith.constant 0.00999999977 : f32
    %107 = vector.broadcast %cst_43 : f32 to vector<8x1024xf32>
    %108 = arith.mulf %107, %104 : vector<8x1024xf32>
    %109 = arith.select %106, %104, %108 : vector<8x1024xi1>, vector<8x1024xf32>
    %110 = arith.truncf %109 : vector<8x1024xf32> to vector<8x1024xbf16>
    %c0_44 = arith.constant 0 : index
    %c0_45 = arith.constant 0 : index
    %111 = vector.load %arg4[%c0_44, %c0_45] : memref<1024x320xbf16, #tpu.memory_space<vmem>>, vector<1024x320xbf16>
    %cst_46 = arith.constant dense<0.000000e+00> : vector<8x320xf32>
    %112 = tpu.matmul %110, %111, %cst_46 {dimension_numbers = #tpu.dot_dimension_numbers<[1], [0], [0], [1], [0, 0, 1, 1], [], []>} : vector<8x1024xbf16>, vector<1024x320xbf16>, vector<8x320xf32> -> vector<8x320xf32>
    %113 = tpu.iota {dimensions = array<i32: 1>} : vector<1x256xi32>
    %c16_i32 = arith.constant 16 : i32
    %c0_i32_47 = arith.constant 0 : i32
    %114 = arith.cmpi eq, %c16_i32, %c0_i32_47 : i32
    %c1_i32_48 = arith.constant 1 : i32
    %115 = arith.select %114, %c1_i32_48, %c16_i32 : i32
    %116 = vector.broadcast %115 : i32 to vector<1x256xi32>
    %117 = arith.remsi %113, %116 : vector<1x256xi32>
    %c0_i32_49 = arith.constant 0 : i32
    %118 = vector.broadcast %c0_i32_49 : i32 to vector<1x256xi32>
    %119 = arith.cmpi ne, %117, %118 : vector<1x256xi32>
    %c0_i32_50 = arith.constant 0 : i32
    %120 = vector.broadcast %c0_i32_50 : i32 to vector<1x256xi32>
    %121 = arith.cmpi slt, %117, %120 : vector<1x256xi32>
    %c0_i32_51 = arith.constant 0 : i32
    %122 = arith.cmpi slt, %115, %c0_i32_51 : i32
    %123 = vector.broadcast %122 : i1 to vector<1x256xi1>
    %124 = vector.broadcast %123 : vector<1x256xi1> to vector<1x256xi1>
    %125 = arith.xori %121, %124 : vector<1x256xi1>
    %126 = arith.andi %125, %119 : vector<1x256xi1>
    %127 = vector.broadcast %115 : i32 to vector<1x256xi32>
    %128 = arith.addi %117, %127 : vector<1x256xi32>
    %129 = arith.select %126, %128, %117 : vector<1x256xi1>, vector<1x256xi32>
    %c15_i32 = arith.constant 15 : i32
    %130 = vector.broadcast %c15_i32 : i32 to vector<1x256xi32>
    %131 = arith.cmpi slt, %129, %130 : vector<1x256xi32>
    %c1_i32_52 = arith.constant 1 : i32
    %132 = vector.broadcast %c1_i32_52 : i32 to vector<1x256xi32>
    %133 = arith.cmpi sge, %129, %132 : vector<1x256xi32>
    %cst_53 = arith.constant 0.000000e+00 : f32
    %134 = vector.broadcast %cst_53 : f32 to vector<16x256xf32>
    %135 = vector.extract_strided_slice %112 {offsets = [0, 15], sizes = [8, 256], strides = [1, 1]} : vector<8x320xf32> to vector<8x256xf32>
    %cst_54 = arith.constant 0.000000e+00 : f32
    %136 = vector.shape_cast %133 : vector<1x256xi1> to vector<1x256xi1>
    %137 = vector.broadcast %136 : vector<1x256xi1> to vector<8x256xi1>
    %138 = vector.broadcast %cst_54 : f32 to vector<8x256xf32>
    %139 = arith.select %137, %135, %138 : vector<8x256xi1>, vector<8x256xf32>
    %c0_55 = arith.constant 0 : index
    %c0_56 = arith.constant 0 : index
    %c0_57 = arith.constant 0 : index
    %140 = vector.load %arg5[%c0_55, %c0_56, %c0_57] : memref<9x16x8xbf16, #tpu.memory_space<vmem>>, vector<1x16x8xbf16>
    %141 = vector.shape_cast %140 : vector<1x16x8xbf16> to vector<16x8xbf16>
    %142 = arith.truncf %139 : vector<8x256xf32> to vector<8x256xbf16>
    %cst_58 = arith.constant dense<0.000000e+00> : vector<16x256xf32>
    %143 = tpu.matmul %141, %142, %cst_58 {dimension_numbers = #tpu.dot_dimension_numbers<[1], [0], [0], [1], [0, 0, 1, 1], [], []>} : vector<16x8xbf16>, vector<8x256xbf16>, vector<16x256xf32> -> vector<16x256xf32>
    %144 = arith.addf %134, %143 : vector<16x256xf32>
    %145 = vector.extract_strided_slice %112 {offsets = [0, 16], sizes = [8, 256], strides = [1, 1]} : vector<8x320xf32> to vector<8x256xf32>
    %c1_59 = arith.constant 1 : index
    %c0_60 = arith.constant 0 : index
    %c0_61 = arith.constant 0 : index
    %146 = vector.load %arg5[%c1_59, %c0_60, %c0_61] : memref<9x16x8xbf16, #tpu.memory_space<vmem>>, vector<1x16x8xbf16>
    %147 = vector.shape_cast %146 : vector<1x16x8xbf16> to vector<16x8xbf16>
    %148 = arith.truncf %145 : vector<8x256xf32> to vector<8x256xbf16>
    %cst_62 = arith.constant dense<0.000000e+00> : vector<16x256xf32>
    %149 = tpu.matmul %147, %148, %cst_62 {dimension_numbers = #tpu.dot_dimension_numbers<[1], [0], [0], [1], [0, 0, 1, 1], [], []>} : vector<16x8xbf16>, vector<8x256xbf16>, vector<16x256xf32> -> vector<16x256xf32>
    %150 = arith.addf %144, %149 : vector<16x256xf32>
    %151 = vector.extract_strided_slice %112 {offsets = [0, 17], sizes = [8, 256], strides = [1, 1]} : vector<8x320xf32> to vector<8x256xf32>
    %cst_63 = arith.constant 0.000000e+00 : f32
    %152 = vector.shape_cast %131 : vector<1x256xi1> to vector<1x256xi1>
    %153 = vector.broadcast %152 : vector<1x256xi1> to vector<8x256xi1>
    %154 = vector.broadcast %cst_63 : f32 to vector<8x256xf32>
    %155 = arith.select %153, %151, %154 : vector<8x256xi1>, vector<8x256xf32>
    %c2_64 = arith.constant 2 : index
    %c0_65 = arith.constant 0 : index
    %c0_66 = arith.constant 0 : index
    %156 = vector.load %arg5[%c2_64, %c0_65, %c0_66] : memref<9x16x8xbf16, #tpu.memory_space<vmem>>, vector<1x16x8xbf16>
    %157 = vector.shape_cast %156 : vector<1x16x8xbf16> to vector<16x8xbf16>
    %158 = arith.truncf %155 : vector<8x256xf32> to vector<8x256xbf16>
    %cst_67 = arith.constant dense<0.000000e+00> : vector<16x256xf32>
    %159 = tpu.matmul %157, %158, %cst_67 {dimension_numbers = #tpu.dot_dimension_numbers<[1], [0], [0], [1], [0, 0, 1, 1], [], []>} : vector<16x8xbf16>, vector<8x256xbf16>, vector<16x256xf32> -> vector<16x256xf32>
    %160 = arith.addf %150, %159 : vector<16x256xf32>
    %161 = vector.extract_strided_slice %112 {offsets = [0, 31], sizes = [8, 256], strides = [1, 1]} : vector<8x320xf32> to vector<8x256xf32>
    %cst_68 = arith.constant 0.000000e+00 : f32
    %162 = vector.shape_cast %133 : vector<1x256xi1> to vector<1x256xi1>
    %163 = vector.broadcast %162 : vector<1x256xi1> to vector<8x256xi1>
    %164 = vector.broadcast %cst_68 : f32 to vector<8x256xf32>
    %165 = arith.select %163, %161, %164 : vector<8x256xi1>, vector<8x256xf32>
    %c3_69 = arith.constant 3 : index
    %c0_70 = arith.constant 0 : index
    %c0_71 = arith.constant 0 : index
    %166 = vector.load %arg5[%c3_69, %c0_70, %c0_71] : memref<9x16x8xbf16, #tpu.memory_space<vmem>>, vector<1x16x8xbf16>
    %167 = vector.shape_cast %166 : vector<1x16x8xbf16> to vector<16x8xbf16>
    %168 = arith.truncf %165 : vector<8x256xf32> to vector<8x256xbf16>
    %cst_72 = arith.constant dense<0.000000e+00> : vector<16x256xf32>
    %169 = tpu.matmul %167, %168, %cst_72 {dimension_numbers = #tpu.dot_dimension_numbers<[1], [0], [0], [1], [0, 0, 1, 1], [], []>} : vector<16x8xbf16>, vector<8x256xbf16>, vector<16x256xf32> -> vector<16x256xf32>
    %170 = arith.addf %160, %169 : vector<16x256xf32>
    %171 = vector.extract_strided_slice %112 {offsets = [0, 32], sizes = [8, 256], strides = [1, 1]} : vector<8x320xf32> to vector<8x256xf32>
    %c4_73 = arith.constant 4 : index
    %c0_74 = arith.constant 0 : index
    %c0_75 = arith.constant 0 : index
    %172 = vector.load %arg5[%c4_73, %c0_74, %c0_75] : memref<9x16x8xbf16, #tpu.memory_space<vmem>>, vector<1x16x8xbf16>
    %173 = vector.shape_cast %172 : vector<1x16x8xbf16> to vector<16x8xbf16>
    %174 = arith.truncf %171 : vector<8x256xf32> to vector<8x256xbf16>
    %cst_76 = arith.constant dense<0.000000e+00> : vector<16x256xf32>
    %175 = tpu.matmul %173, %174, %cst_76 {dimension_numbers = #tpu.dot_dimension_numbers<[1], [0], [0], [1], [0, 0, 1, 1], [], []>} : vector<16x8xbf16>, vector<8x256xbf16>, vector<16x256xf32> -> vector<16x256xf32>
    %176 = arith.addf %170, %175 : vector<16x256xf32>
    %177 = vector.extract_strided_slice %112 {offsets = [0, 33], sizes = [8, 256], strides = [1, 1]} : vector<8x320xf32> to vector<8x256xf32>
    %cst_77 = arith.constant 0.000000e+00 : f32
    %178 = vector.shape_cast %131 : vector<1x256xi1> to vector<1x256xi1>
    %179 = vector.broadcast %178 : vector<1x256xi1> to vector<8x256xi1>
    %180 = vector.broadcast %cst_77 : f32 to vector<8x256xf32>
    %181 = arith.select %179, %177, %180 : vector<8x256xi1>, vector<8x256xf32>
    %c5_78 = arith.constant 5 : index
    %c0_79 = arith.constant 0 : index
    %c0_80 = arith.constant 0 : index
    %182 = vector.load %arg5[%c5_78, %c0_79, %c0_80] : memref<9x16x8xbf16, #tpu.memory_space<vmem>>, vector<1x16x8xbf16>
    %183 = vector.shape_cast %182 : vector<1x16x8xbf16> to vector<16x8xbf16>
    %184 = arith.truncf %181 : vector<8x256xf32> to vector<8x256xbf16>
    %cst_81 = arith.constant dense<0.000000e+00> : vector<16x256xf32>
    %185 = tpu.matmul %183, %184, %cst_81 {dimension_numbers = #tpu.dot_dimension_numbers<[1], [0], [0], [1], [0, 0, 1, 1], [], []>} : vector<16x8xbf16>, vector<8x256xbf16>, vector<16x256xf32> -> vector<16x256xf32>
    %186 = arith.addf %176, %185 : vector<16x256xf32>
    %187 = vector.extract_strided_slice %112 {offsets = [0, 47], sizes = [8, 256], strides = [1, 1]} : vector<8x320xf32> to vector<8x256xf32>
    %cst_82 = arith.constant 0.000000e+00 : f32
    %188 = vector.shape_cast %133 : vector<1x256xi1> to vector<1x256xi1>
    %189 = vector.broadcast %188 : vector<1x256xi1> to vector<8x256xi1>
    %190 = vector.broadcast %cst_82 : f32 to vector<8x256xf32>
    %191 = arith.select %189, %187, %190 : vector<8x256xi1>, vector<8x256xf32>
    %c6_83 = arith.constant 6 : index
    %c0_84 = arith.constant 0 : index
    %c0_85 = arith.constant 0 : index
    %192 = vector.load %arg5[%c6_83, %c0_84, %c0_85] : memref<9x16x8xbf16, #tpu.memory_space<vmem>>, vector<1x16x8xbf16>
    %193 = vector.shape_cast %192 : vector<1x16x8xbf16> to vector<16x8xbf16>
    %194 = arith.truncf %191 : vector<8x256xf32> to vector<8x256xbf16>
    %cst_86 = arith.constant dense<0.000000e+00> : vector<16x256xf32>
    %195 = tpu.matmul %193, %194, %cst_86 {dimension_numbers = #tpu.dot_dimension_numbers<[1], [0], [0], [1], [0, 0, 1, 1], [], []>} : vector<16x8xbf16>, vector<8x256xbf16>, vector<16x256xf32> -> vector<16x256xf32>
    %196 = arith.addf %186, %195 : vector<16x256xf32>
    %197 = vector.extract_strided_slice %112 {offsets = [0, 48], sizes = [8, 256], strides = [1, 1]} : vector<8x320xf32> to vector<8x256xf32>
    %c7_87 = arith.constant 7 : index
    %c0_88 = arith.constant 0 : index
    %c0_89 = arith.constant 0 : index
    %198 = vector.load %arg5[%c7_87, %c0_88, %c0_89] : memref<9x16x8xbf16, #tpu.memory_space<vmem>>, vector<1x16x8xbf16>
    %199 = vector.shape_cast %198 : vector<1x16x8xbf16> to vector<16x8xbf16>
    %200 = arith.truncf %197 : vector<8x256xf32> to vector<8x256xbf16>
    %cst_90 = arith.constant dense<0.000000e+00> : vector<16x256xf32>
    %201 = tpu.matmul %199, %200, %cst_90 {dimension_numbers = #tpu.dot_dimension_numbers<[1], [0], [0], [1], [0, 0, 1, 1], [], []>} : vector<16x8xbf16>, vector<8x256xbf16>, vector<16x256xf32> -> vector<16x256xf32>
    %202 = arith.addf %196, %201 : vector<16x256xf32>
    %203 = vector.extract_strided_slice %112 {offsets = [0, 49], sizes = [8, 256], strides = [1, 1]} : vector<8x320xf32> to vector<8x256xf32>
    %cst_91 = arith.constant 0.000000e+00 : f32
    %204 = vector.shape_cast %131 : vector<1x256xi1> to vector<1x256xi1>
    %205 = vector.broadcast %204 : vector<1x256xi1> to vector<8x256xi1>
    %206 = vector.broadcast %cst_91 : f32 to vector<8x256xf32>
    %207 = arith.select %205, %203, %206 : vector<8x256xi1>, vector<8x256xf32>
    %c8_92 = arith.constant 8 : index
    %c0_93 = arith.constant 0 : index
    %c0_94 = arith.constant 0 : index
    %208 = vector.load %arg5[%c8_92, %c0_93, %c0_94] : memref<9x16x8xbf16, #tpu.memory_space<vmem>>, vector<1x16x8xbf16>
    %209 = vector.shape_cast %208 : vector<1x16x8xbf16> to vector<16x8xbf16>
    %210 = arith.truncf %207 : vector<8x256xf32> to vector<8x256xbf16>
    %cst_95 = arith.constant dense<0.000000e+00> : vector<16x256xf32>
    %211 = tpu.matmul %209, %210, %cst_95 {dimension_numbers = #tpu.dot_dimension_numbers<[1], [0], [0], [1], [0, 0, 1, 1], [], []>} : vector<16x8xbf16>, vector<8x256xbf16>, vector<16x256xf32> -> vector<16x256xf32>
    %212 = arith.addf %202, %211 : vector<16x256xf32>
    %c0_96 = arith.constant 0 : index
    %c0_97 = arith.constant 0 : index
    %213 = vector.load %arg6[%c0_96, %c0_97] : memref<16x1xf32, #tpu.memory_space<vmem>>, vector<16x1xf32>
    %214 = vector.broadcast %213 : vector<16x1xf32> to vector<16x256xf32>
    %215 = arith.addf %212, %214 : vector<16x256xf32>
    %cst_98 = arith.constant 0.000000e+00 : f32
    %216 = vector.broadcast %cst_98 : f32 to vector<16x256xf32>
    %217 = arith.cmpf oge, %215, %216 : vector<16x256xf32>
    %cst_99 = arith.constant 0.00999999977 : f32
    %218 = vector.broadcast %cst_99 : f32 to vector<16x256xf32>
    %219 = arith.mulf %218, %215 : vector<16x256xf32>
    %220 = arith.select %217, %215, %219 : vector<16x256xi1>, vector<16x256xf32>
    %221 = arith.truncf %220 : vector<16x256xf32> to vector<16x256xbf16>
    %c0_100 = arith.constant 0 : index
    %c0_101 = arith.constant 0 : index
    %222 = vector.load %arg7[%c0_100, %c0_101] : memref<256x64xbf16, #tpu.memory_space<vmem>>, vector<256x64xbf16>
    %cst_102 = arith.constant dense<0.000000e+00> : vector<16x64xf32>
    %223 = tpu.matmul %221, %222, %cst_102 {dimension_numbers = #tpu.dot_dimension_numbers<[1], [0], [0], [1], [0, 0, 1, 1], [], []>} : vector<16x256xbf16>, vector<256x64xbf16>, vector<16x64xf32> -> vector<16x64xf32>
    %cst_103 = arith.constant 0.000000e+00 : f32
    %224 = vector.broadcast %cst_103 : f32 to vector<1x64xf32>
    %225 = vector.extract_strided_slice %223 {offsets = [0, 0], sizes = [1, 64], strides = [1, 1]} : vector<16x64xf32> to vector<1x64xf32>
    %226 = arith.truncf %225 : vector<1x64xf32> to vector<1x64xbf16>
    %c0_104 = arith.constant 0 : index
    %c0_105 = arith.constant 0 : index
    %c0_106 = arith.constant 0 : index
    %227 = vector.load %arg8[%c0_104, %c0_105, %c0_106] : memref<16x64x64xbf16, #tpu.memory_space<vmem>>, vector<1x64x64xbf16>
    %228 = vector.shape_cast %227 : vector<1x64x64xbf16> to vector<64x64xbf16>
    %cst_107 = arith.constant dense<0.000000e+00> : vector<1x64xf32>
    %229 = tpu.matmul %226, %228, %cst_107 {dimension_numbers = #tpu.dot_dimension_numbers<[1], [0], [0], [1], [0, 0, 1, 1], [], []>} : vector<1x64xbf16>, vector<64x64xbf16>, vector<1x64xf32> -> vector<1x64xf32>
    %230 = arith.addf %224, %229 : vector<1x64xf32>
    %231 = vector.extract_strided_slice %223 {offsets = [1, 0], sizes = [1, 64], strides = [1, 1]} : vector<16x64xf32> to vector<1x64xf32>
    %232 = arith.truncf %231 : vector<1x64xf32> to vector<1x64xbf16>
    %c1_108 = arith.constant 1 : index
    %c0_109 = arith.constant 0 : index
    %c0_110 = arith.constant 0 : index
    %233 = vector.load %arg8[%c1_108, %c0_109, %c0_110] : memref<16x64x64xbf16, #tpu.memory_space<vmem>>, vector<1x64x64xbf16>
    %234 = vector.shape_cast %233 : vector<1x64x64xbf16> to vector<64x64xbf16>
    %cst_111 = arith.constant dense<0.000000e+00> : vector<1x64xf32>
    %235 = tpu.matmul %232, %234, %cst_111 {dimension_numbers = #tpu.dot_dimension_numbers<[1], [0], [0], [1], [0, 0, 1, 1], [], []>} : vector<1x64xbf16>, vector<64x64xbf16>, vector<1x64xf32> -> vector<1x64xf32>
    %236 = arith.addf %230, %235 : vector<1x64xf32>
    %237 = vector.extract_strided_slice %223 {offsets = [2, 0], sizes = [1, 64], strides = [1, 1]} : vector<16x64xf32> to vector<1x64xf32>
    %238 = arith.truncf %237 : vector<1x64xf32> to vector<1x64xbf16>
    %c2_112 = arith.constant 2 : index
    %c0_113 = arith.constant 0 : index
    %c0_114 = arith.constant 0 : index
    %239 = vector.load %arg8[%c2_112, %c0_113, %c0_114] : memref<16x64x64xbf16, #tpu.memory_space<vmem>>, vector<1x64x64xbf16>
    %240 = vector.shape_cast %239 : vector<1x64x64xbf16> to vector<64x64xbf16>
    %cst_115 = arith.constant dense<0.000000e+00> : vector<1x64xf32>
    %241 = tpu.matmul %238, %240, %cst_115 {dimension_numbers = #tpu.dot_dimension_numbers<[1], [0], [0], [1], [0, 0, 1, 1], [], []>} : vector<1x64xbf16>, vector<64x64xbf16>, vector<1x64xf32> -> vector<1x64xf32>
    %242 = arith.addf %236, %241 : vector<1x64xf32>
    %243 = vector.extract_strided_slice %223 {offsets = [3, 0], sizes = [1, 64], strides = [1, 1]} : vector<16x64xf32> to vector<1x64xf32>
    %244 = arith.truncf %243 : vector<1x64xf32> to vector<1x64xbf16>
    %c3_116 = arith.constant 3 : index
    %c0_117 = arith.constant 0 : index
    %c0_118 = arith.constant 0 : index
    %245 = vector.load %arg8[%c3_116, %c0_117, %c0_118] : memref<16x64x64xbf16, #tpu.memory_space<vmem>>, vector<1x64x64xbf16>
    %246 = vector.shape_cast %245 : vector<1x64x64xbf16> to vector<64x64xbf16>
    %cst_119 = arith.constant dense<0.000000e+00> : vector<1x64xf32>
    %247 = tpu.matmul %244, %246, %cst_119 {dimension_numbers = #tpu.dot_dimension_numbers<[1], [0], [0], [1], [0, 0, 1, 1], [], []>} : vector<1x64xbf16>, vector<64x64xbf16>, vector<1x64xf32> -> vector<1x64xf32>
    %248 = arith.addf %242, %247 : vector<1x64xf32>
    %249 = vector.extract_strided_slice %223 {offsets = [4, 0], sizes = [1, 64], strides = [1, 1]} : vector<16x64xf32> to vector<1x64xf32>
    %250 = arith.truncf %249 : vector<1x64xf32> to vector<1x64xbf16>
    %c4_120 = arith.constant 4 : index
    %c0_121 = arith.constant 0 : index
    %c0_122 = arith.constant 0 : index
    %251 = vector.load %arg8[%c4_120, %c0_121, %c0_122] : memref<16x64x64xbf16, #tpu.memory_space<vmem>>, vector<1x64x64xbf16>
    %252 = vector.shape_cast %251 : vector<1x64x64xbf16> to vector<64x64xbf16>
    %cst_123 = arith.constant dense<0.000000e+00> : vector<1x64xf32>
    %253 = tpu.matmul %250, %252, %cst_123 {dimension_numbers = #tpu.dot_dimension_numbers<[1], [0], [0], [1], [0, 0, 1, 1], [], []>} : vector<1x64xbf16>, vector<64x64xbf16>, vector<1x64xf32> -> vector<1x64xf32>
    %254 = arith.addf %248, %253 : vector<1x64xf32>
    %255 = vector.extract_strided_slice %223 {offsets = [5, 0], sizes = [1, 64], strides = [1, 1]} : vector<16x64xf32> to vector<1x64xf32>
    %256 = arith.truncf %255 : vector<1x64xf32> to vector<1x64xbf16>
    %c5_124 = arith.constant 5 : index
    %c0_125 = arith.constant 0 : index
    %c0_126 = arith.constant 0 : index
    %257 = vector.load %arg8[%c5_124, %c0_125, %c0_126] : memref<16x64x64xbf16, #tpu.memory_space<vmem>>, vector<1x64x64xbf16>
    %258 = vector.shape_cast %257 : vector<1x64x64xbf16> to vector<64x64xbf16>
    %cst_127 = arith.constant dense<0.000000e+00> : vector<1x64xf32>
    %259 = tpu.matmul %256, %258, %cst_127 {dimension_numbers = #tpu.dot_dimension_numbers<[1], [0], [0], [1], [0, 0, 1, 1], [], []>} : vector<1x64xbf16>, vector<64x64xbf16>, vector<1x64xf32> -> vector<1x64xf32>
    %260 = arith.addf %254, %259 : vector<1x64xf32>
    %261 = vector.extract_strided_slice %223 {offsets = [6, 0], sizes = [1, 64], strides = [1, 1]} : vector<16x64xf32> to vector<1x64xf32>
    %262 = arith.truncf %261 : vector<1x64xf32> to vector<1x64xbf16>
    %c6_128 = arith.constant 6 : index
    %c0_129 = arith.constant 0 : index
    %c0_130 = arith.constant 0 : index
    %263 = vector.load %arg8[%c6_128, %c0_129, %c0_130] : memref<16x64x64xbf16, #tpu.memory_space<vmem>>, vector<1x64x64xbf16>
    %264 = vector.shape_cast %263 : vector<1x64x64xbf16> to vector<64x64xbf16>
    %cst_131 = arith.constant dense<0.000000e+00> : vector<1x64xf32>
    %265 = tpu.matmul %262, %264, %cst_131 {dimension_numbers = #tpu.dot_dimension_numbers<[1], [0], [0], [1], [0, 0, 1, 1], [], []>} : vector<1x64xbf16>, vector<64x64xbf16>, vector<1x64xf32> -> vector<1x64xf32>
    %266 = arith.addf %260, %265 : vector<1x64xf32>
    %267 = vector.extract_strided_slice %223 {offsets = [7, 0], sizes = [1, 64], strides = [1, 1]} : vector<16x64xf32> to vector<1x64xf32>
    %268 = arith.truncf %267 : vector<1x64xf32> to vector<1x64xbf16>
    %c7_132 = arith.constant 7 : index
    %c0_133 = arith.constant 0 : index
    %c0_134 = arith.constant 0 : index
    %269 = vector.load %arg8[%c7_132, %c0_133, %c0_134] : memref<16x64x64xbf16, #tpu.memory_space<vmem>>, vector<1x64x64xbf16>
    %270 = vector.shape_cast %269 : vector<1x64x64xbf16> to vector<64x64xbf16>
    %cst_135 = arith.constant dense<0.000000e+00> : vector<1x64xf32>
    %271 = tpu.matmul %268, %270, %cst_135 {dimension_numbers = #tpu.dot_dimension_numbers<[1], [0], [0], [1], [0, 0, 1, 1], [], []>} : vector<1x64xbf16>, vector<64x64xbf16>, vector<1x64xf32> -> vector<1x64xf32>
    %272 = arith.addf %266, %271 : vector<1x64xf32>
    %273 = vector.extract_strided_slice %223 {offsets = [8, 0], sizes = [1, 64], strides = [1, 1]} : vector<16x64xf32> to vector<1x64xf32>
    %274 = arith.truncf %273 : vector<1x64xf32> to vector<1x64xbf16>
    %c8_136 = arith.constant 8 : index
    %c0_137 = arith.constant 0 : index
    %c0_138 = arith.constant 0 : index
    %275 = vector.load %arg8[%c8_136, %c0_137, %c0_138] : memref<16x64x64xbf16, #tpu.memory_space<vmem>>, vector<1x64x64xbf16>
    %276 = vector.shape_cast %275 : vector<1x64x64xbf16> to vector<64x64xbf16>
    %cst_139 = arith.constant dense<0.000000e+00> : vector<1x64xf32>
    %277 = tpu.matmul %274, %276, %cst_139 {dimension_numbers = #tpu.dot_dimension_numbers<[1], [0], [0], [1], [0, 0, 1, 1], [], []>} : vector<1x64xbf16>, vector<64x64xbf16>, vector<1x64xf32> -> vector<1x64xf32>
    %278 = arith.addf %272, %277 : vector<1x64xf32>
    %279 = vector.extract_strided_slice %223 {offsets = [9, 0], sizes = [1, 64], strides = [1, 1]} : vector<16x64xf32> to vector<1x64xf32>
    %280 = arith.truncf %279 : vector<1x64xf32> to vector<1x64xbf16>
    %c9 = arith.constant 9 : index
    %c0_140 = arith.constant 0 : index
    %c0_141 = arith.constant 0 : index
    %281 = vector.load %arg8[%c9, %c0_140, %c0_141] : memref<16x64x64xbf16, #tpu.memory_space<vmem>>, vector<1x64x64xbf16>
    %282 = vector.shape_cast %281 : vector<1x64x64xbf16> to vector<64x64xbf16>
    %cst_142 = arith.constant dense<0.000000e+00> : vector<1x64xf32>
    %283 = tpu.matmul %280, %282, %cst_142 {dimension_numbers = #tpu.dot_dimension_numbers<[1], [0], [0], [1], [0, 0, 1, 1], [], []>} : vector<1x64xbf16>, vector<64x64xbf16>, vector<1x64xf32> -> vector<1x64xf32>
    %284 = arith.addf %278, %283 : vector<1x64xf32>
    %285 = vector.extract_strided_slice %223 {offsets = [10, 0], sizes = [1, 64], strides = [1, 1]} : vector<16x64xf32> to vector<1x64xf32>
    %286 = arith.truncf %285 : vector<1x64xf32> to vector<1x64xbf16>
    %c10 = arith.constant 10 : index
    %c0_143 = arith.constant 0 : index
    %c0_144 = arith.constant 0 : index
    %287 = vector.load %arg8[%c10, %c0_143, %c0_144] : memref<16x64x64xbf16, #tpu.memory_space<vmem>>, vector<1x64x64xbf16>
    %288 = vector.shape_cast %287 : vector<1x64x64xbf16> to vector<64x64xbf16>
    %cst_145 = arith.constant dense<0.000000e+00> : vector<1x64xf32>
    %289 = tpu.matmul %286, %288, %cst_145 {dimension_numbers = #tpu.dot_dimension_numbers<[1], [0], [0], [1], [0, 0, 1, 1], [], []>} : vector<1x64xbf16>, vector<64x64xbf16>, vector<1x64xf32> -> vector<1x64xf32>
    %290 = arith.addf %284, %289 : vector<1x64xf32>
    %291 = vector.extract_strided_slice %223 {offsets = [11, 0], sizes = [1, 64], strides = [1, 1]} : vector<16x64xf32> to vector<1x64xf32>
    %292 = arith.truncf %291 : vector<1x64xf32> to vector<1x64xbf16>
    %c11 = arith.constant 11 : index
    %c0_146 = arith.constant 0 : index
    %c0_147 = arith.constant 0 : index
    %293 = vector.load %arg8[%c11, %c0_146, %c0_147] : memref<16x64x64xbf16, #tpu.memory_space<vmem>>, vector<1x64x64xbf16>
    %294 = vector.shape_cast %293 : vector<1x64x64xbf16> to vector<64x64xbf16>
    %cst_148 = arith.constant dense<0.000000e+00> : vector<1x64xf32>
    %295 = tpu.matmul %292, %294, %cst_148 {dimension_numbers = #tpu.dot_dimension_numbers<[1], [0], [0], [1], [0, 0, 1, 1], [], []>} : vector<1x64xbf16>, vector<64x64xbf16>, vector<1x64xf32> -> vector<1x64xf32>
    %296 = arith.addf %290, %295 : vector<1x64xf32>
    %297 = vector.extract_strided_slice %223 {offsets = [12, 0], sizes = [1, 64], strides = [1, 1]} : vector<16x64xf32> to vector<1x64xf32>
    %298 = arith.truncf %297 : vector<1x64xf32> to vector<1x64xbf16>
    %c12 = arith.constant 12 : index
    %c0_149 = arith.constant 0 : index
    %c0_150 = arith.constant 0 : index
    %299 = vector.load %arg8[%c12, %c0_149, %c0_150] : memref<16x64x64xbf16, #tpu.memory_space<vmem>>, vector<1x64x64xbf16>
    %300 = vector.shape_cast %299 : vector<1x64x64xbf16> to vector<64x64xbf16>
    %cst_151 = arith.constant dense<0.000000e+00> : vector<1x64xf32>
    %301 = tpu.matmul %298, %300, %cst_151 {dimension_numbers = #tpu.dot_dimension_numbers<[1], [0], [0], [1], [0, 0, 1, 1], [], []>} : vector<1x64xbf16>, vector<64x64xbf16>, vector<1x64xf32> -> vector<1x64xf32>
    %302 = arith.addf %296, %301 : vector<1x64xf32>
    %303 = vector.extract_strided_slice %223 {offsets = [13, 0], sizes = [1, 64], strides = [1, 1]} : vector<16x64xf32> to vector<1x64xf32>
    %304 = arith.truncf %303 : vector<1x64xf32> to vector<1x64xbf16>
    %c13 = arith.constant 13 : index
    %c0_152 = arith.constant 0 : index
    %c0_153 = arith.constant 0 : index
    %305 = vector.load %arg8[%c13, %c0_152, %c0_153] : memref<16x64x64xbf16, #tpu.memory_space<vmem>>, vector<1x64x64xbf16>
    %306 = vector.shape_cast %305 : vector<1x64x64xbf16> to vector<64x64xbf16>
    %cst_154 = arith.constant dense<0.000000e+00> : vector<1x64xf32>
    %307 = tpu.matmul %304, %306, %cst_154 {dimension_numbers = #tpu.dot_dimension_numbers<[1], [0], [0], [1], [0, 0, 1, 1], [], []>} : vector<1x64xbf16>, vector<64x64xbf16>, vector<1x64xf32> -> vector<1x64xf32>
    %308 = arith.addf %302, %307 : vector<1x64xf32>
    %309 = vector.extract_strided_slice %223 {offsets = [14, 0], sizes = [1, 64], strides = [1, 1]} : vector<16x64xf32> to vector<1x64xf32>
    %310 = arith.truncf %309 : vector<1x64xf32> to vector<1x64xbf16>
    %c14 = arith.constant 14 : index
    %c0_155 = arith.constant 0 : index
    %c0_156 = arith.constant 0 : index
    %311 = vector.load %arg8[%c14, %c0_155, %c0_156] : memref<16x64x64xbf16, #tpu.memory_space<vmem>>, vector<1x64x64xbf16>
    %312 = vector.shape_cast %311 : vector<1x64x64xbf16> to vector<64x64xbf16>
    %cst_157 = arith.constant dense<0.000000e+00> : vector<1x64xf32>
    %313 = tpu.matmul %310, %312, %cst_157 {dimension_numbers = #tpu.dot_dimension_numbers<[1], [0], [0], [1], [0, 0, 1, 1], [], []>} : vector<1x64xbf16>, vector<64x64xbf16>, vector<1x64xf32> -> vector<1x64xf32>
    %314 = arith.addf %308, %313 : vector<1x64xf32>
    %315 = vector.extract_strided_slice %223 {offsets = [15, 0], sizes = [1, 64], strides = [1, 1]} : vector<16x64xf32> to vector<1x64xf32>
    %316 = arith.truncf %315 : vector<1x64xf32> to vector<1x64xbf16>
    %c15 = arith.constant 15 : index
    %c0_158 = arith.constant 0 : index
    %c0_159 = arith.constant 0 : index
    %317 = vector.load %arg8[%c15, %c0_158, %c0_159] : memref<16x64x64xbf16, #tpu.memory_space<vmem>>, vector<1x64x64xbf16>
    %318 = vector.shape_cast %317 : vector<1x64x64xbf16> to vector<64x64xbf16>
    %cst_160 = arith.constant dense<0.000000e+00> : vector<1x64xf32>
    %319 = tpu.matmul %316, %318, %cst_160 {dimension_numbers = #tpu.dot_dimension_numbers<[1], [0], [0], [1], [0, 0, 1, 1], [], []>} : vector<1x64xbf16>, vector<64x64xbf16>, vector<1x64xf32> -> vector<1x64xf32>
    %320 = arith.addf %314, %319 : vector<1x64xf32>
    %c0_161 = arith.constant 0 : index
    %c0_162 = arith.constant 0 : index
    %321 = vector.load %arg9[%c0_161, %c0_162] : memref<1x64xf32, #tpu.memory_space<vmem>>, vector<1x64xf32>
    %322 = arith.addf %320, %321 : vector<1x64xf32>
    %cst_163 = arith.constant 0.000000e+00 : f32
    %323 = vector.broadcast %cst_163 : f32 to vector<1x64xf32>
    %324 = arith.cmpf oge, %322, %323 : vector<1x64xf32>
    %cst_164 = arith.constant 0.00999999977 : f32
    %325 = vector.broadcast %cst_164 : f32 to vector<1x64xf32>
    %326 = arith.mulf %325, %322 : vector<1x64xf32>
    %327 = arith.select %324, %322, %326 : vector<1x64xi1>, vector<1x64xf32>
    %328 = arith.truncf %327 : vector<1x64xf32> to vector<1x64xbf16>
    %c0_165 = arith.constant 0 : index
    %c0_166 = arith.constant 0 : index
    %329 = vector.load %arg10[%c0_165, %c0_166] : memref<64x64xbf16, #tpu.memory_space<vmem>>, vector<64x64xbf16>
    %cst_167 = arith.constant dense<0.000000e+00> : vector<1x64xf32>
    %330 = tpu.matmul %328, %329, %cst_167 {dimension_numbers = #tpu.dot_dimension_numbers<[1], [0], [0], [1], [0, 0, 1, 1], [], []>} : vector<1x64xbf16>, vector<64x64xbf16>, vector<1x64xf32> -> vector<1x64xf32>
    %c0_168 = arith.constant 0 : index
    %c0_169 = arith.constant 0 : index
    %331 = vector.load %arg11[%c0_168, %c0_169] : memref<1x64xf32, #tpu.memory_space<vmem>>, vector<1x64xf32>
    %332 = arith.addf %330, %331 : vector<1x64xf32>
    %cst_170 = arith.constant 0.000000e+00 : f32
    %333 = vector.broadcast %cst_170 : f32 to vector<1x64xf32>
    %334 = arith.cmpf oge, %332, %333 : vector<1x64xf32>
    %cst_171 = arith.constant 0.00999999977 : f32
    %335 = vector.broadcast %cst_171 : f32 to vector<1x64xf32>
    %336 = arith.mulf %335, %332 : vector<1x64xf32>
    %337 = arith.select %334, %332, %336 : vector<1x64xi1>, vector<1x64xf32>
    %338 = arith.truncf %337 : vector<1x64xf32> to vector<1x64xbf16>
    %c0_172 = arith.constant 0 : index
    %c0_173 = arith.constant 0 : index
    %339 = vector.load %arg12[%c0_172, %c0_173] : memref<64x128xbf16, #tpu.memory_space<vmem>>, vector<64x128xbf16>
    %cst_174 = arith.constant dense<0.000000e+00> : vector<1x128xf32>
    %340 = tpu.matmul %338, %339, %cst_174 {dimension_numbers = #tpu.dot_dimension_numbers<[1], [0], [0], [1], [0, 0, 1, 1], [], []>} : vector<1x64xbf16>, vector<64x128xbf16>, vector<1x128xf32> -> vector<1x128xf32>
    %c0_175 = arith.constant 0 : index
    %c0_176 = arith.constant 0 : index
    %341 = vector.load %arg13[%c0_175, %c0_176] : memref<1x128xf32, #tpu.memory_space<vmem>>, vector<1x128xf32>
    %342 = arith.addf %340, %341 : vector<1x128xf32>
    %c0_177 = arith.constant 0 : index
    %c0_178 = arith.constant 0 : index
    %c0_179 = arith.constant 0 : index
    %343 = vector.load %arg14[%c0_177, %c0_178, %c0_179] : memref<1x1x128xf32, #tpu.memory_space<vmem>>, vector<1x1x128xf32>
    %344 = vector.shape_cast %343 : vector<1x1x128xf32> to vector<1x128xf32>
    %345 = vector.shape_cast %342 : vector<1x128xf32> to vector<1x1x128xf32>
    tpu.vector_store %arg14[%c0_177, %c0_178, %c0_179], %345 {strides = array<i32>} : memref<1x1x128xf32, #tpu.memory_space<vmem>>, vector<1x1x128xf32>,
    return
  }
  func.func @transform_0(%arg0: i32) -> (i32, i32, i32) {
    %c0_i32 = arith.constant 0 : i32
    %c0_i32_0 = arith.constant 0 : i32
    %c0_i32_1 = arith.constant 0 : i32
    return %arg0, %c0_i32, %c0_i32_0 : i32, i32, i32
  }
  func.func @transform_1(%arg0: i32) -> (i32, i32, i32) {
    %c0_i32 = arith.constant 0 : i32
    %c0_i32_0 = arith.constant 0 : i32
    %c0_i32_1 = arith.constant 0 : i32
    %c0_i32_2 = arith.constant 0 : i32
    return %c0_i32, %c0_i32_0, %c0_i32_1 : i32, i32, i32
  }
  func.func @transform_2(%arg0: i32) -> (i32, i32) {
    %c0_i32 = arith.constant 0 : i32
    %c0_i32_0 = arith.constant 0 : i32
    %c0_i32_1 = arith.constant 0 : i32
    return %c0_i32, %c0_i32_0 : i32, i32
  }
  func.func @transform_3(%arg0: i32) -> (i32, i32) {
    %c0_i32 = arith.constant 0 : i32
    %c0_i32_0 = arith.constant 0 : i32
    %c0_i32_1 = arith.constant 0 : i32
    return %c0_i32, %c0_i32_0 : i32, i32
  }
  func.func @transform_4(%arg0: i32) -> (i32, i32, i32) {
    %c0_i32 = arith.constant 0 : i32
    %c0_i32_0 = arith.constant 0 : i32
    %c0_i32_1 = arith.constant 0 : i32
    %c0_i32_2 = arith.constant 0 : i32
    return %c0_i32, %c0_i32_0, %c0_i32_1 : i32, i32, i32
  }
  func.func @transform_5(%arg0: i32) -> (i32, i32) {
    %c0_i32 = arith.constant 0 : i32
    %c0_i32_0 = arith.constant 0 : i32
    %c0_i32_1 = arith.constant 0 : i32
    return %c0_i32, %c0_i32_0 : i32, i32
  }
  func.func @transform_6(%arg0: i32) -> (i32, i32) {
    %c0_i32 = arith.constant 0 : i32
    %c0_i32_0 = arith.constant 0 : i32
    %c0_i32_1 = arith.constant 0 : i32
    return %c0_i32, %c0_i32_0 : i32, i32
  }
  func.func @transform_7(%arg0: i32) -> (i32, i32, i32) {
    %c0_i32 = arith.constant 0 : i32
    %c0_i32_0 = arith.constant 0 : i32
    %c0_i32_1 = arith.constant 0 : i32
    %c0_i32_2 = arith.constant 0 : i32
    return %c0_i32, %c0_i32_0, %c0_i32_1 : i32, i32, i32
  }
  func.func @transform_8(%arg0: i32) -> (i32, i32) {
    %c0_i32 = arith.constant 0 : i32
    %c0_i32_0 = arith.constant 0 : i32
    %c0_i32_1 = arith.constant 0 : i32
    return %c0_i32, %c0_i32_0 : i32, i32
  }
  func.func @transform_9(%arg0: i32) -> (i32, i32) {
    %c0_i32 = arith.constant 0 : i32
    %c0_i32_0 = arith.constant 0 : i32
    %c0_i32_1 = arith.constant 0 : i32
    return %c0_i32, %c0_i32_0 : i32, i32
  }
  func.func @transform_10(%arg0: i32) -> (i32, i32) {
    %c0_i32 = arith.constant 0 : i32
    %c0_i32_0 = arith.constant 0 : i32
    %c0_i32_1 = arith.constant 0 : i32
    return %c0_i32, %c0_i32_0 : i32, i32
  }
  func.func @transform_11(%arg0: i32) -> (i32, i32) {
    %c0_i32 = arith.constant 0 : i32
    %c0_i32_0 = arith.constant 0 : i32
    %c0_i32_1 = arith.constant 0 : i32
    return %c0_i32, %c0_i32_0 : i32, i32
  }
  func.func @transform_12(%arg0: i32) -> (i32, i32) {
    %c0_i32 = arith.constant 0 : i32
    %c0_i32_0 = arith.constant 0 : i32
    %c0_i32_1 = arith.constant 0 : i32
    return %c0_i32, %c0_i32_0 : i32, i32
  }
  func.func @transform_13(%arg0: i32) -> (i32, i32, i32) {
    %c0_i32 = arith.constant 0 : i32
    %c0_i32_0 = arith.constant 0 : i32
    %c0_i32_1 = arith.constant 0 : i32
    return %arg0, %c0_i32, %c0_i32_0 : i32, i32, i32
  }
}

</mosaic_0001>

<bundles_post_ra>
// kernel: net_shallow_forward.1
= control target key start
LH: loop header
LB: loop body
LE: loop exit
PB: predicated region body
PF: predicated region fallthrough
CT: control target
= control target key end

     0   :  { %s9469_s0 = inlined_call_operand.vmem [shape: f32[2,3,1152], index: 0, kind: input, shape index: {}]   ;;  %s9470_s1 = inlined_call_operand.vmem [shape: bf16[9,8,3], index: 1, kind: input, shape index: {}]   ;;  %s9471_s2 = inlined_call_operand.vmem [shape: f32[8,1], index: 2, kind: input, shape index: {}]   ;;  %s9472_s3 = inlined_call_operand.hbm [shape: bf16[1024,320], index: 3, kind: input, shape index: {}]   ;;  %s9473_s4 = inlined_call_operand.vmem [shape: bf16[9,16,8], index: 4, kind: input, shape index: {}]   ;;  %s9474_s5 = inlined_call_operand.vmem [shape: f32[16,1], index: 5, kind: input, shape index: {}]   ;;  %s9475_s6 = inlined_call_operand.vmem [shape: bf16[256,64], index: 6, kind: input, shape index: {}]   ;;  %s9476_s7 = inlined_call_operand.vmem [shape: bf16[16,64,64], index: 7, kind: input, shape index: {}]   ;;  %s9477_s8 = inlined_call_operand.vmem [shape: f32[1,64], index: 8, kind: input, shape index: {}]   ;;  %s9478_s9 = inlined_call_operand.vmem [shape: bf16[64,64], index: 9, kind: input, shape index: {}]   ;;  %s9479_s10 = inlined_call_operand.vmem [shape: f32[1,64], index: 10, kind: input, shape index: {}]   ;;  %s9480_s11 = inlined_call_operand.vmem [shape: bf16[64,128], index: 11, kind: input, shape index: {}]   ;;  %s9481_s12 = inlined_call_operand.vmem [shape: f32[1,128], index: 12, kind: input, shape index: {}]   ;;  %s9482_s13 = inlined_call_operand.hbm [shape: f32[2,1,128], index: 13, kind: output, shape index: {}]  }
   0x1   :  { %9496 = sst [smem:[#allocation8_spill]] %s9469_s0 }
   0x2   :  { %9497 = sst [smem:[#allocation9_spill]] %s9470_s1 }
   0x3   :  { %9498 = sst [smem:[#allocation10_spill]] %s9471_s2 }
   0x4   :  { %9499 = sst [smem:[#allocation11_spill]] %s9472_s3 }
   0x5   :  { %18 = vsyncpa [#allocation3], 0 }
   0x6   :  { %19 = vsyncpa [#allocation4], 0 }
   0x7   :  { %21 = vsyncpa [#allocation4 + $0x1], 0  ;;  %s8007_s25 = smov 0   ;;  %s8009_s26 = smov 0  }
   0x8   :  { %s8011_s27 = smov 0   ;;  %s8013_s28 = smov 0  }
   0x9 LB: > { %s8028_s29 = sadd.s32 4294967295, %s7915_s28   ;;  %s5921_s30 = sadd.s32 4294967294, %s7915_s28   ;;  %s7915_s28 = sphi %s8013_s28, %s9631_s28   ;;  %s7911_s27 = sphi %s8011_s27, %s9630_s27   ;;  %s7907_s26 = sphi %s8009_s26, %s9629_s26   ;;  %s7903_s25 = sphi %s8007_s25, %s9628_s25  }
   0xa   : > { %s8032_s14 = sadd.s32 1, %s7915_s28   ;;  %s312_s15 = sadd.s32 1, %s7911_s27 }
   0xb   : > { %s309_s16 = ssub.s32 %s7915_s28, %s8032_s14  ;;  %p322_p0 = scmp.ne.s32.totalorder %s7911_s27, %s7907_s26 }
   0xc   : > { %p310_p1 = scmp.eq.s32.totalorder %s309_s16, 0  ;;  %p323_p2 = scmp.eq.s32.totalorder %s8028_s29, 1 }
   0xd   : > { %p328_p3 = scmp.ne.s32.totalorder %s7907_s26, %s7903_s25  ;;  %p329_p4 = scmp.eq.s32.totalorder %s5921_s30, 1 }
   0xe   : > { %s8043_s17 = scalar_select %p310_p1, %s7911_s27, %s312_s15  }
   0xf   : > { %p8045_p5 = por %p323_p2, %p322_p0  ;;  %p8049_p6 = por %p329_p4, %p328_p3 }
  0x10   : > { %p5922_p7 = scmp.ge.s32.totalorder %s7915_s28, 1  ;;  %p336_p8 = scmp.lt.s32.totalorder %s7915_s28, 3 }
  0x11   : > { %p7642_p9 = scmp.eq.s32.totalorder %s8028_s29, 0  ;;  %s9502_s3 = sld [smem:[#allocation11_spill]] }
  0x12   : > { %p337_p10 = pnand %p5922_p7, %p336_p8  ;;  %s7917_s23 = smov [#allocation2]  }
  0x13   : > { %s355_s24 = sshll.u32 %s7917_s23, 4  ;;  %s7918_s30 = smov 192   ;;  %s356_s24 = int_to_ptr.vmem [resolvable:$true] %s355_s24 }
  0x14   : > { %p7634_p11 = pneg %p337_p10  ;;  %s7919_s15 = smov 12  }
  0x15   : > { %406 = sbr.rel (%p337_p10) target bundleno = 1793 (0x701), region = 72 }
  0x16   : > { %p7635_p12 = pnand %p7642_p9, %p7634_p11 }
  0x17   : > { %s353_s22 = sshll.u32 %s9502_s3, 4  ;;  %s354_s22 = int_to_ptr.hbm [resolvable:$true] %s353_s22 }
  0x18   : > { %7637 = dma.hbm_to_vmem [thread:$0]  (!%p7635_p12), %s354_s22, 24576, %s356_s24, [#allocation3], %s7918_s30, %s7918_s30, %s7919_s15  }
  0x1a   : > { %7894 = dma.done.wait (%p7642_p9), [#allocation3], 24576  }
  0x1b   : > { %7896 = vsyncadd (%p7642_p9), [#allocation3], 4294942720  ;;  %p450_p13 = scmp.lt.s32.totalorder %s8028_s29, 1  ;;  %s9503_s0 = sld [smem:[#allocation8_spill]]  ;;  %vm749_vm0 = vcmask 1040384   ;;  %vm750_vm1 = vcmask 1041408  }
  0x1c   : > { %s7921_s22 = smov 97   ;;  %s7922_s24 = smov 95   ;;  %vm9483_vm2 = vcmask 785408   ;;  %vm9485_vm3 = vcmask 23552   ;;  %vm9484_vm4 = vcmask 793600   ;;  %vm9490_vm13 = vcmask 777216  }
  0x1d   : > { %s451_s16 = scalar_select %p450_p13, %s8028_s29, 1 }
  0x1e   : > { %s7923_s30 = smov 65   ;;  %s7924_s15 = smov 64  }
  0x1f   : > { %s7627_s20 = smul.u32 36, %s451_s16  ;;  %s9504_s1 = sld [smem:[#allocation9_spill]] }
  0x20   : > { %s7926_s21 = smov 63   ;;  %s7928_s16 = smov 32  }
  0x21   : > { %s454_s3 = scalar_lea.vmem %s9503_s0, %s7627_s20  ;;  %s9582_s2 = sld [smem:[#allocation10_spill]] }
  0x22   : > { %v8070_v0 = vld [vmem:[%s454_s3 + $0x10] sm:$0x77]  ;;  %v8072_v1 = vld [vmem:[%s454_s3] sm:$0x77]  ;;  %v8075_v2 = vld [vmem:[%s454_s3 + $0x8] sm:$0x77] }
  0x23   : > { %607 = vst [vmem:[#allocation1 + $0x20] ss:$2 sm:$0xff] %v8070_v0  ;;  %v8077_v3 = vld [vmem:[%s454_s3 + $0x18] sm:$0x77]  ;;  %v8082_v4 = vld [vmem:[%s454_s3 + $0x20] sm:$0x7] }
  0x24   : > { %603 = vst [vmem:[#allocation1] ss:$2 sm:$0xff] %v8072_v1  ;;  %s7920_s3 = smov 96   ;;  %s7932_s20 = smov 113  }
  0x25   : > { %605 = vst [vmem:[#allocation1 + $0x10] ss:$2 sm:$0xff] %v8075_v2  ;;  %s7934_s23 = smov 81  }
  0x26   : > { %609 = vst [vmem:[#allocation1 + $0x30] ss:$2 sm:$0xff] %v8077_v3 }
  0x2a   : > { %v614_v5 = vld.sshfl [vmem:[#allocation1 + $0x20] sm:$0xff pattern:$0x75316420]  ;;  %v8084_v6 = vld.sshfl [vmem:[#allocation1 + $0x28] sm:$0xff pattern:$0x75316420] }
  0x2b   : > { %678 = vst [vmem:[#allocation1 + $0x20] ss:$2 sm:$0xff] %v8070_v0  ;;  %v8087_v7 = vld.sshfl [vmem:[#allocation1] sm:$0xff pattern:$0x75316420] }
  0x2c   : > { %v8089_v8 = vld.sshfl [vmem:[#allocation1 + $0x8] sm:$0xff pattern:$0x75316420]  ;;  %v612_v9 = vld.sshfl [vmem:[#allocation1 + $0x10] sm:$0xff pattern:$0x75316420] }
  0x2d   : > { %618 = vst [vmem:[#allocation1] ss:$2 sm:$0xff] %v8082_v4  ;;  %v613_v10 = vld.sshfl [vmem:[#allocation1 + $0x18] sm:$0xff pattern:$0x75316420]  ;;  %v7702_v43 = vpack.i.bf16 %v8089_v8, %v8087_v7 }
  0x2e   : > { %676 = vst [vmem:[#allocation1 + $0x10] ss:$2 sm:$0xff] %v8075_v2  ;;  %v8093_v11 = vld.sshfl [vmem:[#allocation1 + $0x30] sm:$0xff pattern:$0x75316420]  ;;  %v7697_v38 = vpack.i.bf16 %v613_v10, %v612_v9  ;;  %v7925_v10 = vmov 65535  }
  0x2f   : > { %v617_v12 = vld.sshfl [vmem:[#allocation1 + $0x38] sm:$0xff pattern:$0x75316420] }
  0x30   : > { %680 = vst [vmem:[#allocation1 + $0x30] ss:$2 sm:$0xff] %v8077_v3  ;;  %v7707_v44 = vpack.i.bf16 %v617_v12, %v8093_v11  ;;  %v751_v11 = vsel %vm749_vm0, 4294967295, %v7925_v10 }
  0x32   : > { %v685_v13 = vld.sshfl [vmem:[#allocation1 + $0x20] sm:$0xff pattern:$0x75316420]  ;;  %v686_v14 = vld.sshfl [vmem:[#allocation1 + $0x28] sm:$0xff pattern:$0x75316420] }
  0x33   : > { %v704_v15 = vpack.c.bf16 %v685_v13, %v685_v13  ;;  %1032 = vst [vmem:[#allocation1 + $0x20] ss:$2 sm:$0xff] %v8070_v0  ;;  %v705_v37 = vpack.c.bf16 %v686_v14, %v686_v14  ;;  %v461_v13 = vlaneseq }
  0x34   : > { %v619_v16 = vld.sshfl [vmem:[#allocation1] sm:$0xff pattern:$0x75316420] }
  0x35   : > { %726 = vrot.lane.b32.xlu1 %v704_v15, %s7920_s3  ;;  %674 = vst [vmem:[#allocation1] ss:$2 sm:$0xff] %v8072_v1  ;;  %v683_v17 = vld.sshfl [vmem:[#allocation1 + $0x10] sm:$0xff pattern:$0x75316420] }
  0x36   : > { %v702_v18 = vpack.c.bf16 %v683_v17, %v683_v17  ;;  %v684_v19 = vld.sshfl [vmem:[#allocation1 + $0x18] sm:$0xff pattern:$0x75316420]  ;;  %v8145_v17 = vsel %vm750_vm1, %v751_v11, 0 }
  0x37   : > { %1030 = vst [vmem:[#allocation1 + $0x10] ss:$2 sm:$0xff] %v8075_v2  ;;  %v688_v20 = vld.sshfl [vmem:[#allocation1 + $0x38] sm:$0xff pattern:$0x75316420]  ;;  %v703_v22 = vpack.c.bf16 %v684_v19, %v684_v19 }
  0x38   : > { %722 = vrot.lane.b32.xlu0 %v702_v18, %s7920_s3  ;;  %v687_v21 = vld.sshfl [vmem:[#allocation1 + $0x30] sm:$0xff pattern:$0x75316420]  ;;  %v707_v32 = vpack.c.bf16 %v688_v20, %v688_v20 }
  0x39   : > { %1034 = vst [vmem:[#allocation1 + $0x30] ss:$2 sm:$0xff] %v8077_v3  ;;  %v706_v31 = vpack.c.bf16 %v687_v21, %v687_v21 }
  0x3a   : > { %v1039_v41 = vld.sshfl [vmem:[#allocation1 + $0x20] sm:$0xff pattern:$0x75316420]  ;;  %v1040_v42 = vld.sshfl [vmem:[#allocation1 + $0x28] sm:$0xff pattern:$0x75316420] }
  0x3b   : > { %1241 = vst [vmem:[#allocation1 + $0x20] ss:$2 sm:$0xff] %v8070_v0 }
  0x3c   : > { %v681_v23 = vld.sshfl [vmem:[#allocation1] sm:$0xff pattern:$0x75316420]  ;;  %v682_v24 = vld.sshfl [vmem:[#allocation1 + $0x8] sm:$0xff pattern:$0x75316420] }
  0x3d   : > { %v700_v25 = vpack.c.bf16 %v681_v23, %v681_v23  ;;  %v701_v26 = vpack.c.bf16 %v682_v24, %v682_v24  ;;  %689 = vst [vmem:[#allocation1] ss:$2 sm:$0xff] %v8082_v4  ;;  %v8152_v24 = vand.u32 127, %v461_v13 }
  0x3e   : > { %v1037_v27 = vld.sshfl [vmem:[#allocation1 + $0x10] sm:$0xff pattern:$0x75316420]  ;;  %v1038_v28 = vld.sshfl [vmem:[#allocation1 + $0x18] sm:$0xff pattern:$0x75316420] }
  0x3f   : > { %718 = vrot.lane.b32.xlu1 %v700_v25, %s7920_s3  ;;  %720 = vrot.lane.b32.xlu2 %v701_v26, %s7920_s3  ;;  %1239 = vst [vmem:[#allocation1 + $0x10] ss:$2 sm:$0xff] %v8075_v2  ;;  %v7712_v46 = vpack.i.bf16 %v1038_v28, %v1037_v27  ;;  %v474_v28 = vand.u32 31, %v8152_v24 }
  0x40   : > { %724 = vrot.lane.b32.xlu0 %v703_v22, %s7920_s3  ;;  %v1041_v29 = vld.sshfl [vmem:[#allocation1 + $0x30] sm:$0xff pattern:$0x75316420]  ;;  %v1042_v30 = vld.sshfl [vmem:[#allocation1 + $0x38] sm:$0xff pattern:$0x75316420] }
  0x41   : > { %1243 = vst [vmem:[#allocation1 + $0x30] ss:$2 sm:$0xff] %v8077_v3  ;;  %v7722_v48 = vpack.i.bf16 %v1042_v30, %v1041_v29  ;;  %v8161_v29 = vld [vmem:[%s9504_s1 + $0x4] sm:$0xf]  ;;  %vm8170_vm5 = vcmp.ge.s32.totalorder %v474_v28, 1  ;;  %vm8313_vm14 = vcmp.lt.s32.totalorder %v474_v28, 31 }
  0x42   : > { %v1248_v50 = vld.sshfl [vmem:[#allocation1 + $0x20] sm:$0xff pattern:$0x75316420]  ;;  %v1249_v62 = vld.sshfl [vmem:[#allocation1 + $0x28] sm:$0xff pattern:$0x75316420] }
  0x43   : > { %1452 = vst [vmem:[#allocation1 + $0x20] ss:$2 sm:$0xff] %v8070_v0  ;;  %v8327_v28 = vld [vmem:[%s9504_s1] sm:$0xf] }
  0x44   : > { %v690_v33 = vld.sshfl [vmem:[#allocation1] sm:$0xff pattern:$0x75316420] }
  0x45   : > { %v708_v34 = vpack.c.bf16 %v690_v33, %v690_v33  ;;  %1028 = vst [vmem:[#allocation1] ss:$2 sm:$0xff] %v8072_v1 }
  0x46   : > { %v1246_v35 = vld.sshfl [vmem:[#allocation1 + $0x10] sm:$0xff pattern:$0x75316420]  ;;  %v1247_v36 = vld.sshfl [vmem:[#allocation1 + $0x18] sm:$0xff pattern:$0x75316420] }
  0x47   : > { %730 = vrot.lane.b32.xlu2 %v706_v31, %s7920_s3  ;;  %734 = vrot.lane.b32.xlu1 %v708_v34, %s7920_s3  ;;  %1450 = vst [vmem:[#allocation1 + $0x10] ss:$2 sm:$0xff] %v8075_v2  ;;  %v7727_v49 = vpack.i.bf16 %v1247_v36, %v1246_v35 }
  0x48   : > { %732 = vrot.lane.b32.xlu0 %v707_v32, %s7920_s3  ;;  %v1250_v51 = vld.sshfl [vmem:[#allocation1 + $0x30] sm:$0xff pattern:$0x75316420]  ;;  %v1251_v52 = vld.sshfl [vmem:[#allocation1 + $0x38] sm:$0xff pattern:$0x75316420] }
  0x49   : > { %v7737_v53 = vpack.i.bf16 %v1251_v52, %v1250_v51  ;;  %1454 = vst [vmem:[#allocation1 + $0x30] ss:$2 sm:$0xff] %v8077_v3 }
  0x4a   : > { %v1459_v14 = vld.sshfl [vmem:[#allocation1 + $0x20] sm:$0xff pattern:$0x75316420] }
  0x4b   : > { %v1478_v15 = vpack.c.bf16 %v1459_v14, %v1459_v14 }
  0x4c   : > { %v1035_v39 = vld.sshfl [vmem:[#allocation1] sm:$0xff pattern:$0x75316420]  ;;  %v1036_v40 = vld.sshfl [vmem:[#allocation1 + $0x8] sm:$0xff pattern:$0x75316420] }
  0x4d   : > { %1043 = vst [vmem:[#allocation1] ss:$2 sm:$0xff] %v8082_v4  ;;  %v7717_v47 = vpack.i.bf16 %v1036_v40, %v1035_v39 }
  0x4e   : > { %v1458_v58 = vld.sshfl [vmem:[#allocation1 + $0x18] sm:$0xff pattern:$0x75316420]  ;;  %v1457_v60 = vld.sshfl [vmem:[#allocation1 + $0x10] sm:$0xff pattern:$0x75316420] }
  0x4f   : > { %728 = vrot.lane.b32.xlu2 %v705_v37, %s7920_s3  ;;  %628 = vrot.lane.b32.xlu1 %v614_v5, %s7921_s22  ;;  %v1477_v59 = vpack.c.bf16 %v1458_v58, %v1458_v58  ;;  %v1476_v63 = vpack.c.bf16 %v1457_v60, %v1457_v60  ;;  %1660 = vst [vmem:[#allocation1 + $0x10] ss:$2 sm:$0xff] %v8075_v2  ;;  %v8211_v60 = vadd.s32 384, %v8152_v24 }
  0x50   : > { %7698 = vrot.lane.b32.xlu0 %v7697_v38, %s7921_s22  ;;  %v1461_v30 = vld.sshfl [vmem:[#allocation1 + $0x30] sm:$0xff pattern:$0x75316420] }
  0x51   : > { %v1480_v32 = vpack.c.bf16 %v1461_v30, %v1461_v30  ;;  %v495_v11 = vand.u32 31, %v8211_v60 }
  0x53   : > { %vm8253_vm9 = vcmp.ge.s32.totalorder %v495_v11, 1  ;;  %vm8357_vm1 = vcmp.lt.s32.totalorder %v495_v11, 31 }
  0x54   : > { %v1044_v45 = vld.sshfl [vmem:[#allocation1] sm:$0xff pattern:$0x75316420] }
  0x55   : > { %1237 = vst [vmem:[#allocation1] ss:$2 sm:$0xff] %v8072_v1 }
  0x56   : > { %v1667_v33 = vld.sshfl [vmem:[#allocation1 + $0x10] sm:$0xff pattern:$0x75316420]  ;;  %v1668_v37 = vld.sshfl [vmem:[#allocation1 + $0x18] sm:$0xff pattern:$0x75316420] }
  0x57   : > { %7703 = vrot.lane.b32.xlu2 %v7702_v43, %s7921_s22  ;;  %636 = vrot.lane.b32.xlu1 %v619_v16, %s7921_s22  ;;  %v1462_v16 = vld.sshfl [vmem:[#allocation1 + $0x38] sm:$0xff pattern:$0x75316420]  ;;  %1869 = vst [vmem:[#allocation1 + $0x10] ss:$2 sm:$0xff] %v8075_v2 }
  0x58   : > { %7708 = vrot.lane.b32.xlu0 %v7707_v44, %s7921_s22  ;;  %v1481_v19 = vpack.c.bf16 %v1462_v16, %v1462_v16  ;;  %1664 = vst [vmem:[#allocation1 + $0x30] ss:$2 sm:$0xff] %v8077_v3 }
  0x5c   : > { %v1244_v54 = vld.sshfl [vmem:[#allocation1] sm:$0xff pattern:$0x75316420]  ;;  %v1245_v55 = vld.sshfl [vmem:[#allocation1 + $0x8] sm:$0xff pattern:$0x75316420] }
  0x5d   : > { %1252 = vst [vmem:[#allocation1] ss:$2 sm:$0xff] %v8082_v4  ;;  %v7732_v57 = vpack.i.bf16 %v1245_v55, %v1244_v54 }
  0x5f   : > { %630 = vrot.lane.b32.xlu2 %v8084_v6, %s7921_s22  ;;  %1053 = vrot.lane.b32.xlu1 %v1039_v41, %s7922_s24  ;;  %v1671_v14 = vld.sshfl [vmem:[#allocation1 + $0x30] sm:$0xff pattern:$0x75316420] }
  0x60   : > { %7713 = vrot.lane.b32.xlu0 %v7712_v46, %s7922_s24 }
  0x64   : > { %v1253_v56 = vld.sshfl [vmem:[#allocation1] sm:$0xff pattern:$0x75316420] }
  0x65   : > { %1448 = vst [vmem:[#allocation1] ss:$2 sm:$0xff] %v8072_v1 }
  0x67   : > { %7718 = vrot.lane.b32.xlu2 %v7717_v47, %s7922_s24  ;;  %1061 = vrot.lane.b32.xlu1 %v1044_v45, %s7922_s24 }
  0x68   : > { %7723 = vrot.lane.b32.xlu0 %v7722_v48, %s7922_s24 }
  0x6c   : > { %v1456_v61 = vld.sshfl [vmem:[#allocation1 + $0x8] sm:$0xff pattern:$0x75316420]  ;;  %v1455_v7 = vld.sshfl [vmem:[#allocation1] sm:$0xff pattern:$0x75316420] }
  0x6d   : > { %v1475_v5 = vpack.c.bf16 %v1456_v61, %v1456_v61  ;;  %v1474_v8 = vpack.c.bf16 %v1455_v7, %v1455_v7  ;;  %1463 = vst [vmem:[#allocation1] ss:$2 sm:$0xff] %v8082_v4 }
  0x6f   : > { %1055 = vrot.lane.b32.xlu2 %v1040_v42, %s7922_s24  ;;  %1262 = vrot.lane.b32.xlu1 %v1248_v50, %s7923_s30  ;;  %v7742_v42 = vpack.i.bf16 %v1668_v37, %v1667_v33  ;;  %v1460_v50 = vld.sshfl [vmem:[#allocation1 + $0x28] sm:$0xff pattern:$0x75316420] }
  0x70   : > { %7728 = vrot.lane.b32.xlu0 %v7727_v49, %s7923_s30  ;;  %1662 = vst [vmem:[#allocation1 + $0x20] ss:$2 sm:$0xff] %v8070_v0  ;;  %v1479_v55 = vpack.c.bf16 %v1460_v50, %v1460_v50 }
  0x74   : > { %v1464_v25 = vld.sshfl [vmem:[#allocation1] sm:$0xff pattern:$0x75316420] }
  0x75   : > { %v1482_v27 = vpack.c.bf16 %v1464_v25, %v1464_v25  ;;  %1658 = vst [vmem:[#allocation1] ss:$2 sm:$0xff] %v8072_v1 }
  0x77   : > { %1270 = vrot.lane.b32.xlu1 %v1253_v56, %s7923_s30  ;;  %7733 = vrot.lane.b32.xlu2 %v7732_v57, %s7923_s30  ;;  %v8205_v57 = vadd.s32 256, %v8152_v24  ;;  %v1669_v7 = vld.sshfl [vmem:[#allocation1 + $0x20] sm:$0xff pattern:$0x75316420] }
  0x78   : > { %7738 = vrot.lane.b32.xlu0 %v7737_v53, %s7923_s30  ;;  %v8195_v53 = vadd.s32 512, %v8152_v24 }
  0x7c   : > { %v1666_v37 = vld.sshfl [vmem:[#allocation1 + $0x8] sm:$0xff pattern:$0x75316420] }
  0x7f   : > { %1498 = vrot.lane.b32.xlu1 %v1477_v59, %s7924_s15  ;;  %1264 = vrot.lane.b32.xlu2 %v1249_v62, %s7923_s30  ;;  %v8208_v59 = vadd.s32 128, %v8152_v24  ;;  %s7935_s30 = smov 80  }
  0x80   : > { %1496 = vrot.lane.b32.xlu0 %v1476_v63, %s7924_s15  ;;  %v502_v63 = vand.u32 31, %v8195_v53 }
  0x81   : > { %v481_v10 = vand.u32 31, %v8208_v59 }
  0x82   : > { %vm8229_vm6 = vcmp.ge.s32.totalorder %v502_v63, 1 }
  0x83   : > { %vm8247_vm8 = vcmp.ge.s32.totalorder %v481_v10, 1  ;;  %vm8351_vm0 = vcmp.lt.s32.totalorder %v481_v10, 31 }
  0x87   : > { %1494 = vrot.lane.b32.xlu1 %v1475_v5, %s7924_s15  ;;  %1500 = vrot.lane.b32.xlu2 %v1478_v15, %s7924_s15  ;;  %v1672_v15 = vld.sshfl [vmem:[#allocation1 + $0x38] sm:$0xff pattern:$0x75316420] }
  0x88   : > { %1492 = vrot.lane.b32.xlu0 %v1474_v8, %s7924_s15  ;;  %v488_v8 = vand.u32 31, %v8205_v57  ;;  %1873 = vst [vmem:[#allocation1 + $0x30] ss:$2 sm:$0xff] %v8077_v3  ;;  %v9527_v57 = vmov 0 }
  0x89   : > { %v9528_v57 = vsel %vm8357_vm1, 4294967295, %v9527_v57 }
  0x8a   : > { %vm8237_vm7 = vcmp.ge.s32.totalorder %v488_v8, 1  ;;  %vm8344_vm15 = vcmp.lt.s32.totalorder %v488_v8, 31 }
  0x8f   : > { %1508 = vrot.lane.b32.xlu1 %v1482_v27, %s7924_s15  ;;  %1504 = vrot.lane.b32.xlu2 %v1480_v32, %s7924_s15  ;;  %v8262_v32 = vadd.s32 896, %v8152_v24 }
  0x90   : > { %1506 = vrot.lane.b32.xlu0 %v1481_v19, %s7924_s15  ;;  %v8242_v19 = vadd.s32 768, %v8152_v24 }
  0x97   : > { %1502 = vrot.lane.b32.xlu2 %v1479_v55, %s7924_s15  ;;  %1683 = vrot.lane.b32.xlu1 %v1669_v7, %s7926_s21  ;;  %s7927_s15 = smov 33  }
  0x98   : > { %7743 = vrot.lane.b32.xlu0 %v7742_v42, %s7926_s21  ;;  %v516_v42 = vand.u32 31, %v8242_v19 }
  0x99   : > { %v721_v6 = vpop.permute.xlu2 %720 }
  0x9a   : > { %vm8300_vm11 = vcmp.ge.s32.totalorder %v516_v42, 1 }
  0xa1   : > { %v8143_v9 = vpop.permute.xlu2 %730 }
  0xa7   : > { %v727_v12 = vpop.permute.xlu1 %726 }
  0xa9   : > { %v729_v18 = vpop.permute.xlu2 %728 }
  0xaa   : > { %v723_v20 = vpop.permute.xlu0 %722  ;;  %v742_v21 = vsel %vm9483_vm2, %v729_v18, %v8143_v9  ;;  %v741_v31 = vsel %vm9483_vm2, %v727_v12, %v729_v18 }
  0xab   : > { %v738_v22 = vsel %vm9483_vm2, %v721_v6, %v723_v20  ;;  %v769_v23 = vand.u32 %v8145_v17, %v742_v21  ;;  %v766_v46 = vand.u32 %v8145_v17, %v741_v31 }
  0xac   : > { %v757_v26 = vand.u32 %v8145_v17, %v738_v22 }
  0xae   : > { %797 = vmatpush.bf16.msra.mxu1 %v757_v26 }
  0xb1   : > { %5930 = vmatmul.msk.bf16.vlgmr.msra.gmra.mxu1 %vm9485_vm3, %v8161_v29  ;;  %v719_v34 = vpop.permute.xlu1 %718  ;;  %v8174_v36 = vpop.permute.xlu2 %7703 }
  0xb2   : > { %849 = vmatpush.bf16.msrb.mxu1 %v769_v23  ;;  %v725_v38 = vpop.permute.xlu0 %724  ;;  %v737_v39 = vsel %vm9483_vm2, %v719_v34, %v721_v6  ;;  %v7706_v40 = vunpack.i.h.bf16 %v8174_v36  ;;  %v7705_v41 = vunpack.i.l.bf16 %v8174_v36  ;;  %v1665_v34 = vld.sshfl [vmem:[#allocation1] sm:$0xff pattern:$0x75316420] }
  0xb3   : > { %v754_v43 = vand.u32 %v8145_v17, %v737_v39  ;;  %v739_v44 = vsel %vm9483_vm2, %v723_v20, %v725_v38  ;;  %v740_v45 = vsel %vm9483_vm2, %v725_v38, %v727_v12  ;;  %v7752_v20 = vpack.i.bf16 %v1672_v15, %v1671_v14  ;;  %1673 = vst [vmem:[#allocation1] ss:$2 sm:$0xff] %v8082_v4 }
  0xb4   : > { %v760_v47 = vand.u32 %v8145_v17, %v739_v44  ;;  %v763_v48 = vand.u32 %v8145_v17, %v740_v45  ;;  %v639_v49 = vsel %vm9484_vm4, %v7705_v41, %v7706_v40  ;;  %v9521_v14 = vmov 0 }
  0xb5   : > { %784 = vmatpush.bf16.msra.mxu0 %v754_v43  ;;  %v655_v51 = vsel %vm8170_vm5, %v639_v49, 0.0  ;;  %7753 = vrot.lane.b32.xlu0 %v7752_v20, %s7926_s21  ;;  %v9522_v14 = vsel %vm8313_vm14, 4294967295, %v9521_v14 }
  0xb6   : > { %810 = vmatpush.bf16.msra.mxu2 %v760_v47  ;;  %823 = vmatpush.bf16.msra.mxu3 %v763_v48  ;;  %v664_v52 = vpack.c.bf16 %v655_v51, %v655_v51  ;;  %v523_v48 = vand.u32 31, %v8262_v32 }
  0xb8   : > { %5929 = vmatmul.msk.bf16.vlgmr.msra.gmra.mxu0 %vm9485_vm3, %v8161_v29  ;;  %v885_v54 = vand.u32 %v8145_v17, %v664_v52  ;;  %vm8307_vm12 = vcmp.ge.s32.totalorder %v523_v48, 1 }
  0xb9   : > { %836 = vmatpush.bf16.msrb.mxu0 %v766_v46  ;;  %5931 = vmatmul.msk.bf16.vlgmr.msra.gmra.mxu2 %vm9485_vm3, %v8161_v29  ;;  %v735_v56 = vpop.permute.xlu1 %734  ;;  %v631_v13 = vpop.permute.xlu2 %630 }
  0xba   : > { %5932 = vmatmul.msk.bf16.vlgmr.msra.gmra.mxu3 %vm9485_vm3, %v8161_v29  ;;  %v733_v58 = vpop.permute.xlu0 %732 }
  0xbb   : > { %v743_v61 = vsel %vm9483_vm2, %v8143_v9, %v733_v58  ;;  %v744_v62 = vsel %vm9483_vm2, %v733_v58, %v735_v56  ;;  %v8225_v9 = vadd.s32 640, %v8152_v24 }
  0xbc   : > { %v772_v5 = vand.u32 %v8145_v17, %v743_v61  ;;  %v775_v6 = vand.u32 %v8145_v17, %v744_v62  ;;  %v7747_v62 = vpack.i.bf16 %v1666_v37, %v1665_v34 }
  0xbd   : > { %915 = vmatpush.bf16.msra.mxu0 %v885_v54  ;;  %v509_v26 = vand.u32 31, %v8225_v9  ;;  %v9535_v9 = vmov 0 }
  0xbe   : > { %862 = vmatpush.bf16.msrb.mxu2 %v772_v5  ;;  %875 = vmatpush.bf16.msrb.mxu3 %v775_v6 }
  0xbf   : > { %vm8294_vm10 = vcmp.ge.s32.totalorder %v509_v26, 1  ;;  %7748 = vrot.lane.b32.xlu2 %v7747_v62, %s7926_s21  ;;  %vm8390_vm2 = vcmp.lt.s32.totalorder %v509_v26, 31 }
  0xc1   : > { %5934 = vmatmul.msk.bf16.vlgmr.msrb.gmra.mxu1 %vm9485_vm3, %v8161_v29  ;;  %v629_v18 = vpop.permute.xlu1 %628  ;;  %v8280_v49 = vpop.permute.xlu2 %7718 }
  0xc2   : > { %v7699_v21 = vpop.permute.xlu0 %7698  ;;  %v643_v25 = vsel %vm9484_vm4, %v629_v18, %v631_v13  ;;  %v7720_v50 = vunpack.i.l.bf16 %v8280_v49  ;;  %v7721_v61 = vunpack.i.h.bf16 %v8280_v49 }
  0xc3   : > { %v7701_v27 = vunpack.i.h.bf16 %v7699_v21  ;;  %v7700_v30 = vunpack.i.l.bf16 %v7699_v21  ;;  %v659_v31 = vsel %vm8229_vm6, %v643_v25, 0.0 }
  0xc4   : > { %v668_v33 = vpack.c.bf16 %v659_v31, %v659_v31  ;;  %v1064_v15 = vsel %vm9490_vm13, %v7720_v50, %v7721_v61 }
  0xc5   : > { %v641_v38 = vsel %vm9484_vm4, %v7700_v30, %v7701_v27  ;;  %v640_v39 = vsel %vm9484_vm4, %v7706_v40, %v7700_v30  ;;  %v642_v41 = vsel %vm9484_vm4, %v7701_v27, %v629_v18  ;;  %v1674_v18 = vld.sshfl [vmem:[#allocation1] sm:$0xff pattern:$0x75316420]  ;;  %v1080_v37 = vsel %vm8313_vm14, %v1064_v15, 0.0 }
  0xc6   : > { %v657_v43 = vsel %vm8237_vm7, %v641_v38, 0.0  ;;  %v656_v44 = vsel %vm8247_vm8, %v640_v39, 0.0  ;;  %v658_v45 = vsel %vm8253_vm9, %v642_v41, 0.0  ;;  %v897_v46 = vand.u32 %v8145_v17, %v668_v33  ;;  %1867 = vst [vmem:[#allocation1] ss:$2 sm:$0xff] %v8072_v1  ;;  %1691 = vrot.lane.b32.xlu1 %v1674_v18, %s7926_s21 }
  0xc7   : > { %v666_v36 = vpack.c.bf16 %v657_v43, %v657_v43  ;;  %v665_v47 = vpack.c.bf16 %v656_v44, %v656_v44  ;;  %v667_v40 = vpack.c.bf16 %v658_v45, %v658_v45  ;;  %v1876_v38 = vld.sshfl [vmem:[#allocation1 + $0x10] sm:$0xff pattern:$0x75316420]  ;;  %v1877_v39 = vld.sshfl [vmem:[#allocation1 + $0x18] sm:$0xff pattern:$0x75316420] }
  0xc8   : > { %5933 = vmatmul.msk.bf16.vlgmr.msrb.gmra.mxu0 %vm9485_vm3, %v8161_v29  ;;  %v7757_v45 = vpack.i.bf16 %v1877_v39, %v1876_v38  ;;  %2080 = vst [vmem:[#allocation1 + $0x10] ss:$2 sm:$0xff] %v8075_v2  ;;  %v9533_v39 = vmov 0  ;;  %vm9537_vm14 = vcmask 23552  }
  0xc9   : > { %5935 = vmatmul.msk.bf16.vlgmr.msrb.gmra.mxu2 %vm9485_vm3, %v8161_v29  ;;  %v888_v51 = vand.u32 %v8145_v17, %v665_v47  ;;  %v894_v52 = vand.u32 %v8145_v17, %v667_v40  ;;  %v891_v54 = vand.u32 %v8145_v17, %v666_v36  ;;  %967 = vmatpush.bf16.msrb.mxu0 %v897_v46  ;;  %v1670_v46 = vld.sshfl [vmem:[#allocation1 + $0x28] sm:$0xff pattern:$0x75316420] }
  0xca   : > { %5936 = vmatmul.msk.bf16.vlgmr.msrb.gmra.mxu3 %vm9485_vm3, %v8161_v29  ;;  %v7709_v58 = vpop.permute.xlu0 %7708  ;;  %v637_v29 = vpop.permute.xlu1 %636  ;;  %v1090_v40 = vpack.c.bf16 %v1080_v37, %v1080_v37  ;;  %1871 = vst [vmem:[#allocation1 + $0x20] ss:$2 sm:$0xff] %v8070_v0  ;;  %7758 = vrot.lane.b32.xlu0 %v7757_v45, %s7927_s15 }
  0xcb   : > { %928 = vmatpush.bf16.msra.mxu1 %v888_v51  ;;  %v7711_v5 = vunpack.i.h.bf16 %v7709_v58  ;;  %v7710_v6 = vunpack.i.l.bf16 %v7709_v58  ;;  %941 = vmatpush.bf16.msra.mxu2 %v891_v54 }
  0xcc   : > { %954 = vmatpush.bf16.msra.mxu3 %v894_v52  ;;  %1685 = vrot.lane.b32.xlu2 %v1670_v46, %s7926_s21  ;;  %v8766_v52 = vld [vmem:[%s9504_s1 + $0x1c] sm:$0xf]  ;;  %s7933_s21 = smov 111  }
  0xcd   : > { %v644_v20 = vsel %vm9484_vm4, %v631_v13, %v7710_v6  ;;  %v645_v21 = vsel %vm9484_vm4, %v7710_v6, %v7711_v5  ;;  %v646_v25 = vsel %vm9484_vm4, %v7711_v5, %v637_v29  ;;  %v8362_v8 = vld.sshfl [vmem:[#allocation1] sm:$0xff pattern:$0x75316420]  ;;  %v8364_v54 = vld.sshfl [vmem:[#allocation1 + $0x8] sm:$0xff pattern:$0x75316420]  ;;  %v1102_v5 = vand.u32 %v1090_v40, %v8145_v17 }
  0xce   : > { %v660_v27 = vsel %vm8294_vm10, %v644_v20, 0.0  ;;  %v661_v30 = vsel %vm8300_vm11, %v645_v21, 0.0  ;;  %v662_v13 = vsel %vm8307_vm12, %v646_v25, 0.0  ;;  %1882 = vst [vmem:[#allocation1] ss:$2 sm:$0xff] %v8082_v4  ;;  %v1056_v21 = vpop.permute.xlu2 %1055  ;;  %vm8396_vm4 = vcmp.lt.s32.totalorder %v502_v63, 31 }
  0xcf   : > { %v669_v31 = vpack.c.bf16 %v660_v27, %v660_v27  ;;  %v670_v33 = vpack.c.bf16 %v661_v30, %v661_v30  ;;  %v671_v34 = vpack.c.bf16 %v662_v13, %v662_v13 }
  0xd1   : > { %5938 = vmatmul.msk.bf16.vlgmr.msra.gmra.mxu1 %vm9485_vm3, %v8327_v28  ;;  %v900_v41 = vand.u32 %v8145_v17, %v669_v31  ;;  %v906_v43 = vand.u32 %v8145_v17, %v671_v34  ;;  %v903_v44 = vand.u32 %v8145_v17, %v670_v33  ;;  %v1878_v30 = vld.sshfl [vmem:[#allocation1 + $0x20] sm:$0xff pattern:$0x75316420] }
  0xd2   : > { %v7714_v47 = vpop.permute.xlu0 %7713  ;;  %v1054_v49 = vpop.permute.xlu1 %1053  ;;  %1892 = vrot.lane.b32.xlu1 %v1878_v30, %s7927_s15  ;;  %v2497_v31 = vld [vmem:[%s9582_s2] sm:$0xff] }
  0xd3   : > { %980 = vmatpush.bf16.msrb.mxu1 %v900_v41  ;;  %v7716_v50 = vunpack.i.h.bf16 %v7714_v47  ;;  %v7715_v51 = vunpack.i.l.bf16 %v7714_v47  ;;  %993 = vmatpush.bf16.msrb.mxu2 %v903_v44  ;;  %v1068_v38 = vsel %vm9490_vm13, %v1054_v49, %v1056_v21  ;;  %v1881_v44 = vld.sshfl [vmem:[#allocation1 + $0x38] sm:$0xff pattern:$0x75316420] }
  0xd4   : > { %1006 = vmatpush.bf16.msrb.mxu3 %v906_v43  ;;  %v1880_v43 = vld.sshfl [vmem:[#allocation1 + $0x30] sm:$0xff pattern:$0x75316420] }
  0xd5   : > { %v1066_v10 = vsel %vm9490_vm13, %v7715_v51, %v7716_v50  ;;  %v1065_v58 = vsel %vm9490_vm13, %v7721_v61, %v7715_v51  ;;  %v1067_v60 = vsel %vm9490_vm13, %v7716_v50, %v1054_v49  ;;  %v7767_v46 = vpack.i.bf16 %v1881_v44, %v1880_v43  ;;  %2084 = vst [vmem:[#allocation1 + $0x30] ss:$2 sm:$0xff] %v8077_v3  ;;  %v1883_v47 = vld.sshfl [vmem:[#allocation1] sm:$0xff pattern:$0x75316420] }
  0xd6   : > { %v1082_v11 = vsel %vm8344_vm15, %v1066_v10, 0.0  ;;  %v1081_v29 = vsel %vm8351_vm0, %v1065_v58, 0.0  ;;  %v1083_v62 = vsel %vm8357_vm1, %v1067_v60, 0.0  ;;  %vm8410_vm1 = vcmp.lt.s32.totalorder %v523_v48, 31  ;;  %2078 = vst [vmem:[#allocation1] ss:$2 sm:$0xff] %v8072_v1  ;;  %v7734_v58 = vpop.permute.xlu2 %7733 }
  0xd7   : > { %v1092_v6 = vpack.c.bf16 %v1082_v11, %v1082_v11  ;;  %v1091_v15 = vpack.c.bf16 %v1081_v29, %v1081_v29  ;;  %v1093_v61 = vpack.c.bf16 %v1083_v62, %v1083_v62  ;;  %v9536_v9 = vsel %vm8410_vm1, 4294967295, %v9535_v9  ;;  %7768 = vrot.lane.b32.xlu0 %v7767_v46, %s7927_s15 }
  0xd8   : > { %5937 = vmatmul.msk.bf16.vlgmr.msra.gmra.mxu0 %vm9485_vm3, %v8327_v28  ;;  %v7736_v11 = vunpack.i.h.bf16 %v7734_v58 }
  0xd9   : > { %5939 = vmatmul.msk.bf16.vlgmr.msra.gmra.mxu2 %vm9485_vm3, %v8327_v28  ;;  %v1105_v18 = vand.u32 %v1091_v15, %v8145_v17  ;;  %v1111_v20 = vand.u32 %v1093_v61, %v8145_v17  ;;  %v1108_v25 = vand.u32 %v1092_v6, %v8145_v17  ;;  %1132 = vmatpush.bf16.msra.mxu0 %v1102_v5  ;;  %v7735_v15 = vunpack.i.l.bf16 %v7734_v58 }
  0xda   : > { %5940 = vmatmul.msk.bf16.vlgmr.msra.gmra.mxu3 %vm9485_vm3, %v8327_v28  ;;  %v7724_v27 = vpop.permute.xlu0 %7723  ;;  %v1062_v13 = vpop.permute.xlu1 %1061  ;;  %vm8403_vm3 = vcmp.lt.s32.totalorder %v516_v42, 31  ;;  %v1084_v42 = vsel %vm8396_vm4, %v1068_v38, 0.0  ;;  %1900 = vrot.lane.b32.xlu1 %v1883_v47, %s7927_s15 }
  0xdb   : > { %1145 = vmatpush.bf16.msra.mxu1 %v1105_v18  ;;  %v7726_v33 = vunpack.i.h.bf16 %v7724_v27  ;;  %v7725_v34 = vunpack.i.l.bf16 %v7724_v27  ;;  %1158 = vmatpush.bf16.msra.mxu2 %v1108_v25  ;;  %v9534_v39 = vsel %vm8403_vm3, 4294967295, %v9533_v39  ;;  %v1094_v40 = vpack.c.bf16 %v1084_v42, %v1084_v42 }
  0xdc   : > { %1171 = vmatpush.bf16.msra.mxu3 %v1111_v20  ;;  %v7762_v18 = vpack.i.bf16 %v8364_v54, %v8362_v8  ;;  %v2088_v20 = vld.sshfl [vmem:[#allocation1 + $0x18] sm:$0xff pattern:$0x75316420]  ;;  %v8454_v8 = vld [vmem:[%s9504_s1 + $0x8] sm:$0xf] }
  0xdd   : > { %v1069_v53 = vsel %vm9490_vm13, %v1056_v21, %v7725_v34  ;;  %v1070_v63 = vsel %vm9490_vm13, %v7725_v34, %v7726_v33  ;;  %v1071_v26 = vsel %vm9490_vm13, %v7726_v33, %v1062_v13  ;;  %vm1272_vm13 = vcmask 531456  }
  0xde   : > { %v1085_v19 = vsel %vm8390_vm2, %v1069_v53, 0.0  ;;  %v1086_v41 = vsel %vm8403_vm3, %v1070_v63, 0.0  ;;  %v1087_v48 = vsel %vm8410_vm1, %v1071_v26, 0.0  ;;  %v1114_v60 = vand.u32 %v1094_v40, %v8145_v17  ;;  %vm9538_vm1 = vmmov %vm9537_vm14  ;;  %7763 = vrot.lane.b32.xlu2 %v7762_v18, %s7927_s15  ;;  %v1879_v63 = vld.sshfl [vmem:[#allocation1 + $0x28] sm:$0xff pattern:$0x75316420]  ;;  %v1265_v44 = vpop.permute.xlu2 %1264 }
  0xdf   : > { %v1095_v32 = vpack.c.bf16 %v1085_v19, %v1085_v19  ;;  %v1096_v49 = vpack.c.bf16 %v1086_v41, %v1086_v41  ;;  %v1097_v51 = vpack.c.bf16 %v1087_v48, %v1087_v48  ;;  %vm9539_vm3 = vmmov %vm9538_vm1  ;;  %v2107_v27 = vpack.c.bf16 %v2088_v20, %v2088_v20  ;;  %v2087_v26 = vld.sshfl [vmem:[#allocation1 + $0x10] sm:$0xff pattern:$0x75316420]  ;;  %2082 = vst [vmem:[#allocation1 + $0x20] ss:$2 sm:$0xff] %v8070_v0 }
  0xe0   : > { %v1273_v13 = vsel %vm1272_vm13, %v7735_v15, %v7736_v11  ;;  %v2086_v48 = vld.sshfl [vmem:[#allocation1 + $0x8] sm:$0xff pattern:$0x75316420]  ;;  %2290 = vst [vmem:[#allocation1 + $0x10] ss:$2 sm:$0xff] %v8075_v2 }
  0xe1   : > { %5942 = vmatmul.msk.bf16.vlgmr.msrb.gmra.mxu1 %vm9537_vm14, %v8327_v28  ;;  %v1117_v45 = vand.u32 %v1095_v32, %v8145_v17  ;;  %v1120_v29 = vand.u32 %v1096_v49, %v8145_v17  ;;  %v1123_v62 = vand.u32 %v1097_v51, %v8145_v17  ;;  %v1289_v34 = vsel %vm8170_vm5, %v1273_v13, 0.0 }
  0xe2   : > { %v7729_v50 = vpop.permute.xlu0 %7728  ;;  %v1263_v25 = vpop.permute.xlu1 %1262  ;;  %2128 = vrot.lane.b32.xlu1 %v2107_v27, %s7928_s16  ;;  %v1299_v42 = vpack.c.bf16 %v1289_v34, %v1289_v34  ;;  %v2106_v32 = vpack.c.bf16 %v2087_v26, %v2087_v26  ;;  %v2092_v34 = vld.sshfl [vmem:[#allocation1 + $0x38] sm:$0xff pattern:$0x75316420] }
  0xe3   : > { %1197 = vmatpush.bf16.msrb.mxu1 %v1117_v45  ;;  %v7730_v10 = vunpack.i.l.bf16 %v7729_v50  ;;  %v7731_v5 = vunpack.i.h.bf16 %v7729_v50  ;;  %v2105_v45 = vpack.c.bf16 %v2086_v48, %v2086_v48 }
  0xe4   : > { %2126 = vrot.lane.b32.xlu0 %v2106_v32, %s7928_s16  ;;  %v1311_v47 = vand.u32 %v1299_v42, %v8145_v17  ;;  %v8513_v42 = vld [vmem:[%s9504_s1 + $0xc] sm:$0xf]  ;;  %v2091_v32 = vld.sshfl [vmem:[#allocation1 + $0x30] sm:$0xff pattern:$0x75316420] }
  0xe5   : > { %v1274_v6 = vsel %vm1272_vm13, %v7736_v11, %v7730_v10  ;;  %v1275_v30 = vsel %vm1272_vm13, %v7730_v10, %v7731_v5  ;;  %v2085_v10 = vld.sshfl [vmem:[#allocation1] sm:$0xff pattern:$0x75316420]  ;;  %v1277_v11 = vsel %vm1272_vm13, %v1263_v25, %v1265_v44  ;;  %2294 = vst [vmem:[#allocation1 + $0x30] ss:$2 sm:$0xff] %v8077_v3 }
  0xe6   : > { %v1290_v61 = vsel %vm8247_vm8, %v1274_v6, 0.0  ;;  %v1291_v33 = vsel %vm8237_vm7, %v1275_v30, 0.0  ;;  %1894 = vrot.lane.b32.xlu2 %v1879_v63, %s7927_s15  ;;  %2093 = vst [vmem:[#allocation1] ss:$2 sm:$0xff] %v8082_v4  ;;  %v1293_v6 = vsel %vm8229_vm6, %v1277_v11, 0.0  ;;  %v8497_v30 = vpop.permute.xlu2 %1500  ;;  %s7929_s15 = smov 31  }
  0xe7   : > { %v1300_v21 = vpack.c.bf16 %v1290_v61, %v1290_v61  ;;  %v1301_v19 = vpack.c.bf16 %v1291_v33, %v1291_v33  ;;  %v1303_v18 = vpack.c.bf16 %v1293_v6, %v1293_v6  ;;  %v2090_v3 = vld.sshfl [vmem:[#allocation1 + $0x28] sm:$0xff pattern:$0x75316420] }
  0xe8   : > { %5941 = vmatmul.msk.bf16.vlgmr.msrb.gmra.mxu0 %vm9537_vm14, %v8327_v28  ;;  %vm9541_vm14 = vmmov %vm9538_vm1 }
  0xe9   : > { %5943 = vmatmul.msk.bf16.vlgmr.msrb.gmra.mxu2 %vm9538_vm1, %v8327_v28  ;;  %1184 = vmatpush.bf16.msrb.mxu0 %v1114_v60  ;;  %v1314_v54 = vand.u32 %v1300_v21, %v8145_v17  ;;  %v1317_v40 = vand.u32 %v1301_v19, %v8145_v17  ;;  %v2104_v60 = vpack.c.bf16 %v2085_v10, %v2085_v10 }
  0xea   : > { %5944 = vmatmul.msk.bf16.vlgmr.msrb.gmra.mxu3 %vm9539_vm3, %v8327_v28  ;;  %1210 = vmatpush.bf16.msrb.mxu2 %v1120_v29  ;;  %v1276_v28 = vsel %vm1272_vm13, %v7731_v5, %v1263_v25  ;;  %vm9540_vm3 = vmmov %vm9538_vm1  ;;  %v7739_v53 = vpop.permute.xlu0 %7738  ;;  %v1271_v51 = vpop.permute.xlu1 %1270  ;;  %v1323_v27 = vand.u32 %v1303_v18, %v8145_v17  ;;  %v2109_v10 = vpack.c.bf16 %v2090_v3, %v2090_v3 }
  0xeb   : > { %1223 = vmatpush.bf16.msrb.mxu3 %v1123_v62  ;;  %v1292_v38 = vsel %vm8253_vm9, %v1276_v28, 0.0  ;;  %v7740_v41 = vunpack.i.l.bf16 %v7739_v53  ;;  %2124 = vrot.lane.b32.xlu1 %v2105_v45, %s7928_s16  ;;  %v7741_v2 = vunpack.i.h.bf16 %v7739_v53  ;;  %v2298_v45 = vld.sshfl [vmem:[#allocation1 + $0x18] sm:$0xff pattern:$0x75316420] }
  0xec   : > { %v1302_v43 = vpack.c.bf16 %v1292_v38, %v1292_v38  ;;  %2122 = vrot.lane.b32.xlu0 %v2104_v60, %s7928_s16  ;;  %v2111_v38 = vpack.c.bf16 %v2092_v34, %v2092_v34 }
  0xed   : > { %v1278_v46 = vsel %vm1272_vm13, %v1265_v44, %v7740_v41  ;;  %v1279_v29 = vsel %vm1272_vm13, %v7740_v41, %v7741_v2  ;;  %v1280_v62 = vsel %vm1272_vm13, %v7741_v2, %v1271_v51  ;;  %vm9543_vm13 = vmmov %vm9538_vm1  ;;  %v2094_v19 = vld.sshfl [vmem:[#allocation1] sm:$0xff pattern:$0x75316420]  ;;  %v2297_v44 = vld.sshfl [vmem:[#allocation1 + $0x10] sm:$0xff pattern:$0x75316420] }
  0xee   : > { %v1320_v49 = vand.u32 %v1302_v43, %v8145_v17  ;;  %v1294_v50 = vsel %vm8294_vm10, %v1278_v46, 0.0  ;;  %v1295_v15 = vsel %vm8300_vm11, %v1279_v29, 0.0  ;;  %v1296_v61 = vsel %vm8307_vm12, %v1280_v62, 0.0  ;;  %2288 = vst [vmem:[#allocation1] ss:$2 sm:$0xff] %v8072_v1  ;;  %v1505_v48 = vpop.permute.xlu2 %1504 }
  0xef   : > { %v1304_v58 = vpack.c.bf16 %v1294_v50, %v1294_v50  ;;  %v1305_v20 = vpack.c.bf16 %v1295_v15, %v1295_v15  ;;  %v1306_v25 = vpack.c.bf16 %v1296_v61, %v1296_v61  ;;  %v2112_v41 = vpack.c.bf16 %v2094_v19, %v2094_v19  ;;  %v2301_v62 = vld.sshfl [vmem:[#allocation1 + $0x30] sm:$0xff pattern:$0x75316420] }
  0xf0   : > { %v2110_v43 = vpack.c.bf16 %v2091_v32, %v2091_v32 }
  0xf1   : > { %5947 = vmatmul.msk.bf16.vlgmr.msra.gmra.mxu1 %vm9540_vm3, %v8454_v8  ;;  %vm9542_vm3 = vmmov %vm9538_vm1  ;;  %v1326_v5 = vand.u32 %v1304_v58, %v8145_v17  ;;  %v1329_v13 = vand.u32 %v1305_v20, %v8145_v17  ;;  %v1332_v28 = vand.u32 %v1306_v25, %v8145_v17 }
  0xf2   : > { %1354 = vmatpush.bf16.msra.mxu1 %v1314_v54  ;;  %v1499_v21 = vpop.permute.xlu1 %1498  ;;  %v2089_v54 = vld.sshfl [vmem:[#allocation1 + $0x20] sm:$0xff pattern:$0x75316420]  ;;  %v1497_v53 = vpop.permute.xlu0 %1496 }
  0xf3   : > { %v2108_v33 = vpack.c.bf16 %v2089_v54, %v2089_v54  ;;  %2138 = vrot.lane.b32.xlu1 %v2112_v41, %s7928_s16  ;;  %2292 = vst [vmem:[#allocation1 + $0x20] ss:$2 sm:$0xff] %v8070_v0 }
  0xf4   : > { %2136 = vrot.lane.b32.xlu0 %v2111_v38, %s7928_s16 }
  0xf5   : > { %2130 = vrot.lane.b32.xlu2 %v2108_v33, %s7928_s16  ;;  %v2296_v25 = vld.sshfl [vmem:[#allocation1 + $0x8] sm:$0xff pattern:$0x75316420] }
  0xf6   : > { %v1503_v58 = vpop.permute.xlu2 %1502 }
  0xf8   : > { %5946 = vmatmul.msk.bf16.vlgmr.msra.gmra.mxu0 %vm9538_vm1, %v8454_v8 }
  0xf9   : > { %5948 = vmatmul.msk.bf16.vlgmr.msra.gmra.mxu2 %vm9541_vm14, %v8454_v8  ;;  %1341 = vmatpush.bf16.msra.mxu0 %v1311_v47  ;;  %vm9495_vm14 = vcmask 523264   ;;  %v7772_v47 = vpack.i.bf16 %v2298_v45, %v2297_v44 }
  0xfa   : > { %5949 = vmatmul.msk.bf16.vlgmr.msra.gmra.mxu3 %vm9542_vm3, %v8454_v8  ;;  %1367 = vmatpush.bf16.msra.mxu2 %v1317_v40  ;;  %vm9544_vm3 = vmmov %vm9538_vm1  ;;  %v1495_v63 = vpop.permute.xlu1 %1494  ;;  %v1493_v46 = vpop.permute.xlu0 %1492  ;;  %v1513_v40 = vsel %vm9495_vm14, %v1497_v53, %v1499_v21  ;;  %v1514_v1 = vsel %vm9495_vm14, %v1499_v21, %v8497_v30  ;;  %v1516_v0 = vsel %vm9495_vm14, %v1503_v58, %v1505_v48  ;;  %v2299_v60 = vld.sshfl [vmem:[#allocation1 + $0x20] sm:$0xff pattern:$0x75316420] }
  0xfb   : > { %1380 = vmatpush.bf16.msra.mxu3 %v1320_v49  ;;  %v1512_v26 = vsel %vm9495_vm14, %v1495_v63, %v1497_v53  ;;  %v1511_v49 = vsel %vm9495_vm14, %v1493_v46, %v1495_v63  ;;  %v1529_v50 = vand.u32 %v1513_v40, %v8145_v17  ;;  %v1532_v51 = vand.u32 %v1514_v1, %v8145_v17  ;;  %v2295_v21 = vld.sshfl [vmem:[#allocation1] sm:$0xff pattern:$0x75316420] }
  0xfc   : > { %7773 = vrot.lane.b32.xlu0 %v7772_v47, %s7929_s15  ;;  %v1523_v2 = vand.u32 %v1511_v49, %v8145_v17  ;;  %2313 = vrot.lane.b32.xlu1 %v2299_v60, %s7929_s15  ;;  %v1538_v29 = vand.u32 %v1516_v0, %v8145_v17  ;;  %v1515_v61 = vsel %vm9495_vm14, %v8497_v30, %v1503_v58  ;;  %v2300_v60 = vld.sshfl [vmem:[#allocation1 + $0x28] sm:$0xff pattern:$0x75316420] }
  0xfd   : > { %2134 = vrot.lane.b32.xlu2 %v2110_v43, %s7928_s16  ;;  %2303 = vst [vmem:[#allocation1] ss:$2 sm:$0xff] %v8082_v4 }
 0x101   : > { %5951 = vmatmul.msk.bf16.vlgmr.msrb.gmra.mxu1 %vm9538_vm1, %v8454_v8 }
 0x102   : > { %1406 = vmatpush.bf16.msrb.mxu1 %v1326_v5  ;;  %v1507_v11 = vpop.permute.xlu0 %1506  ;;  %v2302_v5 = vld.sshfl [vmem:[#allocation1 + $0x38] sm:$0xff pattern:$0x75316420]  ;;  %v1509_v6 = vpop.permute.xlu1 %1508 }
 0x103   : > { %v7782_v15 = vpack.i.bf16 %v2302_v5, %v2301_v62  ;;  %v1517_v18 = vsel %vm9495_vm14, %v1505_v48, %v1507_v11  ;;  %v1518_v20 = vsel %vm9495_vm14, %v1507_v11, %v1509_v6 }
 0x104   : > { %v1544_v33 = vand.u32 %v1518_v20, %v8145_v17  ;;  %v2304_v32 = vld.sshfl [vmem:[#allocation1] sm:$0xff pattern:$0x75316420] }
 0x105   : > { %2132 = vrot.lane.b32.xlu2 %v2109_v10, %s7928_s16  ;;  %7783 = vrot.lane.b32.xlu0 %v7782_v15, %s7929_s15  ;;  %s7931_s16 = smov 112  }
 0x106   : > { %2321 = vrot.lane.b32.xlu1 %v2304_v32, %s7929_s15 }
 0x108   : > { %5950 = vmatmul.msk.bf16.vlgmr.msrb.gmra.mxu0 %vm9543_vm13, %v8454_v8  ;;  %vm9545_vm13 = vmmov %vm9538_vm1 }
 0x109   : > { %5952 = vmatmul.msk.bf16.vlgmr.msrb.gmra.mxu2 %vm9544_vm3, %v8454_v8  ;;  %1393 = vmatpush.bf16.msrb.mxu0 %v1323_v27  ;;  %vm9546_vm3 = vmmov %vm9538_vm1  ;;  %v1535_v27 = vand.u32 %v1515_v61, %v8145_v17 }
 0x10a   : > { %5953 = vmatmul.msk.bf16.vlgmr.msrb.gmra.mxu3 %vm9538_vm1, %v8454_v8  ;;  %1419 = vmatpush.bf16.msrb.mxu2 %v1329_v13  ;;  %v1526_v8 = vand.u32 %v1512_v26, %v8145_v17  ;;  %v1541_v13 = vand.u32 %v1517_v18, %v8145_v17  ;;  %v7777_v26 = vpack.i.bf16 %v2296_v25, %v2295_v21  ;;  %v1684_v46 = vpop.permute.xlu1 %1683 }
 0x10b   : > { %1432 = vmatpush.bf16.msrb.mxu3 %v1332_v28  ;;  %v7744_v28 = vpop.permute.xlu0 %7743 }
 0x10c   : > { %v7745_v30 = vunpack.i.l.bf16 %v7744_v28  ;;  %v7746_v38 = vunpack.i.h.bf16 %v7744_v28 }
 0x10d   : > { %7778 = vrot.lane.b32.xlu2 %v7777_v26, %s7929_s15 }
 0x111   : > { %5956 = vmatmul.msk.bf16.vlgmr.msra.gmra.mxu1 %vm9545_vm13, %v8513_v42  ;;  %vm9547_vm13 = vmmov %vm9538_vm1 }
 0x112   : > { %1566 = vmatpush.bf16.msra.mxu1 %v1526_v8 }
 0x115   : > { %2315 = vrot.lane.b32.xlu2 %v2300_v60, %s7929_s15 }
 0x118   : > { %5955 = vmatmul.msk.bf16.vlgmr.msra.gmra.mxu0 %vm9546_vm3, %v8513_v42  ;;  %vm9548_vm3 = vmmov %vm9538_vm1 }
 0x119   : > { %5957 = vmatmul.msk.bf16.vlgmr.msra.gmra.mxu2 %vm9538_vm1, %v8513_v42  ;;  %1553 = vmatpush.bf16.msra.mxu0 %v1523_v2  ;;  %vm1693_vm1 = vcmask 515072   ;;  %v7749_v54 = vpop.permute.xlu2 %7748  ;;  %vm9550_vm14 = vmmov %vm9548_vm3 }
 0x11a   : > { %5958 = vmatmul.msk.bf16.vlgmr.msra.gmra.mxu3 %vm9547_vm13, %v8513_v42  ;;  %1579 = vmatpush.bf16.msra.mxu2 %v1529_v50  ;;  %v7751_v34 = vunpack.i.h.bf16 %v7749_v54  ;;  %vm9549_vm13 = vmmov %vm9548_vm3  ;;  %v7750_v53 = vunpack.i.l.bf16 %v7749_v54  ;;  %v1696_v8 = vsel %vm1693_vm1, %v7745_v30, %v7746_v38  ;;  %v1697_v47 = vsel %vm1693_vm1, %v7746_v38, %v1684_v46 }
 0x11b   : > { %1592 = vmatpush.bf16.msra.mxu3 %v1532_v51  ;;  %v1712_v44 = vsel %vm8344_vm15, %v1696_v8, 0.0 }
 0x11c   : > { %v1695_v63 = vsel %vm1693_vm1, %v7751_v34, %v7745_v30  ;;  %v1694_v41 = vsel %vm1693_vm1, %v7750_v53, %v7751_v34  ;;  %v1722_v49 = vpack.c.bf16 %v1712_v44, %v1712_v44 }
 0x11d   : > { %v1711_v4 = vsel %vm8351_vm0, %v1695_v63, 0.0 }
 0x11e   : > { %v1721_v19 = vpack.c.bf16 %v1711_v4, %v1711_v4  ;;  %v1738_v0 = vand.u32 %v1722_v49, %v8145_v17 }
 0x120   : > { %v1735_v43 = vand.u32 %v1721_v19, %v8145_v17 }
 0x121   : > { %5960 = vmatmul.msk.bf16.vlgmr.msrb.gmra.mxu1 %vm9548_vm3, %v8513_v42 }
 0x122   : > { %1618 = vmatpush.bf16.msrb.mxu1 %v1538_v29 }
 0x126   : > { %v1686_v29 = vpop.permute.xlu2 %1685 }
 0x127   : > { %v7754_v2 = vpop.permute.xlu0 %7753  ;;  %v1698_v20 = vsel %vm1693_vm1, %v1684_v46, %v1686_v29 }
 0x128   : > { %5959 = vmatmul.msk.bf16.vlgmr.msrb.gmra.mxu0 %vm9549_vm13, %v8513_v42  ;;  %vm9552_vm13 = vmmov %vm9548_vm3  ;;  %v7755_v10 = vunpack.i.l.bf16 %v7754_v2  ;;  %v7756_v62 = vunpack.i.h.bf16 %v7754_v2  ;;  %v1714_v28 = vsel %vm8396_vm4, %v1698_v20, 0.0 }
 0x129   : > { %5961 = vmatmul.msk.bf16.vlgmr.msrb.gmra.mxu2 %vm9548_vm3, %v8513_v42  ;;  %1605 = vmatpush.bf16.msrb.mxu0 %v1535_v27  ;;  %vm9553_vm3 = vnez %v9528_v57  ;;  %v1724_v38 = vpack.c.bf16 %v1714_v28, %v1714_v28 }
 0x12a   : > { %5962 = vmatmul.msk.bf16.vlgmr.msrb.gmra.mxu3 %vm9550_vm14, %v8513_v42  ;;  %1631 = vmatpush.bf16.msrb.mxu2 %v1541_v13  ;;  %v8569_v42 = vld [vmem:[%s9504_s1 + $0x10] sm:$0xf]  ;;  %vm9551_vm14 = vnez %v9522_v14  ;;  %v1713_v40 = vsel %vm9553_vm3, %v1697_v47, 0.0  ;;  %v1699_v5 = vsel %vm1693_vm1, %v1686_v29, %v7755_v10  ;;  %vm9554_vm3 = vmmov %vm9552_vm13  ;;  %v1700_v21 = vsel %vm1693_vm1, %v7755_v10, %v7756_v62 }
 0x12b   : > { %1644 = vmatpush.bf16.msrb.mxu3 %v1544_v33  ;;  %v1710_v45 = vsel %vm9551_vm14, %v1694_v41, 0.0  ;;  %v1723_v3 = vpack.c.bf16 %v1713_v40, %v1713_v40  ;;  %vm9555_vm14 = vmmov %vm9554_vm3  ;;  %v1715_v6 = vsel %vm8390_vm2, %v1699_v5, 0.0  ;;  %v1744_v32 = vand.u32 %v1724_v38, %v8145_v17 }
 0x12c   : > { %v1720_v1 = vpack.c.bf16 %v1710_v45, %v1710_v45  ;;  %v1725_v15 = vpack.c.bf16 %v1715_v6, %v1715_v6 }
 0x12d   : > { %v1741_v11 = vand.u32 %v1723_v3, %v8145_v17 }
 0x12e   : > { %v8564_v48 = vpop.f32.mrf.mxu1  ;;  %v1732_v58 = vand.u32 %v1720_v1, %v8145_v17  ;;  %v1747_v13 = vand.u32 %v1725_v15, %v8145_v17 }
 0x131   : > { %5965 = vmatmul.msk.bf16.vlgmr.msra.gmra.mxu1 %vm9552_vm13, %v8569_v42 }
 0x132   : > { %1775 = vmatpush.bf16.msra.mxu1 %v1735_v43 }
 0x135   : > { %v8582_v50 = vpop.f32.mrf.mxu0 }
 0x136   : > { %v801_v51 = vpop.f32.mrf.mxu1 }
 0x138   : > { %5964 = vmatmul.msk.bf16.vlgmr.msra.gmra.mxu0 %vm9552_vm13, %v8569_v42  ;;  %v1692_v33 = vpop.permute.xlu1 %1691  ;;  %vm9557_vm13 = vnez %v9536_v9  ;;  %v7764_v8 = vpop.permute.xlu2 %7763 }
 0x139   : > { %5966 = vmatmul.msk.bf16.vlgmr.msra.gmra.mxu2 %vm9554_vm3, %v8569_v42  ;;  %1762 = vmatpush.bf16.msra.mxu0 %v1732_v58  ;;  %v1701_v30 = vsel %vm1693_vm1, %v7756_v62, %v1692_v33  ;;  %v7766_v44 = vunpack.i.h.bf16 %v7764_v8  ;;  %vm9558_vm1 = vmmov %vm9554_vm3  ;;  %v7765_v49 = vunpack.i.l.bf16 %v7764_v8 }
 0x13a   : > { %5967 = vmatmul.msk.bf16.vlgmr.msra.gmra.mxu3 %vm9555_vm14, %v8569_v42  ;;  %1788 = vmatpush.bf16.msra.mxu2 %v1738_v0  ;;  %vm9556_vm14 = vnez %v9534_v39  ;;  %v1717_v34 = vsel %vm9557_vm13, %v1701_v30, 0.0  ;;  %vm9560_vm13 = vmmov %vm9558_vm1 }
 0x13b   : > { %1801 = vmatpush.bf16.msra.mxu3 %v1741_v11  ;;  %v1716_v54 = vsel %vm9556_vm14, %v1700_v21, 0.0  ;;  %v1727_v63 = vpack.c.bf16 %v1717_v34, %v1717_v34  ;;  %vm1902_vm14 = vcmask 269312  }
 0x13c   : > { %v8597_v61 = vpop.f32.mrf.mxu2  ;;  %v1726_v53 = vpack.c.bf16 %v1716_v54, %v1716_v54  ;;  %v7759_v43 = vpop.permute.xlu0 %7758  ;;  %v1903_v0 = vsel %vm1902_vm14, %v7765_v49, %v7766_v44 }
 0x13d   : > { %v8599_v18 = vpop.f32.mrf.mxu3  ;;  %v788_v25 = vpop.f32.mrf.mxu0  ;;  %v1753_v46 = vand.u32 %v1727_v63, %v8145_v17  ;;  %v7760_v47 = vunpack.i.l.bf16 %v7759_v43  ;;  %v7761_v40 = vunpack.i.h.bf16 %v7759_v43  ;;  %v1919_v5 = vsel %vm8170_vm5, %v1903_v0, 0.0  ;;  %vm9562_vm5 = vmmov %vm9558_vm1 }
 0x13e   : > { %v8603_v27 = vpop.f32.mrf.mxu1  ;;  %v1750_v45 = vand.u32 %v1726_v53, %v8145_v17  ;;  %v1929_v25 = vpack.c.bf16 %v1919_v5, %v1919_v5 }
 0x13f   : > { %v1904_v1 = vsel %vm1902_vm14, %v7766_v44, %v7760_v47  ;;  %v1905_v58 = vsel %vm1902_vm14, %v7760_v47, %v7761_v40 }
 0x140   : > { %v1920_v3 = vsel %vm8247_vm8, %v1904_v1, 0.0  ;;  %v1921_v62 = vsel %vm8237_vm7, %v1905_v58, 0.0  ;;  %vm9561_vm8 = vmmov %vm9558_vm1  ;;  %v1941_v34 = vand.u32 %v1929_v25, %v8145_v17  ;;  %v1895_v53 = vpop.permute.xlu2 %1894 }
 0x141   : > { %5969 = vmatmul.msk.bf16.vlgmr.msrb.gmra.mxu1 %vm9554_vm3, %v8569_v42  ;;  %vm9559_vm3 = vmmov %vm9558_vm1  ;;  %v1930_v2 = vpack.c.bf16 %v1920_v3, %v1920_v3  ;;  %v1931_v21 = vpack.c.bf16 %v1921_v62, %v1921_v62 }
 0x142   : > { %1827 = vmatpush.bf16.msrb.mxu1 %v1747_v13  ;;  %vm9563_vm7 = vmmov %vm9558_vm1 }
 0x143   : > { %v1944_v22 = vand.u32 %v1930_v2, %v8145_v17  ;;  %v1947_v38 = vand.u32 %v1931_v21, %v8145_v17 }
 0x144   : > { %v814_v4 = vpop.f32.mrf.mxu2  ;;  %v1893_v6 = vpop.permute.xlu1 %1892 }
 0x145   : > { %v827_v26 = vpop.f32.mrf.mxu3  ;;  %v8615_v19 = vpop.f32.mrf.mxu0  ;;  %v1906_v15 = vsel %vm1902_vm14, %v7761_v40, %v1893_v6  ;;  %v1907_v43 = vsel %vm1902_vm14, %v1893_v6, %v1895_v53 }
 0x146   : > { %v853_v41 = vpop.f32.mrf.mxu1  ;;  %v1922_v20 = vsel %vm8253_vm9, %v1906_v15, 0.0  ;;  %vm9564_vm9 = vmmov %vm9558_vm1  ;;  %v1923_v3 = vsel %vm8229_vm6, %v1907_v43, 0.0 }
 0x147   : > { %v1933_v58 = vpack.c.bf16 %v1923_v3, %v1923_v3  ;;  %vm9566_vm6 = vmmov %vm9558_vm1 }
 0x148   : > { %5968 = vmatmul.msk.bf16.vlgmr.msrb.gmra.mxu0 %vm9558_vm1, %v8569_v42 }
 0x149   : > { %5970 = vmatmul.msk.bf16.vlgmr.msrb.gmra.mxu2 %vm9559_vm3, %v8569_v42  ;;  %1814 = vmatpush.bf16.msrb.mxu0 %v1744_v32  ;;  %v7769_v54 = vpop.permute.xlu0 %7768  ;;  %v1953_v56 = vand.u32 %v1933_v58, %v8145_v17  ;;  %vm9570_vm3 = vmmov %vm9558_vm1 }
 0x14a   : > { %5971 = vmatmul.msk.bf16.vlgmr.msrb.gmra.mxu3 %vm9560_vm13, %v8569_v42  ;;  %1840 = vmatpush.bf16.msrb.mxu2 %v1750_v45  ;;  %v8638_v42 = vld [vmem:[%s9504_s1 + $0x14] sm:$0xf]  ;;  %v7770_v30 = vunpack.i.l.bf16 %v7769_v54  ;;  %v7771_v63 = vunpack.i.h.bf16 %v7769_v54  ;;  %vm9569_vm13 = vmmov %vm9558_vm1 }
 0x14b   : > { %1853 = vmatpush.bf16.msrb.mxu3 %v1753_v46 }
 0x14c   : > { %v8629_v51 = vpop.f32.mrf.mxu2  ;;  %v1908_v4 = vsel %vm1902_vm14, %v1895_v53, %v7770_v30  ;;  %v1901_v26 = vpop.permute.xlu1 %1900  ;;  %v1909_v44 = vsel %vm1902_vm14, %v7770_v30, %v7771_v63 }
 0x14d   : > { %v8631_v10 = vpop.f32.mrf.mxu3  ;;  %v840_v60 = vpop.f32.mrf.mxu0  ;;  %v1910_v55 = vsel %vm1902_vm14, %v7771_v63, %v1901_v26  ;;  %v1925_v2 = vsel %vm8300_vm11, %v1909_v44, 0.0  ;;  %vm2140_vm11 = vcmask 261120   ;;  %vm9568_vm14 = vmmov %vm9558_vm1 }
 0x14e   : > { %v930_v11 = vpop.f32.mrf.mxu1  ;;  %v1935_v0 = vpack.c.bf16 %v1925_v2, %v1925_v2 }
 0x14f   : > { %v8642_v29 = vadd.f32 %v930_v11, %v8564_v48  ;;  %v1932_v48 = vpack.c.bf16 %v1922_v20, %v1922_v20  ;;  %v2131_v5 = vpop.permute.xlu2 %2130 }
 0x150   : > { %v1959_v7 = vand.u32 %v1935_v0, %v8145_v17 }
 0x151   : > { %5974 = vmatmul.msk.bf16.vlgmr.msra.gmra.mxu1 %vm9561_vm8, %v8638_v42  ;;  %v1950_v23 = vand.u32 %v1932_v48, %v8145_v17  ;;  %vm9571_vm8 = vmmov %vm9558_vm1 }
 0x152   : > { %1984 = vmatpush.bf16.msra.mxu1 %v1944_v22 }
 0x154   : > { %v866_v13 = vpop.f32.mrf.mxu2 }
 0x155   : > { %v879_v28 = vpop.f32.mrf.mxu3  ;;  %v917_v16 = vpop.f32.mrf.mxu0 }
 0x156   : > { %v8654_v35 = vadd.f32 %v917_v16, %v8582_v50  ;;  %v932_v33 = vpop.f32.mrf.mxu1  ;;  %v1924_v50 = vsel %vm8294_vm10, %v1908_v4, 0.0  ;;  %vm9565_vm10 = vmmov %vm9558_vm1 }
 0x157   : > { %v1934_v8 = vpack.c.bf16 %v1924_v50, %v1924_v50  ;;  %v2135_v30 = vpop.permute.xlu2 %2134 }
 0x158   : > { %5973 = vmatmul.msk.bf16.vlgmr.msra.gmra.mxu0 %vm9562_vm5, %v8638_v42  ;;  %vm9572_vm5 = vmmov %vm9558_vm1 }
 0x159   : > { %5975 = vmatmul.msk.bf16.vlgmr.msra.gmra.mxu2 %vm9563_vm7, %v8638_v42  ;;  %1971 = vmatpush.bf16.msra.mxu0 %v1941_v34  ;;  %v1956_v49 = vand.u32 %v1934_v8, %v8145_v17  ;;  %vm2323_vm7 = vcmask 252928  }
 0x15a   : > { %5976 = vmatmul.msk.bf16.vlgmr.msra.gmra.mxu3 %vm9564_vm9, %v8638_v42  ;;  %1997 = vmatpush.bf16.msra.mxu2 %v1947_v38  ;;  %vm9573_vm9 = vmmov %vm9558_vm1 }
 0x15b   : > { %2010 = vmatpush.bf16.msra.mxu3 %v1950_v23 }
 0x15c   : > { %v943_v41 = vpop.f32.mrf.mxu2 }
 0x15d   : > { %v956_v32 = vpop.f32.mrf.mxu3  ;;  %v8671_v45 = vadd.f32 %v943_v41, %v8597_v61  ;;  %v919_v47 = vpop.f32.mrf.mxu0  ;;  %v1926_v61 = vsel %vm8307_vm12, %v1910_v55, 0.0  ;;  %vm9567_vm12 = vmmov %vm9558_vm1 }
 0x15e   : > { %v8674_v46 = vadd.f32 %v956_v32, %v8599_v18  ;;  %v982_v40 = vpop.f32.mrf.mxu1  ;;  %v2129_v18 = vpop.permute.xlu1 %2128  ;;  %v1936_v60 = vpack.c.bf16 %v1926_v61, %v1926_v61 }
 0x15f   : > { %v8679_v1 = vadd.f32 %v982_v40, %v8603_v27  ;;  %v2144_v53 = vsel %vm2140_vm11, %v2129_v18, %v2131_v5  ;;  %v2133_v41 = vpop.permute.xlu2 %2132 }
 0x160   : > { %v1962_v6 = vand.u32 %v1936_v60, %v8145_v17  ;;  %v2162_v8 = vand.u32 %v2144_v53, %v8145_v17  ;;  %v2146_v32 = vsel %vm2140_vm11, %v2133_v41, %v2135_v30 }
 0x161   : > { %5978 = vmatmul.msk.bf16.vlgmr.msrb.gmra.mxu1 %vm9565_vm10, %v8638_v42  ;;  %vm9574_vm10 = vmmov %vm9558_vm1 }
 0x162   : > { %2036 = vmatpush.bf16.msrb.mxu1 %v1956_v49  ;;  %v2168_v49 = vand.u32 %v2146_v32, %v8145_v17 }
 0x164   : > { %v945_v11 = vpop.f32.mrf.mxu2 }
 0x165   : > { %v958_v27 = vpop.f32.mrf.mxu3  ;;  %v969_v22 = vpop.f32.mrf.mxu0 }
 0x166   : > { %v8690_v12 = vadd.f32 %v969_v22, %v8615_v19  ;;  %v984_v62 = vpop.f32.mrf.mxu1  ;;  %v2127_v19 = vpop.permute.xlu0 %2126 }
 0x167   : > { %v2125_v15 = vpop.permute.xlu1 %2124 }
 0x168   : > { %5977 = vmatmul.msk.bf16.vlgmr.msrb.gmra.mxu0 %vm9566_vm6, %v8638_v42  ;;  %v2142_v20 = vsel %vm2140_vm11, %v2125_v15, %v2127_v19  ;;  %vm9575_vm6 = vmmov %vm9558_vm1 }
 0x169   : > { %5979 = vmatmul.msk.bf16.vlgmr.msrb.gmra.mxu2 %vm9567_vm12, %v8638_v42  ;;  %2023 = vmatpush.bf16.msrb.mxu0 %v1953_v56  ;;  %v2156_v54 = vand.u32 %v2142_v20, %v8145_v17  ;;  %vm9578_vm12 = vnez %v9528_v57 }
 0x16a   : > { %5980 = vmatmul.msk.bf16.vlgmr.msrb.gmra.mxu3 %vm9568_vm14, %v8638_v42  ;;  %2049 = vmatpush.bf16.msrb.mxu2 %v1959_v7  ;;  %v5981_v42 = vld [vmem:[%s9504_s1 + $0x18] sm:$0xf]  ;;  %v7779_v7 = vpop.permute.xlu2 %7778  ;;  %vm9580_vm14 = vmmov %vm9558_vm1 }
 0x16b   : > { %2062 = vmatpush.bf16.msrb.mxu3 %v1962_v6 }
 0x16c   : > { %v995_v21 = vpop.f32.mrf.mxu2 }
 0x16d   : > { %v1008_v25 = vpop.f32.mrf.mxu3  ;;  %v8703_v48 = vadd.f32 %v995_v21, %v8629_v51  ;;  %v971_v28 = vpop.f32.mrf.mxu0  ;;  %v2143_v51 = vsel %vm2140_vm11, %v2127_v19, %v2129_v18  ;;  %v2145_v18 = vsel %vm2140_vm11, %v2131_v5, %v2133_v41  ;;  %v7781_v19 = vunpack.i.h.bf16 %v7779_v7 }
 0x16e   : > { %v8706_v13 = vadd.f32 %v1008_v25, %v8631_v10  ;;  %v1147_v16 = vpop.f32.mrf.mxu1  ;;  %v2123_v34 = vpop.permute.xlu0 %2122 }
 0x16f   : > { %v8713_v33 = vadd.f32 %v1147_v16, %v8642_v29  ;;  %v2141_v10 = vsel %vm2140_vm11, %v2123_v34, %v2125_v15  ;;  %v2159_v29 = vand.u32 %v2143_v51, %v8145_v17  ;;  %v2139_v61 = vpop.permute.xlu1 %2138  ;;  %v7780_v15 = vunpack.i.l.bf16 %v7779_v7 }
 0x170   : > { %v2153_v26 = vand.u32 %v2141_v10, %v8145_v17 }
 0x171   : > { %5983 = vmatmul.msk.bf16.vlgmr.msra.gmra.mxu1 %vm9569_vm13, %v5981_v42  ;;  %vm9581_vm13 = vmmov %vm9558_vm1 }
 0x172   : > { %2196 = vmatpush.bf16.msra.mxu1 %v2156_v54  ;;  %v2324_v54 = vsel %vm2323_vm7, %v7780_v15, %v7781_v19 }
 0x174   : > { %v997_v38 = vpop.f32.mrf.mxu2 }
 0x175   : > { %v1010_v23 = vpop.f32.mrf.mxu3  ;;  %v1134_v63 = vpop.f32.mrf.mxu0 }
 0x176   : > { %v8720_v4 = vadd.f32 %v1134_v63, %v8654_v35  ;;  %v1149_v50 = vpop.f32.mrf.mxu1  ;;  %v2137_v3 = vpop.permute.xlu0 %2136 }
 0x178   : > { %5982 = vmatmul.msk.bf16.vlgmr.msra.gmra.mxu0 %vm9558_vm1, %v5981_v42 }
 0x179   : > { %5984 = vmatmul.msk.bf16.vlgmr.msra.gmra.mxu2 %vm9570_vm3, %v5981_v42  ;;  %2183 = vmatpush.bf16.msra.mxu0 %v2153_v26  ;;  %vm9584_vm3 = vnez %v9536_v9 }
 0x17a   : > { %5985 = vmatmul.msk.bf16.vlgmr.msra.gmra.mxu3 %vm9571_vm8, %v5981_v42  ;;  %2209 = vmatpush.bf16.msra.mxu2 %v2159_v29  ;;  %vm9586_vm8 = vmmov %vm9558_vm1 }
 0x17b   : > { %2222 = vmatpush.bf16.msra.mxu3 %v2162_v8 }
 0x17c   : > { %v1160_v35 = vpop.f32.mrf.mxu2 }
 0x17d   : > { %v1173_v43 = vpop.f32.mrf.mxu3  ;;  %v8730_v44 = vadd.f32 %v1160_v35, %v8671_v45  ;;  %v1136_v55 = vpop.f32.mrf.mxu0  ;;  %v2147_v45 = vsel %vm2140_vm11, %v2135_v30, %v2137_v3 }
 0x17e   : > { %v8733_v47 = vadd.f32 %v1173_v43, %v8674_v46  ;;  %v1199_v40 = vpop.f32.mrf.mxu1  ;;  %v2148_v46 = vsel %vm2140_vm11, %v2137_v3, %v2139_v61  ;;  %v2171_v22 = vand.u32 %v2147_v45, %v8145_v17  ;;  %v7774_v62 = vpop.permute.xlu0 %7773  ;;  %vm9577_vm11 = vmmov %vm9558_vm1 }
 0x17f   : > { %v8737_v2 = vadd.f32 %v1199_v40, %v8679_v1  ;;  %v2165_v1 = vand.u32 %v2145_v18, %v8145_v17  ;;  %v2174_v56 = vand.u32 %v2148_v46, %v8145_v17  ;;  %v7775_v5 = vunpack.i.l.bf16 %v7774_v62  ;;  %v2316_v40 = vpop.permute.xlu2 %2315 }
 0x180   : > { %v7776_v6 = vunpack.i.h.bf16 %v7774_v62 }
 0x181   : > { %5987 = vmatmul.msk.bf16.vlgmr.msrb.gmra.mxu1 %vm9572_vm5, %v5981_v42  ;;  %vm9587_vm5 = vmmov %vm9558_vm1 }
 0x182   : > { %2248 = vmatpush.bf16.msrb.mxu1 %v2168_v49  ;;  %v2326_v28 = vsel %vm2323_vm7, %v7775_v5, %v7776_v6 }
 0x183   : > { %v2342_v23 = vsel %vm8344_vm15, %v2326_v28, 0.0  ;;  %vm9579_vm15 = vmmov %vm9558_vm1 }
 0x184   : > { %v1162_v58 = vpop.f32.mrf.mxu2  ;;  %v2352_v50 = vpack.c.bf16 %v2342_v23, %v2342_v23 }
 0x185   : > { %v1175_v0 = vpop.f32.mrf.mxu3  ;;  %v1186_v60 = vpop.f32.mrf.mxu0 }
 0x186   : > { %v8744_v11 = vadd.f32 %v1186_v60, %v8690_v12  ;;  %v1201_v27 = vpop.f32.mrf.mxu1  ;;  %v2325_v12 = vsel %vm2323_vm7, %v7781_v19, %v7775_v5  ;;  %v7784_v41 = vpop.permute.xlu0 %7783  ;;  %v2368_v55 = vand.u32 %v2352_v50, %v8145_v17 }
 0x187   : > { %v2341_v20 = vsel %vm8351_vm0, %v2325_v12, 0.0  ;;  %vm9576_vm0 = vnez %v9522_v14  ;;  %v7785_v35 = vunpack.i.l.bf16 %v7784_v41  ;;  %v7786_v49 = vunpack.i.h.bf16 %v7784_v41 }
 0x188   : > { %5986 = vmatmul.msk.bf16.vlgmr.msrb.gmra.mxu0 %vm9573_vm9, %v5981_v42  ;;  %v2351_v16 = vpack.c.bf16 %v2341_v20, %v2341_v20  ;;  %vm9589_vm9 = vmmov %vm9558_vm1 }
 0x189   : > { %5988 = vmatmul.msk.bf16.vlgmr.msrb.gmra.mxu2 %vm9574_vm10, %v5981_v42  ;;  %2235 = vmatpush.bf16.msrb.mxu0 %v2165_v1  ;;  %v2329_v3 = vsel %vm2323_vm7, %v2316_v40, %v7785_v35  ;;  %v2330_v0 = vsel %vm2323_vm7, %v7785_v35, %v7786_v49  ;;  %v7930_v1 = vmov 0   ;;  %vm9590_vm10 = vmmov %vm9558_vm1 }
 0x18a   : > { %5989 = vmatmul.msk.bf16.vlgmr.msrb.gmra.mxu3 %vm9575_vm6, %v5981_v42  ;;  %2261 = vmatpush.bf16.msrb.mxu2 %v2171_v22  ;;  %v2365_v10 = vand.u32 %v2351_v16, %v8145_v17  ;;  %vm9591_vm6 = vmmov %vm9558_vm1 }
 0x18b   : > { %2274 = vmatpush.bf16.msrb.mxu3 %v2174_v56  ;;  %7787 = vset.pattern.permute.xlu0 %v7930_v1 }
 0x18c   : > { %v1212_v21 = vpop.f32.mrf.mxu2  ;;  %7818 = vset.pattern.permute.xlu2 %v7930_v1  ;;  %2500 = vperm.xlu0 %7787, %v2497_v31  }
 0x18d   : > { %v1225_v25 = vpop.f32.mrf.mxu3  ;;  %v8758_v30 = vadd.f32 %v1212_v21, %v8703_v48  ;;  %v1188_v34 = vpop.f32.mrf.mxu0  ;;  %v2340_v48 = vsel %vm9576_vm0, %v2324_v54, 0.0  ;;  %vm9592_vm0 = vmmov %vm9558_vm1 }
 0x18e   : > { %v8761_v42 = vadd.f32 %v1225_v25, %v8706_v13  ;;  %v1356_v51 = vpop.f32.mrf.mxu1  ;;  %v2314_v13 = vpop.permute.xlu1 %2313  ;;  %v2350_v29 = vpack.c.bf16 %v2340_v48, %v2340_v48 }
 0x18f   : > { %v8770_v38 = vadd.f32 %v1356_v51, %v8713_v33  ;;  %v2327_v53 = vsel %vm2323_vm7, %v7776_v6, %v2314_v13  ;;  %v2328_v58 = vsel %vm2323_vm7, %v2314_v13, %v2316_v40 }
 0x190   : > { %v2343_v63 = vsel %vm9578_vm12, %v2327_v53, 0.0  ;;  %v2362_v43 = vand.u32 %v2350_v29, %v8145_v17  ;;  %v2344_v5 = vsel %vm8396_vm4, %v2328_v58, 0.0  ;;  %vm9585_vm4 = vmmov %vm9558_vm1 }
 0x191   : > { %5992 = vmatmul.msk.bf16.vlgmr.msra.gmra.mxu1 %vm9577_vm11, %v8766_v52  ;;  %v2353_v33 = vpack.c.bf16 %v2343_v63, %v2343_v63  ;;  %v2354_v6 = vpack.c.bf16 %v2344_v5, %v2344_v5  ;;  %vm9593_vm11 = vmmov %vm9592_vm0 }
 0x192   : > { %2405 = vmatpush.bf16.msra.mxu1 %v2365_v10  ;;  %v5999_v10 = vld [vmem:[%s9504_s1 + $0x20] sm:$0xf]  ;;  %vm9594_vm12 = vmmov %vm9592_vm0 }
 0x193   : > { %v2371_v57 = vand.u32 %v2353_v33, %v8145_v17  ;;  %v2374_v25 = vand.u32 %v2354_v6, %v8145_v17  ;;  %v6094_v6 = vld [vmem:[#allocation2 + $0xa8] sm:$0xf] }
 0x194   : > { %v1214_v26 = vpop.f32.mrf.mxu2 }
 0x195   : > { %v1227_v8 = vpop.f32.mrf.mxu3  ;;  %v1343_v36 = vpop.f32.mrf.mxu0 }
 0x196   : > { %v8782_v14 = vadd.f32 %v1343_v36, %v8720_v4  ;;  %v1358_v32 = vpop.f32.mrf.mxu1  ;;  %v2345_v4 = vsel %vm8390_vm2, %v2329_v3, 0.0  ;;  %vm9583_vm2 = vnez %v9534_v39 }
 0x197   : > { %v2355_v61 = vpack.c.bf16 %v2345_v4, %v2345_v4 }
 0x198   : > { %5991 = vmatmul.msk.bf16.vlgmr.msra.gmra.mxu0 %vm9579_vm15, %v8766_v52  ;;  %vm9595_vm15 = vmmov %vm9592_vm0 }
 0x199   : > { %5993 = vmatmul.msk.bf16.vlgmr.msra.gmra.mxu2 %vm9580_vm14, %v8766_v52  ;;  %2392 = vmatpush.bf16.msra.mxu0 %v2362_v43  ;;  %v2377_v62 = vand.u32 %v2355_v61, %v8145_v17 }
 0x19a   : > { %5994 = vmatmul.msk.bf16.vlgmr.msra.gmra.mxu3 %vm9581_vm13, %v8766_v52  ;;  %2418 = vmatpush.bf16.msra.mxu2 %v2368_v55 }
 0x19b   : > { %2431 = vmatpush.bf16.msra.mxu3 %v2371_v57 }
 0x19c   : > { %v1369_v18 = vpop.f32.mrf.mxu2 }
 0x19d   : > { %v1382_v45 = vpop.f32.mrf.mxu3  ;;  %v1440_v46 = vadd.f32 %v1369_v18, %v8730_v44  ;;  %v1345_v27 = vpop.f32.mrf.mxu0  ;;  %v2346_v44 = vsel %vm9583_vm2, %v2330_v0, 0.0  ;;  %v6190_v0 = vld [vmem:[#allocation2 + $0x168] sm:$0xf] }
 0x19e   : > { %v1441_v60 = vadd.f32 %v1382_v45, %v8733_v47  ;;  %v1408_v22 = vpop.f32.mrf.mxu1  ;;  %v2322_v47 = vpop.permute.xlu1 %2321  ;;  %v2356_v19 = vpack.c.bf16 %v2346_v44, %v2346_v44  ;;  %v6178_v44 = vld [vmem:[#allocation2 + $0x150] sm:$0xf] }
 0x19f   : > { %v1443_v56 = vadd.f32 %v1408_v22, %v8737_v2  ;;  %v2331_v7 = vsel %vm2323_vm7, %v7786_v49, %v2322_v47  ;;  %vm9588_vm7 = vmmov %vm9558_vm1  ;;  %v7381_v47 = vld [vmem:[#allocation2 + $0x158] sm:$0xf0] }
 0x1a0   : > { %v2347_v15 = vsel %vm9584_vm3, %v2331_v7, 0.0  ;;  %v2380_v28 = vand.u32 %v2356_v19, %v8145_v17  ;;  %v6179_v7 = vor.u32 %v7381_v47, %v6178_v44  ;;  %v7360_v19 = vld [vmem:[#allocation2 + $0xb0] sm:$0xf0]  ;;  %v6118_v47 = vld [vmem:[#allocation2 + $0xd8] sm:$0xf] }
 0x1a1   : > { %5996 = vmatmul.msk.bf16.vlgmr.msrb.gmra.mxu1 %vm9558_vm1, %v8766_v52  ;;  %v2357_v12 = vpack.c.bf16 %v2347_v15, %v2347_v15  ;;  %v6166_v15 = vld [vmem:[#allocation2 + $0x138] sm:$0xf]  ;;  %v7348_v44 = vld [vmem:[#allocation2 + $0x50] sm:$0xf0] }
 0x1a2   : > { %2457 = vmatpush.bf16.msrb.mxu1 %v2377_v62 }
 0x1a3   : > { %v2383_v16 = vand.u32 %v2357_v12, %v8145_v17 }
 0x1a4   : > { %v1371_v2 = vpop.f32.mrf.mxu2 }
 0x1a5   : > { %v1384_v20 = vpop.f32.mrf.mxu3  ;;  %v1395_v37 = vpop.f32.mrf.mxu0 }
 0x1a6   : > { %v1442_v21 = vadd.f32 %v1395_v37, %v8744_v11  ;;  %v1410_v39 = vpop.f32.mrf.mxu1  ;;  %v6095_v20 = vor.u32 %v7360_v19, %v6094_v6  ;;  %v7378_v37 = vld [vmem:[#allocation2 + $0x140] sm:$0xf0] }
 0x1a7   : > { %v6167_v39 = vor.u32 %v7378_v37, %v6166_v15  ;;  %v7366_v15 = vld [vmem:[#allocation2 + $0xe0] sm:$0xf0]  ;;  %v7399_v37 = vld [vmem:[#allocation2 + $0x1e8] sm:$0xf0] }
 0x1a8   : > { %5995 = vmatmul.msk.bf16.vlgmr.msrb.gmra.mxu0 %vm9585_vm4, %v8766_v52 }
 0x1a9   : > { %5997 = vmatmul.msk.bf16.vlgmr.msrb.gmra.mxu2 %vm9586_vm8, %v8766_v52  ;;  %2444 = vmatpush.bf16.msrb.mxu0 %v2374_v25 }
 0x1aa   : > { %5998 = vmatmul.msk.bf16.vlgmr.msrb.gmra.mxu3 %vm9587_vm5, %v8766_v52  ;;  %2470 = vmatpush.bf16.msrb.mxu2 %v2380_v28 }
 0x1ab   : > { %2483 = vmatpush.bf16.msrb.mxu3 %v2383_v16  ;;  %v6082_v16 = vld [vmem:[#allocation2 + $0x90] sm:$0xf] }
 0x1ac   : > { %v1421_v9 = vpop.f32.mrf.mxu2 }
 0x1ad   : > { %v1434_v11 = vpop.f32.mrf.mxu3  ;;  %v1444_v54 = vadd.f32 %v1421_v9, %v8758_v30  ;;  %v1397_v51 = vpop.f32.mrf.mxu0  ;;  %v7357_v9 = vld [vmem:[#allocation2 + $0x98] sm:$0xf0] }
 0x1ae   : > { %v1445_v34 = vadd.f32 %v1434_v11, %v8761_v42  ;;  %v1568_v17 = vpop.f32.mrf.mxu1  ;;  %v6154_v11 = vld [vmem:[#allocation2 + $0x120] sm:$0xf] }
 0x1af   : > { %v1651_v23 = vadd.f32 %v1568_v17, %v8770_v38  ;;  %v6286_v17 = vld [vmem:[#allocation2 + $0x228] sm:$0xf] }
 0x1b1   : > { %6001 = vmatmul.msk.bf16.vlgmr.msra.gmra.mxu1 %vm9588_vm7, %v5999_v10  ;;  %vm4207_vm7 = vcmask 916480  }
 0x1b4   : > { %v1423_v52 = vpop.f32.mrf.mxu2 }
 0x1b5   : > { %v1436_v48 = vpop.f32.mrf.mxu3  ;;  %v1555_v13 = vpop.f32.mrf.mxu0 }
 0x1b6   : > { %v1650_v53 = vadd.f32 %v1555_v13, %v8782_v14  ;;  %v1570_v63 = vpop.f32.mrf.mxu1  ;;  %v7432_v48 = vld [vmem:[#allocation2 + $0x2f0] sm:$0xf0] }
 0x1b7   : > { %v7354_v63 = vld [vmem:[#allocation2 + $0x80] sm:$0xf0] }
 0x1b8   : > { %6000 = vmatmul.msk.bf16.vlgmr.msra.gmra.mxu0 %vm9589_vm9, %v5999_v10  ;;  %vm4214_vm9 = vcmask 1043456  }
 0x1b9   : > { %6002 = vmatmul.msk.bf16.vlgmr.msra.gmra.mxu2 %vm9590_vm10, %v5999_v10  ;;  %3823 = vmatpush.bf16.msra.mxu0 %v6095_v20  ;;  %v6250_v20 = vld [vmem:[#allocation2 + $0x1e0] sm:$0xf]  ;;  %vm4176_vm10 = vcmask 924672  }
 0x1ba   : > { %6003 = vmatmul.msk.bf16.vlgmr.msra.gmra.mxu3 %vm9591_vm6, %v5999_v10 }
 0x1bc   : > { %v1581_v30 = vpop.f32.mrf.mxu2 }
 0x1bd   : > { %v1594_v42 = vpop.f32.mrf.mxu3  ;;  %v1652_v50 = vadd.f32 %v1581_v30, %v1440_v46  ;;  %v1557_v33 = vpop.f32.mrf.mxu0  ;;  %v7384_v46 = vld [vmem:[#allocation2 + $0x170] sm:$0xf0]  ;;  %v6142_v30 = vld [vmem:[#allocation2 + $0x108] sm:$0xf] }
 0x1be   : > { %v1653_v29 = vadd.f32 %v1594_v42, %v1441_v60  ;;  %v1620_v38 = vpop.f32.mrf.mxu1  ;;  %v6191_v1 = vor.u32 %v7384_v46, %v6190_v0  ;;  %v7372_v33 = vld [vmem:[#allocation2 + $0x110] sm:$0xf0]  ;;  %v6262_v0 = vld [vmem:[#allocation2 + $0x1f8] sm:$0xf]  ;;  %v7402_v46 = vld [vmem:[#allocation2 + $0x200] sm:$0xf0] }
 0x1bf   : > { %v1655_v26 = vadd.f32 %v1620_v38, %v1443_v56 }
 0x1c0   : > { %3836 = vmatpush.bf16.msra.mxu1 %v6191_v1  ;;  %v7426_v1 = vld [vmem:[#allocation2 + $0x2c0] sm:$0xf0] }
 0x1c1   : > { %6005 = vmatmul.msk.bf16.vlgmr.msrb.gmra.mxu1 %vm9592_vm0, %v5999_v10  ;;  %vm4210_vm0 = vcmask 64512  }
 0x1c4   : > { %v1583_v8 = vpop.f32.mrf.mxu2  ;;  %3837 = vmatpush.bf16.msra.mxu1 %v6179_v7 }
 0x1c5   : > { %v1596_v36 = vpop.f32.mrf.mxu3  ;;  %v1607_v41 = vpop.f32.mrf.mxu0 }
 0x1c6   : > { %v1654_v14 = vadd.f32 %v1607_v41, %v1442_v21  ;;  %v1622_v32 = vpop.f32.mrf.mxu1  ;;  %v6143_v36 = vor.u32 %v7372_v33, %v6142_v30  ;;  %v6274_v41 = vld [vmem:[#allocation2 + $0x210] sm:$0xf]  ;;  %v7342_v33 = vld [vmem:[#allocation2 + $0x20] sm:$0xf0] }
 0x1c7   : > { %v6370_v32 = vld [vmem:[#allocation2 + $0x2d0] sm:$0xf] }
 0x1c8   : > { %6004 = vmatmul.msk.bf16.vlgmr.msrb.gmra.mxu0 %vm9593_vm11, %v5999_v10  ;;  %3838 = vmatpush.bf16.msra.mxu1 %v6167_v39 }
 0x1c9   : > { %6006 = vmatmul.msk.bf16.vlgmr.msrb.gmra.mxu2 %vm9594_vm12, %v5999_v10  ;;  %vm9600_vm12 = vcmask 777216  }
 0x1ca   : > { %6007 = vmatmul.msk.bf16.vlgmr.msrb.gmra.mxu3 %vm9595_vm15, %v5999_v10  ;;  %v7408_v10 = vld [vmem:[#allocation2 + $0x230] sm:$0xf0] }
 0x1cb   : > { %v6287_v52 = vor.u32 %v7408_v10, %v6286_v17  ;;  %v7363_v17 = vld [vmem:[#allocation2 + $0xc8] sm:$0xf0]  ;;  %v6574_v10 = vld [vmem:[#allocation2 + $0x468] sm:$0xf] }
 0x1cc   : > { %v1633_v35 = vpop.f32.mrf.mxu2 }
 0x1cd   : > { %v1646_v43 = vpop.f32.mrf.mxu3  ;;  %v1656_v55 = vadd.f32 %v1633_v35, %v1444_v54  ;;  %v1609_v40 = vpop.f32.mrf.mxu0  ;;  %v6083_v54 = vor.u32 %v7357_v9, %v6082_v16  ;;  %3849 = vmatpush.bf16.msra.mxu2 %v6287_v52  ;;  %v7423_v16 = vld [vmem:[#allocation2 + $0x2a8] sm:$0xf0]  ;;  %v6034_v9 = vld [vmem:[#allocation2 + $0x30] sm:$0xf]  ;;  %v7480_v52 = vld [vmem:[#allocation2 + $0x470] sm:$0xf0] }
 0x1ce   : > { %v1657_v57 = vadd.f32 %v1646_v43, %v1445_v34  ;;  %v1777_v49 = vpop.f32.mrf.mxu1  ;;  %v7375_v34 = vld [vmem:[#allocation2 + $0x128] sm:$0xf0]  ;;  %v7429_v40 = vld [vmem:[#allocation2 + $0x2d8] sm:$0xf0] }
 0x1cf   : > { %v8839_v3 = vadd.f32 %v1777_v49, %v1651_v23  ;;  %v6155_v51 = vor.u32 %v7375_v34, %v6154_v11  ;;  %v6382_v23 = vld [vmem:[#allocation2 + $0x2e8] sm:$0xf]  ;;  %3824 = vmatpush.bf16.msra.mxu0 %v6083_v54  ;;  %v6371_v49 = vor.u32 %v7429_v40, %v6370_v32  ;;  %v7345_v11 = vld [vmem:[#allocation2 + $0x38] sm:$0xf0] }
 0x1d0   : > { %v6383_v13 = vor.u32 %v7432_v48, %v6382_v23  ;;  %v6035_v34 = vor.u32 %v7345_v11, %v6034_v9  ;;  %v6575_v48 = vor.u32 %v7480_v52, %v6574_v10  ;;  %v7477_v32 = vld [vmem:[#allocation2 + $0x458] sm:$0xf0]  ;;  %v6298_v52 = vld [vmem:[#allocation2 + $0x240] sm:$0xf] }
 0x1d1   : > { %3839 = vmatpush.bf16.msra.mxu1 %v6155_v51  ;;  %v6106_v51 = vld [vmem:[#allocation2 + $0xc0] sm:$0xf] }
 0x1d2   : > { %3862 = vmatpush.bf16.msra.mxu3 %v6383_v13  ;;  %v6107_v23 = vor.u32 %v7363_v17, %v6106_v51  ;;  %v6238_v13 = vld [vmem:[#allocation2 + $0x1c8] sm:$0xf]  ;;  %v7387_v51 = vld [vmem:[#allocation2 + $0x188] sm:$0xf0] }
 0x1d4   : > { %v1635_v4 = vpop.f32.mrf.mxu2 }
 0x1d5   : > { %v1648_v61 = vpop.f32.mrf.mxu3  ;;  %v1764_v18 = vpop.f32.mrf.mxu0  ;;  %3840 = vmatpush.bf16.msra.mxu1 %v6143_v36  ;;  %v6058_v4 = vld [vmem:[#allocation2 + $0x60] sm:$0xf] }
 0x1d6   : > { %v8841_v45 = vadd.f32 %v1764_v18, %v1650_v53  ;;  %v1779_v58 = vpop.f32.mrf.mxu1  ;;  %v6070_v53 = vld [vmem:[#allocation2 + $0x78] sm:$0xf]  ;;  %v7351_v61 = vld [vmem:[#allocation2 + $0x68] sm:$0xf0]  ;;  %v6130_v18 = vld [vmem:[#allocation2 + $0xf0] sm:$0xf]  ;;  %3863 = vmatpush.bf16.msra.mxu3 %v6371_v49 }
 0x1d7   : > { %v6226_v49 = vld [vmem:[#allocation2 + $0x1b0] sm:$0xf] }
 0x1dc   : > { %v1790_v60 = vpop.f32.mrf.mxu2 }
 0x1dd   : > { %v1803_v27 = vpop.f32.mrf.mxu3  ;;  %v8843_v31 = vadd.f32 %v1790_v60, %v1652_v50  ;;  %v1766_v62 = vpop.f32.mrf.mxu0  ;;  %v6358_v60 = vld [vmem:[#allocation2 + $0x2b8] sm:$0xf] }
 0x1de   : > { %v8845_v22 = vadd.f32 %v1803_v27, %v1653_v29  ;;  %v1829_v56 = vpop.f32.mrf.mxu1  ;;  %v6071_v29 = vor.u32 %v7354_v63, %v6070_v53  ;;  %v6263_v27 = vor.u32 %v7402_v46, %v6262_v0  ;;  %v6359_v62 = vor.u32 %v7426_v1, %v6358_v60  ;;  %v7396_v53 = vld [vmem:[#allocation2 + $0x1d0] sm:$0xf0]  ;;  %v6334_v63 = vld [vmem:[#allocation2 + $0x288] sm:$0xf]  ;;  %v6010_v0 = vld [vmem:[#allocation2] sm:$0xf] }
 0x1df   : > { %v8847_v5 = vadd.f32 %v1829_v56, %v1655_v26  ;;  %v6046_v56 = vld [vmem:[#allocation2 + $0x48] sm:$0xf]  ;;  %v6239_v30 = vor.u32 %v7396_v53, %v6238_v13  ;;  %v7339_v46 = vld [vmem:[#allocation2 + $0x8] sm:$0xf0]  ;;  %v7456_v1 = vld [vmem:[#allocation2 + $0x3b0] sm:$0xf0] }
 0x1e0   : > { %3825 = vmatpush.bf16.msra.mxu0 %v6071_v29  ;;  %v6047_v19 = vor.u32 %v7348_v44, %v6046_v56  ;;  %3864 = vmatpush.bf16.msra.mxu3 %v6359_v62  ;;  %v6022_v29 = vld [vmem:[#allocation2 + $0x18] sm:$0xf]  ;;  %v6478_v60 = vld [vmem:[#allocation2 + $0x3a8] sm:$0xf]  ;;  %v7474_v56 = vld [vmem:[#allocation2 + $0x440] sm:$0xf0] }
 0x1e1   : > { %v6550_v62 = vld [vmem:[#allocation2 + $0x438] sm:$0xf]  ;;  %v6479_v44 = vor.u32 %v7456_v1, %v6478_v60  ;;  %v6670_v13 = vld [vmem:[#allocation2 + $0x528] sm:$0xf]  ;;  %v6442_v60 = vld [vmem:[#allocation2 + $0x360] sm:$0xf] }
 0x1e2   : > { %v6514_v1 = vld [vmem:[#allocation2 + $0x3f0] sm:$0xf] }
 0x1e4   : > { %v1792_v12 = vpop.f32.mrf.mxu2 }
 0x1e5   : > { %v1805_v2 = vpop.f32.mrf.mxu3  ;;  %v1816_v21 = vpop.f32.mrf.mxu0 }
 0x1e6   : > { %v8849_v25 = vadd.f32 %v1816_v21, %v1654_v14  ;;  %v1831_v28 = vpop.f32.mrf.mxu1  ;;  %v7405_v14 = vld [vmem:[#allocation2 + $0x218] sm:$0xf0]  ;;  %v6119_v2 = vor.u32 %v7366_v15, %v6118_v47  ;;  %v6346_v21 = vld [vmem:[#allocation2 + $0x2a0] sm:$0xf]  ;;  %v6551_v47 = vor.u32 %v7474_v56, %v6550_v62 }
 0x1e7   : > { %v6275_v43 = vor.u32 %v7405_v14, %v6274_v41  ;;  %v6251_v28 = vor.u32 %v7399_v37, %v6250_v20  ;;  %v6347_v54 = vor.u32 %v7423_v16, %v6346_v21  ;;  %v6023_v41 = vor.u32 %v7342_v33, %v6022_v29  ;;  %v6562_v14 = vld [vmem:[#allocation2 + $0x450] sm:$0xf]  ;;  %v6538_v16 = vld [vmem:[#allocation2 + $0x420] sm:$0xf]  ;;  %v6454_v33 = vld [vmem:[#allocation2 + $0x378] sm:$0xf] }
 0x1e8   : > { %v6563_v40 = vor.u32 %v7477_v32, %v6562_v14  ;;  %v6526_v14 = vld [vmem:[#allocation2 + $0x408] sm:$0xf] }
 0x1e9   : > { %3850 = vmatpush.bf16.msra.mxu2 %v6275_v43  ;;  %3865 = vmatpush.bf16.msra.mxu3 %v6347_v54  ;;  %v7471_v54 = vld [vmem:[#allocation2 + $0x428] sm:$0xf0] }
 0x1ea   : > { %v6539_v10 = vor.u32 %v7471_v54, %v6538_v16  ;;  %v6502_v16 = vld [vmem:[#allocation2 + $0x3d8] sm:$0xf] }
 0x1ec   : > { %v1842_v42 = vpop.f32.mrf.mxu2 }
 0x1ed   : > { %v1855_v50 = vpop.f32.mrf.mxu3  ;;  %v8851_v38 = vadd.f32 %v1842_v42, %v1656_v55  ;;  %v1818_v8 = vpop.f32.mrf.mxu0  ;;  %v6059_v55 = vor.u32 %v7351_v61, %v6058_v4  ;;  %3851 = vmatpush.bf16.msra.mxu2 %v6263_v27  ;;  %v7420_v42 = vld [vmem:[#allocation2 + $0x290] sm:$0xf0]  ;;  %v7393_v4 = vld [vmem:[#allocation2 + $0x1b8] sm:$0xf0]  ;;  %v6322_v61 = vld [vmem:[#allocation2 + $0x270] sm:$0xf]  ;;  %v6011_v27 = vor.u32 %v7339_v46, %v6010_v0 }
 0x1ee   : > { %v8853_v26 = vadd.f32 %v1855_v50, %v1657_v57  ;;  %v8855_v35 = vpop.f32.mrf.mxu1  ;;  %v7369_v57 = vld [vmem:[#allocation2 + $0xf8] sm:$0xf0]  ;;  %v6335_v50 = vor.u32 %v7420_v42, %v6334_v63  ;;  %v7504_v63 = vld [vmem:[#allocation2 + $0x530] sm:$0xf0] }
 0x1ef   : > { %v6131_v58 = vor.u32 %v7369_v57, %v6130_v18  ;;  %3826 = vmatpush.bf16.msra.mxu0 %v6059_v55  ;;  %v6227_v55 = vor.u32 %v7393_v4, %v6226_v49  ;;  %v7417_v57 = vld [vmem:[#allocation2 + $0x278] sm:$0xf0]  ;;  %v7528_v42 = vld [vmem:[#allocation2 + $0x5f0] sm:$0xf0]  ;;  %v6658_v49 = vld [vmem:[#allocation2 + $0x510] sm:$0xf] }
 0x1f0   : > { %3866 = vmatpush.bf16.msra.mxu3 %v6335_v50  ;;  %v6671_v50 = vor.u32 %v7504_v63, %v6670_v13  ;;  %v7501_v4 = vld [vmem:[#allocation2 + $0x518] sm:$0xf0] }
 0x1f1   : > { %3841 = vmatpush.bf16.msra.mxu1 %v6131_v58  ;;  %3852 = vmatpush.bf16.msra.mxu2 %v6251_v28  ;;  %v6323_v58 = vor.u32 %v7417_v57, %v6322_v61  ;;  %v7453_v28 = vld [vmem:[#allocation2 + $0x398] sm:$0xf0]  ;;  %v6754_v61 = vld [vmem:[#allocation2 + $0x5d0] sm:$0xf] }
 0x1f2   : > { %v7525_v57 = vld [vmem:[#allocation2 + $0x5d8] sm:$0xf0] }
 0x1f3   : > { %3827 = vmatpush.bf16.msra.mxu0 %v6047_v19  ;;  %v6310_v19 = vld [vmem:[#allocation2 + $0x258] sm:$0xf]  ;;  %v6755_v46 = vor.u32 %v7525_v57, %v6754_v61  ;;  %v7441_v63 = vld [vmem:[#allocation2 + $0x338] sm:$0xf0] }
 0x1f4   : > { %v1844_v7 = vpop.f32.mrf.mxu2  ;;  %3867 = vmatpush.bf16.msra.mxu3 %v6323_v58  ;;  %v6406_v61 = vld [vmem:[#allocation2 + $0x318] sm:$0xf] }
 0x1f5   : > { %v1857_v6 = vpop.f32.mrf.mxu3  ;;  %v8857_v12 = vpop.f32.mrf.mxu0  ;;  %3842 = vmatpush.bf16.msra.mxu1 %v6119_v2  ;;  %3853 = vmatpush.bf16.msra.mxu2 %v6239_v30  ;;  %v6214_v7 = vld [vmem:[#allocation2 + $0x198] sm:$0xf]  ;;  %v7414_v2 = vld [vmem:[#allocation2 + $0x260] sm:$0xf0]  ;;  %v6766_v30 = vld [vmem:[#allocation2 + $0x5e8] sm:$0xf] }
 0x1f6   : > { %v1988_v39 = vpop.f32.mrf.mxu1  ;;  %v7390_v6 = vld [vmem:[#allocation2 + $0x1a0] sm:$0xf0]  ;;  %v6311_v20 = vor.u32 %v7414_v2, %v6310_v19  ;;  %v6767_v29 = vor.u32 %v7528_v42, %v6766_v30  ;;  %v6490_v30 = vld [vmem:[#allocation2 + $0x3c0] sm:$0xf] }
 0x1f7   : > { %3828 = vmatpush.bf16.msra.mxu0 %v6035_v34  ;;  %v6215_v15 = vor.u32 %v7390_v6, %v6214_v7  ;;  %v6466_v39 = vld [vmem:[#allocation2 + $0x390] sm:$0xf]  ;;  %v6202_v34 = vld [vmem:[#allocation2 + $0x180] sm:$0xf]  ;;  %v6646_v6 = vld [vmem:[#allocation2 + $0x4f8] sm:$0xf] }
 0x1f8   : > { %3868 = vmatpush.bf16.msra.mxu3 %v6311_v20  ;;  %v6467_v11 = vor.u32 %v7453_v28, %v6466_v39  ;;  %v7498_v19 = vld [vmem:[#allocation2 + $0x500] sm:$0xf0] }
 0x1f9   : > { %3843 = vmatpush.bf16.msra.mxu1 %v6107_v23  ;;  %3854 = vmatpush.bf16.msra.mxu2 %v6227_v55  ;;  %v6203_v23 = vor.u32 %v7387_v51, %v6202_v34  ;;  %v6659_v55 = vor.u32 %v7501_v4, %v6658_v49  ;;  %v6647_v2 = vor.u32 %v7498_v19, %v6646_v6  ;;  %v7522_v20 = vld [vmem:[#allocation2 + $0x5c0] sm:$0xf0]  ;;  %v6634_v34 = vld [vmem:[#allocation2 + $0x4e0] sm:$0xf]  ;;  %v7495_v51 = vld [vmem:[#allocation2 + $0x4e8] sm:$0xf0] }
 0x1fa   : > { %v7516_v49 = vld [vmem:[#allocation2 + $0x590] sm:$0xf0]  ;;  %v6394_v19 = vld [vmem:[#allocation2 + $0x300] sm:$0xf] }
 0x1fb   : > { %3829 = vmatpush.bf16.msra.mxu0 %v6023_v41  ;;  %v7450_v41 = vld [vmem:[#allocation2 + $0x380] sm:$0xf0] }
 0x1fc   : > { %v8859_v8 = vpop.f32.mrf.mxu2  ;;  %v6455_v32 = vor.u32 %v7450_v41, %v6454_v33 }
 0x1fd   : > { %v8861_v36 = vpop.f32.mrf.mxu3  ;;  %3888 = vmatpush.bf16.msrb.mxu1 %v6575_v48  ;;  %v1975_v43 = vpop.f32.mrf.mxu0  ;;  %3855 = vmatpush.bf16.msra.mxu2 %v6215_v15  ;;  %v7411_v48 = vld [vmem:[#allocation2 + $0x248] sm:$0xf0]  ;;  %v6742_v15 = vld [vmem:[#allocation2 + $0x5b8] sm:$0xf] }
 0x1fe   : > { %v8863_v18 = vpop.f32.mrf.mxu1  ;;  %v6299_v53 = vor.u32 %v7411_v48, %v6298_v52  ;;  %v7468_v43 = vld [vmem:[#allocation2 + $0x410] sm:$0xf0]  ;;  %v6743_v39 = vor.u32 %v7522_v20, %v6742_v15  ;;  %v7435_v15 = vld [vmem:[#allocation2 + $0x308] sm:$0xf0] }
 0x1ff   : > { %3830 = vmatpush.bf16.msra.mxu0 %v6011_v27  ;;  %v7447_v27 = vld [vmem:[#allocation2 + $0x368] sm:$0xf0]  ;;  %v6395_v20 = vor.u32 %v7435_v15, %v6394_v19  ;;  %v6096_v15 = vld [vmem:[#allocation2 + $0xb4] sm:$0xf0] }
 0x200   : > { %3869 = vmatpush.bf16.msra.mxu3 %v6299_v53  ;;  %v6443_v56 = vor.u32 %v7447_v27, %v6442_v60  ;;  %v6418_v53 = vld [vmem:[#allocation2 + $0x330] sm:$0xf]  ;;  %v7489_v60 = vld [vmem:[#allocation2 + $0x4b8] sm:$0xf0]  ;;  %v7359_v19 = vld [vmem:[#allocation2 + $0xac] sm:$0xf] }
 0x201   : > { %3889 = vmatpush.bf16.msrb.mxu1 %v6563_v40  ;;  %3856 = vmatpush.bf16.msra.mxu2 %v6203_v23  ;;  %v6527_v40 = vor.u32 %v7468_v43, %v6526_v14  ;;  %v7519_v23 = vld [vmem:[#allocation2 + $0x5a8] sm:$0xf0]  ;;  %v6622_v14 = vld [vmem:[#allocation2 + $0x4c8] sm:$0xf]  ;;  %v6706_v27 = vld [vmem:[#allocation2 + $0x570] sm:$0xf] }
 0x202   : > { %v6718_v43 = vld [vmem:[#allocation2 + $0x588] sm:$0xf] }
 0x203   : > { %3875 = vmatpush.bf16.msrb.mxu0 %v6479_v44  ;;  %v7465_v44 = vld [vmem:[#allocation2 + $0x3f8] sm:$0xf0]  ;;  %v6719_v4 = vor.u32 %v7516_v49, %v6718_v43  ;;  %v7383_v49 = vld [vmem:[#allocation2 + $0x16c] sm:$0xf] }
 0x204   : > { %v2001_v37 = vpop.f32.mrf.mxu2  ;;  %3914 = vmatpush.bf16.msrb.mxu3 %v6767_v29  ;;  %v6515_v7 = vor.u32 %v7465_v44, %v6514_v1  ;;  %v7459_v29 = vld [vmem:[#allocation2 + $0x3c8] sm:$0xf0]  ;;  %v7513_v44 = vld [vmem:[#allocation2 + $0x578] sm:$0xf0] }
 0x205   : > { %v2014_v21 = vpop.f32.mrf.mxu3  ;;  %3890 = vmatpush.bf16.msrb.mxu1 %v6551_v47  ;;  %v8865_v9 = vpop.f32.mrf.mxu0  ;;  %3901 = vmatpush.bf16.msrb.mxu2 %v6671_v50  ;;  %v6430_v37 = vld [vmem:[#allocation2 + $0x348] sm:$0xf]  ;;  %v6419_v50 = vor.u32 %v7441_v63, %v6418_v53  ;;  %v6491_v41 = vor.u32 %v7459_v29, %v6490_v30  ;;  %v6707_v6 = vor.u32 %v7513_v44, %v6706_v27  ;;  %v7380_v44 = vld [vmem:[#allocation2 + $0x154] sm:$0xf] }
 0x206   : > { %v2040_v17 = vpop.f32.mrf.mxu1  ;;  %v7444_v21 = vld [vmem:[#allocation2 + $0x350] sm:$0xf0]  ;;  %v2069_v63 = vadd.f32 %v8855_v35, %v8839_v3 }
 0x207   : > { %3876 = vmatpush.bf16.msrb.mxu0 %v6467_v11  ;;  %v6431_v28 = vor.u32 %v7444_v21, %v6430_v37  ;;  %v7462_v11 = vld [vmem:[#allocation2 + $0x3e0] sm:$0xf0]  ;;  %v6730_v17 = vld [vmem:[#allocation2 + $0x5a0] sm:$0xf]  ;;  %v6598_v37 = vld [vmem:[#allocation2 + $0x498] sm:$0xf] }
 0x208   : > { %3915 = vmatpush.bf16.msrb.mxu3 %v6755_v46  ;;  %v6503_v54 = vor.u32 %v7462_v11, %v6502_v16  ;;  %v6731_v13 = vor.u32 %v7519_v23, %v6730_v17  ;;  %v6610_v46 = vld [vmem:[#allocation2 + $0x4b0] sm:$0xf]  ;;  %v7486_v21 = vld [vmem:[#allocation2 + $0x4a0] sm:$0xf0]  ;;  %v6682_v23 = vld [vmem:[#allocation2 + $0x540] sm:$0xf] }
 0x209   : > { %3891 = vmatpush.bf16.msrb.mxu1 %v6539_v10  ;;  %3902 = vmatpush.bf16.msrb.mxu2 %v6659_v55  ;;  %v6635_v10 = vor.u32 %v7495_v51, %v6634_v34  ;;  %v7438_v55 = vld [vmem:[#allocation2 + $0x320] sm:$0xf0]  ;;  %v7483_v34 = vld [vmem:[#allocation2 + $0x488] sm:$0xf0] }
 0x20a   : > { %v6407_v57 = vor.u32 %v7438_v55, %v6406_v61  ;;  %v7510_v16 = vld [vmem:[#allocation2 + $0x560] sm:$0xf0] }
 0x20b   : > { %3877 = vmatpush.bf16.msrb.mxu0 %v6455_v32  ;;  %v7492_v32 = vld [vmem:[#allocation2 + $0x4d0] sm:$0xf0] }
 0x20c   : > { %v8867_v58 = vpop.f32.mrf.mxu2  ;;  %3916 = vmatpush.bf16.msrb.mxu3 %v6743_v39  ;;  %v6599_v39 = vor.u32 %v7486_v21, %v6598_v37  ;;  %v2073_v37 = vadd.f32 %v8863_v18, %v8847_v5 }
 0x20d   : > { %v8869_v0 = vpop.f32.mrf.mxu3  ;;  %3892 = vmatpush.bf16.msrb.mxu1 %v6527_v40  ;;  %v2027_v62 = vpop.f32.mrf.mxu0  ;;  %3903 = vmatpush.bf16.msrb.mxu2 %v6647_v2  ;;  %v6623_v40 = vor.u32 %v7492_v32, %v6622_v14 }
 0x20e   : > { %v8871_v47 = vpop.f32.mrf.mxu1  ;;  %v8890_v14 = vpop.permute.xlu0 %2500 }
 0x20f   : > { %3878 = vmatpush.bf16.msrb.mxu0 %v6443_v56  ;;  %v6611_v56 = vor.u32 %v7489_v60, %v6610_v46  ;;  %v2281_v29 = vadd.f32 %v8871_v47, %v2069_v63  ;;  %v6288_v63 = vld [vmem:[#allocation2 + $0x234] sm:$0xf0] }
 0x210   : > { %3917 = vmatpush.bf16.msrb.mxu3 %v6731_v13 }
 0x211   : > { %3893 = vmatpush.bf16.msrb.mxu1 %v6515_v7  ;;  %3904 = vmatpush.bf16.msrb.mxu2 %v6635_v10 }
 0x213   : > { %3879 = vmatpush.bf16.msrb.mxu0 %v6431_v28  ;;  %v6694_v28 = vld [vmem:[#allocation2 + $0x558] sm:$0xf] }
 0x214   : > { %v2053_v52 = vpop.f32.mrf.mxu2  ;;  %3918 = vmatpush.bf16.msrb.mxu3 %v6719_v4  ;;  %v6695_v11 = vor.u32 %v7510_v16, %v6694_v28  ;;  %v6192_v4 = vld [vmem:[#allocation2 + $0x174] sm:$0xf0] }
 0x215   : > { %v2066_v48 = vpop.f32.mrf.mxu3  ;;  %3894 = vmatpush.bf16.msrb.mxu1 %v6503_v54  ;;  %v8873_v42 = vpop.f32.mrf.mxu0  ;;  %3905 = vmatpush.bf16.msrb.mxu2 %v6623_v40  ;;  %v6586_v54 = vld [vmem:[#allocation2 + $0x480] sm:$0xf]  ;;  %v7507_v52 = vld [vmem:[#allocation2 + $0x548] sm:$0xf0]  ;;  %v2068_v40 = vadd.f32 %v8857_v12, %v8841_v45  ;;  %v6195_v46 = vor.u32 %v7383_v49, %v6192_v4  ;;  %v2070_v45 = vadd.f32 %v8859_v8, %v8843_v31  ;;  %v6072_v49 = vld [vmem:[#allocation2 + $0x84] sm:$0xf0] }
 0x216   : > { %v2200_v33 = vpop.f32.mrf.mxu1  ;;  %v6587_v10 = vor.u32 %v7483_v34, %v6586_v54  ;;  %v6683_v13 = vor.u32 %v7507_v52, %v6682_v23  ;;  %v2071_v12 = vadd.f32 %v8861_v36, %v8845_v22  ;;  %v6099_v36 = vor.u32 %v7359_v19, %v6096_v15  ;;  %v7356_v54 = vld [vmem:[#allocation2 + $0x94] sm:$0xf]  ;;  %v7374_v23 = vld [vmem:[#allocation2 + $0x124] sm:$0xf]  ;;  %v6156_v52 = vld [vmem:[#allocation2 + $0x12c] sm:$0xf0] }
 0x217   : > { %3880 = vmatpush.bf16.msrb.mxu0 %v6419_v50  ;;  %v2280_v35 = vadd.f32 %v8873_v42, %v2068_v40  ;;  %v7353_v40 = vld [vmem:[#allocation2 + $0x7c] sm:$0xf]  ;;  %v6372_v19 = vld [vmem:[#allocation2 + $0x2dc] sm:$0xf0] }
 0x218   : > { %3919 = vmatpush.bf16.msrb.mxu3 %v6707_v6 }
 0x219   : > { %3895 = vmatpush.bf16.msrb.mxu1 %v6491_v41  ;;  %3906 = vmatpush.bf16.msrb.mxu2 %v6611_v56 }
 0x21b   : > { %3881 = vmatpush.bf16.msrb.mxu0 %v6407_v57 }
 0x21c   : > { %v8875_v1 = vpop.f32.mrf.mxu2  ;;  %3920 = vmatpush.bf16.msrb.mxu3 %v6695_v11 }
 0x21d   : > { %v8877_v62 = vpop.f32.mrf.mxu3  ;;  %v2187_v7 = vpop.f32.mrf.mxu0  ;;  %3907 = vmatpush.bf16.msrb.mxu2 %v6599_v39  ;;  %v6168_v39 = vld [vmem:[#allocation2 + $0x144] sm:$0xf0]  ;;  %v2282_v28 = vadd.f32 %v8875_v1, %v2070_v45 }
 0x21e   : > { %v8879_v2 = vpop.f32.mrf.mxu1  ;;  %v6180_v7 = vld [vmem:[#allocation2 + $0x15c] sm:$0xf0]  ;;  %v2283_v16 = vadd.f32 %v8877_v62, %v2071_v12 }
 0x21f   : > { %3882 = vmatpush.bf16.msrb.mxu0 %v6395_v20  ;;  %v6183_v42 = vor.u32 %v7380_v44, %v6180_v7  ;;  %v7377_v20 = vld [vmem:[#allocation2 + $0x13c] sm:$0xf]  ;;  %v2285_v31 = vadd.f32 %v8879_v2, %v2073_v37  ;;  %v6276_v44 = vld [vmem:[#allocation2 + $0x21c] sm:$0xf0]  ;;  %v7428_v7 = vld [vmem:[#allocation2 + $0x2d4] sm:$0xf] }
 0x220   : > { %3921 = vmatpush.bf16.msrb.mxu3 %v6683_v13  ;;  %v6171_v18 = vor.u32 %v7377_v20, %v6168_v39  ;;  %v7350_v20 = vld [vmem:[#allocation2 + $0x64] sm:$0xf]  ;;  %v6060_v37 = vld [vmem:[#allocation2 + $0x6c] sm:$0xf0] }
 0x221   : > { %3908 = vmatpush.bf16.msrb.mxu2 %v6587_v10  ;;  %v6084_v10 = vld [vmem:[#allocation2 + $0x9c] sm:$0xf0] }
 0x224   : > { %v2213_v51 = vpop.f32.mrf.mxu2 }
 0x225   : > { %v2226_v17 = vpop.f32.mrf.mxu3  ;;  %v8881_v48 = vpop.f32.mrf.mxu0 }
 0x226   : > { %v2252_v53 = vpop.f32.mrf.mxu1 }
 0x227   : > { %v7407_v53 = vld [vmem:[#allocation2 + $0x22c] sm:$0xf] }
 0x22c   : > { %v8885_v30 = vpop.f32.mrf.mxu2 }
 0x22d   : > { %v8887_v50 = vpop.f32.mrf.mxu3  ;;  %v2239_v33 = vpop.f32.mrf.mxu0 }
 0x22e   : > { %v2407_v41 = vpop.f32.mrf.mxu1  ;;  %v2072_v33 = vadd.f32 %v8865_v9, %v8849_v25 }
 0x22f   : > { %v2490_v32 = vadd.f32 %v2407_v41, %v2281_v29  ;;  %v7431_v29 = vld [vmem:[#allocation2 + $0x2ec] sm:$0xf]  ;;  %v6087_v41 = vor.u32 %v7356_v54, %v6084_v10  ;;  %v7401_v54 = vld [vmem:[#allocation2 + $0x1fc] sm:$0xf] }
 0x230   : > { %v7425_v10 = vld [vmem:[#allocation2 + $0x2bc] sm:$0xf] }
 0x231   : > { %v2504_v43 = vadd.f32 %v8890_v14, %v2490_v32  ;;  %v6159_v32 = vor.u32 %v7374_v23, %v6156_v52  ;;  %v6360_v23 = vld [vmem:[#allocation2 + $0x2c4] sm:$0xf0]  ;;  %v2075_v52 = vadd.f32 %v8869_v0, %v8853_v26  ;;  %v6252_v26 = vld [vmem:[#allocation2 + $0x1ec] sm:$0xf0] }
 0x233   : > { %vm2512_vm14 = vcmp.ge.f32.partialorder %v2504_v43, 0.0  ;;  %v2520_v3 = vmul.f32 0.01, %v2504_v43 }
 0x234   : > { %v2265_v61 = vpop.f32.mrf.mxu2 }
 0x235   : > { %v2278_v55 = vpop.f32.mrf.mxu3  ;;  %v2394_v57 = vpop.f32.mrf.mxu0  ;;  %v2528_v47 = vsel %vm2512_vm14, %v2504_v43, %v2520_v3  ;;  %v6384_v43 = vld [vmem:[#allocation2 + $0x2f4] sm:$0xf0]  ;;  %vm4301_vm14 = vcmask 908288  }
 0x236   : > { %v2489_v60 = vadd.f32 %v2394_v57, %v2280_v35  ;;  %v2409_v27 = vpop.f32.mrf.mxu1  ;;  %v8896_v56 = vpack.c.bf16 %v2528_v47, %v2528_v47  ;;  %v2284_v35 = vadd.f32 %v8881_v48, %v2072_v33  ;;  %v6291_v55 = vor.u32 %v7407_v53, %v6288_v63  ;;  %v7371_v57 = vld [vmem:[#allocation2 + $0x10c] sm:$0xf]  ;;  %v6144_v47 = vld [vmem:[#allocation2 + $0x114] sm:$0xf0]  ;;  %v6120_v33 = vld [vmem:[#allocation2 + $0xe4] sm:$0xf0] }
 0x237   : > { %v6387_v9 = vor.u32 %v7431_v29, %v6384_v43  ;;  %v7404_v27 = vld [vmem:[#allocation2 + $0x214] sm:$0xf]  ;;  %v2287_v53 = vadd.f32 %v8887_v50, %v2075_v52  ;;  %v6363_v29 = vor.u32 %v7425_v10, %v6360_v23  ;;  %v6036_v50 = vld [vmem:[#allocation2 + $0x3c] sm:$0xf0] }
 0x238   : > { %v2503_v6 = vadd.f32 %v8890_v14, %v2489_v60  ;;  %3844 = vmatmul.bf16.vlgmr.msra.gmra.mxu1 %v8896_v56  ;;  %v6075_v60 = vor.u32 %v7353_v40, %v6072_v49  ;;  %v7422_v40 = vld [vmem:[#allocation2 + $0x2a4] sm:$0xf]  ;;  %v6228_v52 = vld [vmem:[#allocation2 + $0x1bc] sm:$0xf0] }
 0x239   : > { %3940 = vmatpush.bf16.msra.mxu1 %v6195_v46 }
 0x23a   : > { %vm2511_vm13 = vcmp.ge.f32.partialorder %v2503_v6, 0.0  ;;  %v2519_v21 = vmul.f32 0.01, %v2503_v6 }
 0x23c   : > { %v2527_v8 = vsel %vm2511_vm13, %v2503_v6, %v2519_v21  ;;  %v2420_v11 = vpop.f32.mrf.mxu2  ;;  %vm9603_vm13 = vcmask 793600  }
 0x23d   : > { %v2433_v22 = vpop.f32.mrf.mxu3  ;;  %v8909_v34 = vpack.c.bf16 %v2527_v8, %v2527_v8  ;;  %v2491_v51 = vadd.f32 %v2420_v11, %v2282_v28  ;;  %3941 = vmatpush.bf16.msra.mxu1 %v6183_v42  ;;  %v2396_v5 = vpop.f32.mrf.mxu0  ;;  %v6147_v28 = vor.u32 %v7371_v57, %v6144_v47  ;;  %v6279_v8 = vor.u32 %v7404_v27, %v6276_v44  ;;  %v7479_v44 = vld [vmem:[#allocation2 + $0x46c] sm:$0xf] }
 0x23e   : > { %v2492_v17 = vadd.f32 %v2433_v22, %v2283_v16  ;;  %v2459_v1 = vpop.f32.mrf.mxu1  ;;  %v6375_v11 = vor.u32 %v7428_v7, %v6372_v19  ;;  %v7368_v22 = vld [vmem:[#allocation2 + $0xf4] sm:$0xf]  ;;  %v6063_v5 = vor.u32 %v7350_v20, %v6060_v37  ;;  %v6576_v7 = vld [vmem:[#allocation2 + $0x474] sm:$0xf0]  ;;  %v7419_v19 = vld [vmem:[#allocation2 + $0x28c] sm:$0xf] }
 0x23f   : > { %v2505_v62 = vadd.f32 %v8890_v14, %v2491_v51  ;;  %v2494_v13 = vadd.f32 %v2459_v1, %v2285_v31  ;;  %3831 = vmatmul.bf16.vlgmr.msra.gmra.mxu0 %v8909_v34  ;;  %v2074_v51 = vadd.f32 %v8867_v58, %v8851_v38  ;;  %v7347_v1 = vld [vmem:[#allocation2 + $0x4c] sm:$0xf]  ;;  %v7365_v58 = vld [vmem:[#allocation2 + $0xdc] sm:$0xf] }
 0x240   : > { %v2506_v2 = vadd.f32 %v8890_v14, %v2492_v17  ;;  %3927 = vmatpush.bf16.msra.mxu0 %v6099_v36  ;;  %v6132_v36 = vld [vmem:[#allocation2 + $0xfc] sm:$0xf0]  ;;  %v6123_v57 = vor.u32 %v7365_v58, %v6120_v33  ;;  %v7455_v58 = vld [vmem:[#allocation2 + $0x3ac] sm:$0xf]  ;;  %v7473_v33 = vld [vmem:[#allocation2 + $0x43c] sm:$0xf] }
 0x241   : > { %vm2513_vm2 = vcmp.ge.f32.partialorder %v2505_v62, 0.0  ;;  %v2521_v4 = vmul.f32 0.01, %v2505_v62  ;;  %3942 = vmatpush.bf16.msra.mxu1 %v6171_v18  ;;  %v2508_v61 = vadd.f32 %v8890_v14, %v2494_v13  ;;  %v6264_v18 = vld [vmem:[#allocation2 + $0x204] sm:$0xf0]  ;;  %v6135_v38 = vor.u32 %v7368_v22, %v6132_v36 }
 0x242   : > { %vm2514_vm1 = vcmp.ge.f32.partialorder %v2506_v2, 0.0  ;;  %v2522_v3 = vmul.f32 0.01, %v2506_v2  ;;  %v6267_v63 = vor.u32 %v7401_v54, %v6264_v18  ;;  %v7392_v18 = vld [vmem:[#allocation2 + $0x1b4] sm:$0xf] }
 0x243   : > { %v2529_v46 = vsel %vm2513_vm2, %v2505_v62, %v2521_v4  ;;  %vm2516_vm3 = vcmp.ge.f32.partialorder %v2508_v61, 0.0  ;;  %v2524_v12 = vmul.f32 0.01, %v2508_v61  ;;  %v6048_v62 = vld [vmem:[#allocation2 + $0x54] sm:$0xf0] }
 0x244   : > { %v2530_v25 = vsel %vm2514_vm1, %v2506_v2, %v2522_v3  ;;  %v8918_v6 = vpack.c.bf16 %v2529_v46, %v2529_v46  ;;  %v2422_v42 = vpop.f32.mrf.mxu2  ;;  %3928 = vmatpush.bf16.msra.mxu0 %v6087_v41  ;;  %v2286_v2 = vadd.f32 %v8885_v30, %v2074_v51  ;;  %v7398_v41 = vld [vmem:[#allocation2 + $0x1e4] sm:$0xf]  ;;  %v6348_v30 = vld [vmem:[#allocation2 + $0x2ac] sm:$0xf0]  ;;  %vm9606_vm1 = vcmask 785408  }
 0x245   : > { %v8920_v45 = vpack.c.bf16 %v2530_v25, %v2530_v25  ;;  %v2435_v48 = vpop.f32.mrf.mxu3  ;;  %3943 = vmatpush.bf16.msra.mxu1 %v6159_v32  ;;  %v2446_v15 = vpop.f32.mrf.mxu0  ;;  %v2532_v21 = vsel %vm2516_vm3, %v2508_v61, %v2524_v12  ;;  %v7344_v61 = vld [vmem:[#allocation2 + $0x34] sm:$0xf]  ;;  %v6255_v47 = vor.u32 %v7398_v41, %v6252_v26  ;;  %v7362_v46 = vld [vmem:[#allocation2 + $0xc4] sm:$0xf]  ;;  %v6108_v25 = vld [vmem:[#allocation2 + $0xcc] sm:$0xf0]  ;;  %v6351_v27 = vor.u32 %v7422_v40, %v6348_v30 }
 0x246   : > { %v2493_v39 = vadd.f32 %v2446_v15, %v2284_v35  ;;  %3857 = vmatmul.bf16.vlgmr.msra.gmra.mxu2 %v8918_v6  ;;  %v2461_v16 = vpop.f32.mrf.mxu1  ;;  %v8924_v31 = vpack.c.bf16 %v2532_v21, %v2532_v21  ;;  %v6051_v35 = vor.u32 %v7347_v1, %v6048_v62  ;;  %v7395_v12 = vld [vmem:[#allocation2 + $0x1cc] sm:$0xf]  ;;  %v6039_v42 = vor.u32 %v7344_v61, %v6036_v50  ;;  %v6240_v48 = vld [vmem:[#allocation2 + $0x1d4] sm:$0xf0]  ;;  %v7416_v1 = vld [vmem:[#allocation2 + $0x274] sm:$0xf] }
 0x247   : > { %3870 = vmatmul.bf16.vlgmr.msra.gmra.mxu3 %v8920_v45  ;;  %3953 = vmatpush.bf16.msra.mxu2 %v6291_v55  ;;  %v6336_v15 = vld [vmem:[#allocation2 + $0x294] sm:$0xf0]  ;;  %v6111_v21 = vor.u32 %v7362_v46, %v6108_v25  ;;  %v6243_v36 = vor.u32 %v7395_v12, %v6240_v48  ;;  %v6324_v62 = vld [vmem:[#allocation2 + $0x27c] sm:$0xf0]  ;;  %v6552_v41 = vld [vmem:[#allocation2 + $0x444] sm:$0xf0] }
 0x248   : > { %3966 = vmatpush.bf16.msra.mxu3 %v6387_v9  ;;  %v2507_v17 = vadd.f32 %v8890_v14, %v2493_v39  ;;  %3929 = vmatpush.bf16.msra.mxu0 %v6075_v60  ;;  %v6024_v39 = vld [vmem:[#allocation2 + $0x24] sm:$0xf0]  ;;  %v6339_v54 = vor.u32 %v7419_v19, %v6336_v15  ;;  %v7389_v26 = vld [vmem:[#allocation2 + $0x19c] sm:$0xf]  ;;  %v7470_v61 = vld [vmem:[#allocation2 + $0x424] sm:$0xf] }
 0x249   : > { %3896 = vmatmul.bf16.vlgmr.msrb.gmra.mxu1 %v8924_v31  ;;  %v6312_v40 = vld [vmem:[#allocation2 + $0x264] sm:$0xf0]  ;;  %v6204_v46 = vld [vmem:[#allocation2 + $0x18c] sm:$0xf0]  ;;  %v7410_v25 = vld [vmem:[#allocation2 + $0x244] sm:$0xf] }
 0x24a   : > { %vm2515_vm4 = vcmp.ge.f32.partialorder %v2507_v17, 0.0  ;;  %v2523_v13 = vmul.f32 0.01, %v2507_v17  ;;  %3944 = vmatpush.bf16.msra.mxu1 %v6147_v28  ;;  %v6768_v12 = vld [vmem:[#allocation2 + $0x5f4] sm:$0xf0]  ;;  %vm9607_vm3 = vmmov %vm9603_vm13 }
 0x24b   : > { %3954 = vmatpush.bf16.msra.mxu2 %v6279_v8  ;;  %v6579_v8 = vor.u32 %v7479_v44, %v6576_v7  ;;  %v6672_v44 = vld [vmem:[#allocation2 + $0x534] sm:$0xf0]  ;;  %v7527_v7 = vld [vmem:[#allocation2 + $0x5ec] sm:$0xf]  ;;  %v7449_v48 = vld [vmem:[#allocation2 + $0x37c] sm:$0xf] }
 0x24c   : > { %3967 = vmatpush.bf16.msra.mxu3 %v6375_v11  ;;  %v2531_v0 = vsel %vm2515_vm4, %v2507_v17, %v2523_v13  ;;  %v2472_v32 = vpop.f32.mrf.mxu2  ;;  %3930 = vmatpush.bf16.msra.mxu0 %v6063_v5  ;;  %v7476_v17 = vld [vmem:[#allocation2 + $0x454] sm:$0xf]  ;;  %v6564_v5 = vld [vmem:[#allocation2 + $0x45c] sm:$0xf0]  ;;  %v6012_v13 = vld [vmem:[#allocation2 + $0xc] sm:$0xf0] }
 0x24d   : > { %v2485_v43 = vpop.f32.mrf.mxu3  ;;  %v8934_v49 = vpack.c.bf16 %v2531_v0, %v2531_v0  ;;  %v2495_v4 = vadd.f32 %v2472_v32, %v2286_v2  ;;  %v2448_v55 = vpop.f32.mrf.mxu0  ;;  %v7338_v2 = vld [vmem:[#allocation2 + $0x4] sm:$0xf]  ;;  %v6216_v32 = vld [vmem:[#allocation2 + $0x1a4] sm:$0xf0]  ;;  %vm9608_vm4 = vmmov %vm9600_vm12 }
 0x24e   : > { %v2496_v3 = vadd.f32 %v2485_v43, %v2287_v53  ;;  %3945 = vmatpush.bf16.msra.mxu1 %v6135_v38  ;;  %v6567_v38 = vor.u32 %v7476_v17, %v6564_v5  ;;  %v6480_v53 = vld [vmem:[#allocation2 + $0x3b4] sm:$0xf0]  ;;  %v6015_v0 = vor.u32 %v7338_v2, %v6012_v13  ;;  %v7413_v43 = vld [vmem:[#allocation2 + $0x25c] sm:$0xf]  ;;  %v6219_v50 = vor.u32 %v7389_v26, %v6216_v32  ;;  %v6456_v19 = vld [vmem:[#allocation2 + $0x384] sm:$0xf0] }
 0x24f   : > { %v2509_v9 = vadd.f32 %v8890_v14, %v2495_v4  ;;  %3955 = vmatpush.bf16.msra.mxu2 %v6267_v63  ;;  %3883 = vmatmul.bf16.vlgmr.msrb.gmra.mxu0 %v8934_v49  ;;  %v6231_v63 = vor.u32 %v7392_v18, %v6228_v52  ;;  %v6483_v30 = vor.u32 %v7455_v58, %v6480_v53  ;;  %v7446_v17 = vld [vmem:[#allocation2 + $0x364] sm:$0xf]  ;;  %v6444_v5 = vld [vmem:[#allocation2 + $0x36c] sm:$0xf0]  ;;  %v7464_v18 = vld [vmem:[#allocation2 + $0x3f4] sm:$0xf] }
 0x250   : > { %v2510_v60 = vadd.f32 %v8890_v14, %v2496_v3  ;;  %3968 = vmatpush.bf16.msra.mxu3 %v6363_v29  ;;  %3931 = vmatpush.bf16.msra.mxu0 %v6051_v35  ;;  %v7341_v14 = vld [vmem:[#allocation2 + $0x1c] sm:$0xf]  ;;  %v6327_v29 = vor.u32 %v7416_v1, %v6324_v62  ;;  %v6555_v4 = vor.u32 %v7473_v33, %v6552_v41  ;;  %v7452_v3 = vld [vmem:[#allocation2 + $0x394] sm:$0xf]  ;;  %v6468_v35 = vld [vmem:[#allocation2 + $0x39c] sm:$0xf0] }
 0x251   : > { %vm2517_vm8 = vcmp.ge.f32.partialorder %v2509_v9, 0.0  ;;  %v2525_v20 = vmul.f32 0.01, %v2509_v9  ;;  %v6027_v23 = vor.u32 %v7341_v14, %v6024_v39  ;;  %v6315_v55 = vor.u32 %v7413_v43, %v6312_v40  ;;  %v7497_v1 = vld [vmem:[#allocation2 + $0x4fc] sm:$0xf] }
 0x252   : > { %vm2518_vm5 = vcmp.ge.f32.partialorder %v2510_v60, 0.0  ;;  %v2526_v37 = vmul.f32 0.01, %v2510_v60  ;;  %3946 = vmatpush.bf16.msra.mxu1 %v6123_v57  ;;  %v6540_v57 = vld [vmem:[#allocation2 + $0x42c] sm:$0xf0]  ;;  %v6771_v39 = vor.u32 %v7527_v7, %v6768_v12  ;;  %v6447_v62 = vor.u32 %v7446_v17, %v6444_v5 }
 0x253   : > { %v2533_v28 = vsel %vm2517_vm8, %v2509_v9, %v2525_v20  ;;  %3956 = vmatpush.bf16.msra.mxu2 %v6255_v47  ;;  %v7386_v47 = vld [vmem:[#allocation2 + $0x184] sm:$0xf]  ;;  %v6300_v9 = vld [vmem:[#allocation2 + $0x24c] sm:$0xf0]  ;;  %v6648_v2 = vld [vmem:[#allocation2 + $0x504] sm:$0xf0] }
 0x254   : > { %v2534_v16 = vsel %vm2518_vm5, %v2510_v60, %v2526_v37  ;;  %3969 = vmatpush.bf16.msra.mxu3 %v6351_v27  ;;  %v8939_v11 = vpack.c.bf16 %v2533_v28, %v2533_v28  ;;  %v2474_v51 = vpop.f32.mrf.mxu2  ;;  %3932 = vmatpush.bf16.msra.mxu0 %v6039_v42  ;;  %v7503_v60 = vld [vmem:[#allocation2 + $0x52c] sm:$0xf]  ;;  %v6471_v27 = vor.u32 %v7452_v3, %v6468_v35  ;;  %v7500_v28 = vld [vmem:[#allocation2 + $0x514] sm:$0xf]  ;;  %v7521_v13 = vld [vmem:[#allocation2 + $0x5bc] sm:$0xf] }
 0x255   : > { %v8941_v22 = vpack.c.bf16 %v2534_v16, %v2534_v16  ;;  %v2487_v10 = vpop.f32.mrf.mxu3  ;;  %v6543_v42 = vor.u32 %v7470_v61, %v6540_v57  ;;  %v6207_v15 = vor.u32 %v7386_v47, %v6204_v46  ;;  %v6303_v20 = vor.u32 %v7410_v25, %v6300_v9  ;;  %v7467_v37 = vld [vmem:[#allocation2 + $0x40c] sm:$0xf]  ;;  %v6504_v33 = vld [vmem:[#allocation2 + $0x3e4] sm:$0xf0]  ;;  %v6636_v43 = vld [vmem:[#allocation2 + $0x4ec] sm:$0xf0] }
 0x256   : > { %3947 = vmatpush.bf16.msra.mxu1 %v6111_v21  ;;  %3909 = vmatmul.bf16.vlgmr.msrb.gmra.mxu2 %v8939_v11  ;;  %v6528_v21 = vld [vmem:[#allocation2 + $0x414] sm:$0xf0]  ;;  %v6675_v14 = vor.u32 %v7503_v60, %v6672_v44  ;;  %v6459_v16 = vor.u32 %v7449_v48, %v6456_v19  ;;  %v6516_v10 = vld [vmem:[#allocation2 + $0x3fc] sm:$0xf0]  ;;  %v7443_v53 = vld [vmem:[#allocation2 + $0x34c] sm:$0xf]  ;;  %v6651_v41 = vor.u32 %v7497_v1, %v6648_v2 }
 0x257   : > { %3922 = vmatmul.bf16.vlgmr.msrb.gmra.mxu3 %v8941_v22  ;;  %3957 = vmatpush.bf16.msra.mxu2 %v6243_v36  ;;  %v7524_v36 = vld [vmem:[#allocation2 + $0x5d4] sm:$0xf]  ;;  %v6531_v51 = vor.u32 %v7467_v37, %v6528_v21  ;;  %v6519_v58 = vor.u32 %v7464_v18, %v6516_v10  ;;  %v7518_v40 = vld [vmem:[#allocation2 + $0x5a4] sm:$0xf]  ;;  %v6420_v35 = vld [vmem:[#allocation2 + $0x33c] sm:$0xf0] }
 0x258   : > { %3970 = vmatpush.bf16.msra.mxu3 %v6339_v54  ;;  %3933 = vmatpush.bf16.msra.mxu0 %v6027_v23  ;;  %v6756_v54 = vld [vmem:[#allocation2 + $0x5dc] sm:$0xf0]  ;;  %v7440_v3 = vld [vmem:[#allocation2 + $0x334] sm:$0xf]  ;;  %v7458_v61 = vld [vmem:[#allocation2 + $0x3c4] sm:$0xf] }
 0x259   : > { %3948 = vmatmul.bf16.vlgmr.msra.gmra.mxu1 %v8896_v56  ;;  %v6759_v52 = vor.u32 %v7524_v36, %v6756_v54  ;;  %v6198_v47 = vld [vmem:[#allocation2 + $0x170] sm:$0xf]  ;;  %v7385_v46 = vld [vmem:[#allocation2 + $0x178] sm:$0xf0]  ;;  %v7491_v25 = vld [vmem:[#allocation2 + $0x4cc] sm:$0xf]  ;;  %v6423_v9 = vor.u32 %v7440_v3, %v6420_v35 }
 0x25a   : > { %3992 = vmatpush.bf16.msrb.mxu1 %v6579_v8  ;;  %v6660_v8 = vld [vmem:[#allocation2 + $0x51c] sm:$0xf0]  ;;  %v6624_v60 = vld [vmem:[#allocation2 + $0x4d4] sm:$0xf0]  ;;  %v7437_v12 = vld [vmem:[#allocation2 + $0x31c] sm:$0xf]  ;;  %v6199_v48 = vor.u32 %v7385_v46, %v6198_v47 }
 0x25b   : > { %3958 = vmatpush.bf16.msra.mxu2 %v6231_v63  ;;  %v6663_v23 = vor.u32 %v7500_v28, %v6660_v8  ;;  %v6432_v63 = vld [vmem:[#allocation2 + $0x354] sm:$0xf0]  ;;  %v6627_v19 = vor.u32 %v7491_v25, %v6624_v60  ;;  %v7382_v37 = vld [vmem:[#allocation2 + $0x160] sm:$0xf0]  ;;  %v7488_v21 = vld [vmem:[#allocation2 + $0x4b4] sm:$0xf] }
 0x25c   : > { %3971 = vmatpush.bf16.msra.mxu3 %v6327_v29  ;;  %3934 = vmatpush.bf16.msra.mxu0 %v6015_v0  ;;  %v7461_v29 = vld [vmem:[#allocation2 + $0x3dc] sm:$0xf]  ;;  %v7494_v0 = vld [vmem:[#allocation2 + $0x4e4] sm:$0xf]  ;;  %v6435_v32 = vor.u32 %v7443_v53, %v6432_v63  ;;  %v6720_v44 = vld [vmem:[#allocation2 + $0x594] sm:$0xf0] }
 0x25d   : > { %v7512_v28 = vld [vmem:[#allocation2 + $0x574] sm:$0xf]  ;;  %v7434_v8 = vld [vmem:[#allocation2 + $0x304] sm:$0xf]  ;;  %v6396_v36 = vld [vmem:[#allocation2 + $0x30c] sm:$0xf0] }
 0x25e   : > { %3993 = vmatpush.bf16.msrb.mxu1 %v6567_v38  ;;  %v6744_v38 = vld [vmem:[#allocation2 + $0x5c4] sm:$0xf0]  ;;  %v7361_v17 = vld [vmem:[#allocation2 + $0xb8] sm:$0xf0]  ;;  %v6174_v10 = vld [vmem:[#allocation2 + $0x140] sm:$0xf]  ;;  %v6399_v1 = vor.u32 %v7434_v8, %v6396_v36 }
 0x25f   : > { %3959 = vmatpush.bf16.msra.mxu2 %v6219_v50  ;;  %3935 = vmatmul.bf16.vlgmr.msra.gmra.mxu0 %v8909_v34  ;;  %v6747_v26 = vor.u32 %v7521_v13, %v6744_v38  ;;  %v6492_v50 = vld [vmem:[#allocation2 + $0x3cc] sm:$0xf0]  ;;  %v7509_v2 = vld [vmem:[#allocation2 + $0x55c] sm:$0xf]  ;;  %v6696_v13 = vld [vmem:[#allocation2 + $0x564] sm:$0xf0] }
 0x260   : > { %3979 = vmatpush.bf16.msrb.mxu0 %v6483_v30  ;;  %3972 = vmatpush.bf16.msra.mxu3 %v6315_v55  ;;  %v6732_v30 = vld [vmem:[#allocation2 + $0x5ac] sm:$0xf0]  ;;  %v6639_v55 = vor.u32 %v7494_v0, %v6636_v43  ;;  %v6495_v7 = vor.u32 %v7458_v61, %v6492_v50  ;;  %v6090_v53 = vld [vmem:[#allocation2 + $0x98] sm:$0xf]  ;;  %v7358_v63 = vld [vmem:[#allocation2 + $0xa0] sm:$0xf0] }
 0x261   : > { %v6735_v57 = vor.u32 %v7518_v40, %v6732_v30  ;;  %v7482_v0 = vld [vmem:[#allocation2 + $0x484] sm:$0xf]  ;;  %v6684_v40 = vld [vmem:[#allocation2 + $0x54c] sm:$0xf0]  ;;  %v7409_v3 = vld [vmem:[#allocation2 + $0x238] sm:$0xf0] }
 0x262   : > { %3994 = vmatpush.bf16.msrb.mxu1 %v6555_v4  ;;  %v6507_v4 = vor.u32 %v7461_v29, %v6504_v33  ;;  %v6162_v29 = vld [vmem:[#allocation2 + $0x128] sm:$0xf]  ;;  %v7506_v43 = vld [vmem:[#allocation2 + $0x544] sm:$0xf]  ;;  %v6294_v30 = vld [vmem:[#allocation2 + $0x230] sm:$0xf] }
 0x263   : > { %3960 = vmatpush.bf16.msra.mxu2 %v6207_v15  ;;  %v6390_v35 = vld [vmem:[#allocation2 + $0x2f0] sm:$0xf]  ;;  %v7433_v61 = vld [vmem:[#allocation2 + $0x2f8] sm:$0xf0]  ;;  %v6687_v46 = vor.u32 %v7506_v43, %v6684_v40  ;;  %v6295_v25 = vor.u32 %v7409_v3, %v6294_v30  ;;  %v7403_v8 = vld [vmem:[#allocation2 + $0x208] sm:$0xf0] }
 0x264   : > { %3980 = vmatpush.bf16.msrb.mxu0 %v6471_v27  ;;  %3973 = vmatpush.bf16.msra.mxu3 %v6303_v20  ;;  %v7515_v27 = vld [vmem:[#allocation2 + $0x58c] sm:$0xf]  ;;  %v6186_v20 = vld [vmem:[#allocation2 + $0x158] sm:$0xf]  ;;  %v6150_v60 = vld [vmem:[#allocation2 + $0x110] sm:$0xf] }
 0x265   : > { %v6723_v15 = vor.u32 %v7515_v27, %v6720_v44  ;;  %v6187_v54 = vor.u32 %v7382_v37, %v6186_v20  ;;  %v7373_v27 = vld [vmem:[#allocation2 + $0x118] sm:$0xf0]  ;;  %v6282_v44 = vld [vmem:[#allocation2 + $0x218] sm:$0xf]  ;;  %v6366_v36 = vld [vmem:[#allocation2 + $0x2c0] sm:$0xf] }
 0x266   : > { %3995 = vmatpush.bf16.msrb.mxu1 %v6543_v42  ;;  %3961 = vmatmul.bf16.vlgmr.msra.gmra.mxu2 %v8918_v6  ;;  %v6408_v42 = vld [vmem:[#allocation2 + $0x324] sm:$0xf0]  ;;  %v6151_v20 = vor.u32 %v7373_v27, %v6150_v60  ;;  %v6246_v40 = vld [vmem:[#allocation2 + $0x1d0] sm:$0xf]  ;;  %v7397_v30 = vld [vmem:[#allocation2 + $0x1d8] sm:$0xf0] }
 0x267   : > { %4005 = vmatpush.bf16.msrb.mxu2 %v6675_v14  ;;  %3974 = vmatmul.bf16.vlgmr.msra.gmra.mxu3 %v8920_v45  ;;  %v6411_v14 = vor.u32 %v7437_v12, %v6408_v42  ;;  %v7406_v12 = vld [vmem:[#allocation2 + $0x220] sm:$0xf0]  ;;  %v6378_v42 = vld [vmem:[#allocation2 + $0x2d8] sm:$0xf]  ;;  %v7421_v3 = vld [vmem:[#allocation2 + $0x298] sm:$0xf0] }
 0x268   : > { %4018 = vmatpush.bf16.msrb.mxu3 %v6771_v39  ;;  %3981 = vmatpush.bf16.msrb.mxu0 %v6459_v16  ;;  %v6612_v39 = vld [vmem:[#allocation2 + $0x4bc] sm:$0xf0]  ;;  %v6283_v37 = vor.u32 %v7406_v12, %v6282_v44  ;;  %v6234_v60 = vld [vmem:[#allocation2 + $0x1b8] sm:$0xf]  ;;  %v7394_v27 = vld [vmem:[#allocation2 + $0x1c0] sm:$0xf0] }
 0x269   : > { %v6708_v16 = vld [vmem:[#allocation2 + $0x57c] sm:$0xf0]  ;;  %v6615_v5 = vor.u32 %v7488_v21, %v6612_v39  ;;  %v7370_v39 = vld [vmem:[#allocation2 + $0x100] sm:$0xf0]  ;;  %v6330_v44 = vld [vmem:[#allocation2 + $0x278] sm:$0xf] }
 0x26a   : > { %3996 = vmatpush.bf16.msrb.mxu1 %v6531_v51  ;;  %v6102_v51 = vld [vmem:[#allocation2 + $0xb0] sm:$0xf]  ;;  %v6711_v18 = vor.u32 %v7512_v28, %v6708_v16  ;;  %v6270_v28 = vld [vmem:[#allocation2 + $0x200] sm:$0xf]  ;;  %v6018_v12 = vld [vmem:[#allocation2 + $0x8] sm:$0xf] }
 0x26b   : > { %4006 = vmatpush.bf16.msrb.mxu2 %v6663_v23  ;;  %v7379_v23 = vld [vmem:[#allocation2 + $0x148] sm:$0xf0]  ;;  %v6103_v38 = vor.u32 %v7361_v17, %v6102_v51  ;;  %v6054_v51 = vld [vmem:[#allocation2 + $0x50] sm:$0xf]  ;;  %v7349_v17 = vld [vmem:[#allocation2 + $0x58] sm:$0xf0] }
 0x26c   : > { %4019 = vmatpush.bf16.msrb.mxu3 %v6759_v52  ;;  %3982 = vmatpush.bf16.msrb.mxu0 %v6447_v62  ;;  %v7485_v52 = vld [vmem:[#allocation2 + $0x49c] sm:$0xf]  ;;  %v6600_v62 = vld [vmem:[#allocation2 + $0x4a4] sm:$0xf0]  ;;  %vm9609_vm8 = vmmov %vm9606_vm1  ;;  %vm4548_vm5 = vcmask 662528  }
 0x26d   : > { %v6603_v33 = vor.u32 %v7485_v52, %v6600_v62  ;;  %v7367_v52 = vld [vmem:[#allocation2 + $0xe8] sm:$0xf0]  ;;  %v6055_v62 = vor.u32 %v7349_v17, %v6054_v51  ;;  %v6474_v51 = vld [vmem:[#allocation2 + $0x398] sm:$0xf]  ;;  %v7454_v17 = vld [vmem:[#allocation2 + $0x3a0] sm:$0xf0] }
 0x26e   : > { %3997 = vmatpush.bf16.msrb.mxu1 %v6519_v58  ;;  %v6175_v58 = vor.u32 %v7379_v23, %v6174_v10  ;;  %v6126_v23 = vld [vmem:[#allocation2 + $0xe0] sm:$0xf] }
 0x26f   : > { %4007 = vmatpush.bf16.msrb.mxu2 %v6651_v41  ;;  %v6699_v41 = vor.u32 %v7509_v2, %v6696_v13  ;;  %v7400_v2 = vld [vmem:[#allocation2 + $0x1f0] sm:$0xf0]  ;;  %v6354_v13 = vld [vmem:[#allocation2 + $0x2a8] sm:$0xf] }
 0x270   : > { %4020 = vmatpush.bf16.msrb.mxu3 %v6747_v26  ;;  %3983 = vmatpush.bf16.msrb.mxu0 %v6435_v32  ;;  %v7376_v26 = vld [vmem:[#allocation2 + $0x130] sm:$0xf0]  ;;  %v6588_v32 = vld [vmem:[#allocation2 + $0x48c] sm:$0xf0] }
 0x271   : > { %v6163_v50 = vor.u32 %v7376_v26, %v6162_v29  ;;  %v6591_v47 = vor.u32 %v7482_v0, %v6588_v32  ;;  %v6114_v29 = vld [vmem:[#allocation2 + $0xc8] sm:$0xf]  ;;  %v7364_v26 = vld [vmem:[#allocation2 + $0xd0] sm:$0xf0]  ;;  %v6582_v0 = vld [vmem:[#allocation2 + $0x470] sm:$0xf] }
 0x272   : > { %3998 = vmatpush.bf16.msrb.mxu1 %v6507_v4  ;;  %v6091_v4 = vor.u32 %v7358_v63, %v6090_v53  ;;  %v7346_v53 = vld [vmem:[#allocation2 + $0x40] sm:$0xf0]  ;;  %v6127_v63 = vor.u32 %v7367_v52, %v6126_v23  ;;  %v7481_v32 = vld [vmem:[#allocation2 + $0x478] sm:$0xf0]  ;;  %v7472_v23 = vld [vmem:[#allocation2 + $0x430] sm:$0xf0] }
 0x273   : > { %4008 = vmatpush.bf16.msrb.mxu2 %v6639_v55  ;;  %v6078_v55 = vld [vmem:[#allocation2 + $0x80] sm:$0xf]  ;;  %v6210_v52 = vld [vmem:[#allocation2 + $0x188] sm:$0xf] }
 0x274   : > { %4021 = vmatpush.bf16.msrb.mxu3 %v6735_v57  ;;  %3984 = vmatpush.bf16.msrb.mxu0 %v6423_v9  ;;  %v7355_v57 = vld [vmem:[#allocation2 + $0x88] sm:$0xf0]  ;;  %v6391_v9 = vor.u32 %v7433_v61, %v6390_v35  ;;  %v6030_v35 = vld [vmem:[#allocation2 + $0x20] sm:$0xf] }
 0x275   : > { %v7343_v61 = vld [vmem:[#allocation2 + $0x28] sm:$0xf0] }
 0x276   : > { %3999 = vmatpush.bf16.msrb.mxu1 %v6495_v7  ;;  %v6079_v7 = vor.u32 %v7355_v57, %v6078_v55  ;;  %v6583_v55 = vor.u32 %v7481_v32, %v6582_v0  ;;  %v6247_v57 = vor.u32 %v7397_v30, %v6246_v40  ;;  %v7469_v40 = vld [vmem:[#allocation2 + $0x418] sm:$0xf0] }
 0x277   : > { %4009 = vmatpush.bf16.msrb.mxu2 %v6627_v19  ;;  %v6066_v19 = vld [vmem:[#allocation2 + $0x68] sm:$0xf] }
 0x278   : > { %4022 = vmatpush.bf16.msrb.mxu3 %v6723_v15  ;;  %3985 = vmatpush.bf16.msrb.mxu0 %v6411_v14  ;;  %v7352_v15 = vld [vmem:[#allocation2 + $0x70] sm:$0xf0]  ;;  %v6138_v14 = vld [vmem:[#allocation2 + $0xf8] sm:$0xf] }
 0x279   : > { %4000 = vmatmul.bf16.vlgmr.msrb.gmra.mxu1 %v8924_v31  ;;  %v6067_v16 = vor.u32 %v7352_v15, %v6066_v19  ;;  %v7457_v19 = vld [vmem:[#allocation2 + $0x3b8] sm:$0xf0] }
 0x27a   : > { %4044 = vmatpush.bf16.msra.mxu1 %v6199_v48  ;;  %v7430_v48 = vld [vmem:[#allocation2 + $0x2e0] sm:$0xf0] }
 0x27b   : > { %4010 = vmatpush.bf16.msrb.mxu2 %v6615_v5  ;;  %v6379_v21 = vor.u32 %v7430_v48, %v6378_v42  ;;  %v6139_v5 = vor.u32 %v7370_v39, %v6138_v14  ;;  %v7340_v42 = vld [vmem:[#allocation2 + $0x10] sm:$0xf0]  ;;  %v6486_v48 = vld [vmem:[#allocation2 + $0x3b0] sm:$0xf]  ;;  %v7475_v39 = vld [vmem:[#allocation2 + $0x448] sm:$0xf0] }
 0x27c   : > { %4023 = vmatpush.bf16.msrb.mxu3 %v6711_v18  ;;  %3986 = vmatpush.bf16.msrb.mxu0 %v6399_v1  ;;  %v6271_v18 = vor.u32 %v7403_v8, %v6270_v28  ;;  %v6258_v1 = vld [vmem:[#allocation2 + $0x1e8] sm:$0xf]  ;;  %v6019_v14 = vor.u32 %v7340_v42, %v6018_v12  ;;  %v6222_v28 = vld [vmem:[#allocation2 + $0x1a0] sm:$0xf]  ;;  %v6487_v8 = vor.u32 %v7457_v19, %v6486_v48  ;;  %v7523_v12 = vld [vmem:[#allocation2 + $0x5c8] sm:$0xf0] }
 0x27d   : > { %v6438_v42 = vld [vmem:[#allocation2 + $0x350] sm:$0xf]  ;;  %v7445_v48 = vld [vmem:[#allocation2 + $0x358] sm:$0xf0] }
 0x27e   : > { %4045 = vmatpush.bf16.msra.mxu1 %v6187_v54  ;;  %v7427_v54 = vld [vmem:[#allocation2 + $0x2c8] sm:$0xf0] }
 0x27f   : > { %4011 = vmatpush.bf16.msrb.mxu2 %v6603_v33  ;;  %3987 = vmatmul.bf16.vlgmr.msrb.gmra.mxu0 %v8934_v49  ;;  %v6367_v10 = vor.u32 %v7427_v54, %v6366_v36  ;;  %v6259_v33 = vor.u32 %v7400_v2, %v6258_v1  ;;  %v6318_v36 = vld [vmem:[#allocation2 + $0x260] sm:$0xf]  ;;  %v7415_v54 = vld [vmem:[#allocation2 + $0x268] sm:$0xf0]  ;;  %v6306_v2 = vld [vmem:[#allocation2 + $0x248] sm:$0xf] }
 0x280   : > { %4031 = vmatpush.bf16.msra.mxu0 %v6103_v38  ;;  %4024 = vmatpush.bf16.msrb.mxu3 %v6699_v41  ;;  %v7424_v38 = vld [vmem:[#allocation2 + $0x2b0] sm:$0xf0]  ;;  %v6319_v1 = vor.u32 %v7415_v54, %v6318_v36  ;;  %v7442_v36 = vld [vmem:[#allocation2 + $0x340] sm:$0xf0] }
 0x281   : > { %v6355_v41 = vor.u32 %v7424_v38, %v6354_v13  ;;  %v7412_v13 = vld [vmem:[#allocation2 + $0x250] sm:$0xf0]  ;;  %v6678_v38 = vld [vmem:[#allocation2 + $0x530] sm:$0xf] }
 0x282   : > { %4046 = vmatpush.bf16.msra.mxu1 %v6175_v58  ;;  %v6042_v58 = vld [vmem:[#allocation2 + $0x38] sm:$0xf]  ;;  %v6307_v0 = vor.u32 %v7412_v13, %v6306_v2  ;;  %v7439_v2 = vld [vmem:[#allocation2 + $0x328] sm:$0xf0] }
 0x283   : > { %4012 = vmatpush.bf16.msrb.mxu2 %v6591_v47  ;;  %v6043_v43 = vor.u32 %v7346_v53, %v6042_v58  ;;  %v6570_v47 = vld [vmem:[#allocation2 + $0x458] sm:$0xf]  ;;  %v7505_v58 = vld [vmem:[#allocation2 + $0x538] sm:$0xf0]  ;;  %v6774_v53 = vld [vmem:[#allocation2 + $0x5f0] sm:$0xf] }
 0x284   : > { %4032 = vmatpush.bf16.msra.mxu0 %v6091_v4  ;;  %4025 = vmatpush.bf16.msrb.mxu3 %v6687_v46  ;;  %v6342_v4 = vld [vmem:[#allocation2 + $0x290] sm:$0xf]  ;;  %v7478_v46 = vld [vmem:[#allocation2 + $0x460] sm:$0xf0]  ;;  %v6679_v32 = vor.u32 %v7505_v58, %v6678_v38 }
 0x285   : > { %v6571_v15 = vor.u32 %v7478_v46, %v6570_v47 }
 0x286   : > { %4047 = vmatpush.bf16.msra.mxu1 %v6163_v50  ;;  %4013 = vmatmul.bf16.vlgmr.msrb.gmra.mxu2 %v8939_v11  ;;  %v6115_v50 = vor.u32 %v7364_v26, %v6114_v29  ;;  %v6462_v29 = vld [vmem:[#allocation2 + $0x380] sm:$0xf] }
 0x287   : > { %4057 = vmatpush.bf16.msra.mxu2 %v6295_v25  ;;  %4026 = vmatmul.bf16.vlgmr.msrb.gmra.mxu3 %v8941_v22  ;;  %v6343_v25 = vor.u32 %v7421_v3, %v6342_v4  ;;  %v6666_v3 = vld [vmem:[#allocation2 + $0x518] sm:$0xf] }
 0x288   : > { %4070 = vmatpush.bf16.msra.mxu3 %v6391_v9  ;;  %4033 = vmatpush.bf16.msra.mxu0 %v6079_v7  ;;  %v6031_v9 = vor.u32 %v7343_v61, %v6030_v35  ;;  %v7418_v7 = vld [vmem:[#allocation2 + $0x280] sm:$0xf0]  ;;  %v6762_v61 = vld [vmem:[#allocation2 + $0x5d8] sm:$0xf] }
 0x289   : > { %v7502_v35 = vld [vmem:[#allocation2 + $0x520] sm:$0xf0] }
 0x28a   : > { %4048 = vmatpush.bf16.msra.mxu1 %v6151_v20  ;;  %v6235_v20 = vor.u32 %v7394_v27, %v6234_v60  ;;  %v6667_v46 = vor.u32 %v7502_v35, %v6666_v3  ;;  %v6654_v27 = vld [vmem:[#allocation2 + $0x500] sm:$0xf]  ;;  %v7511_v3 = vld [vmem:[#allocation2 + $0x568] sm:$0xf0] }
 0x28b   : > { %4058 = vmatpush.bf16.msra.mxu2 %v6283_v37  ;;  %v6558_v37 = vld [vmem:[#allocation2 + $0x440] sm:$0xf] }
 0x28c   : > { %4071 = vmatpush.bf16.msra.mxu3 %v6379_v21  ;;  %4034 = vmatpush.bf16.msra.mxu0 %v6067_v16  ;;  %v6331_v21 = vor.u32 %v7418_v7, %v6330_v44  ;;  %v7391_v16 = vld [vmem:[#allocation2 + $0x1a8] sm:$0xf0]  ;;  %v6750_v7 = vld [vmem:[#allocation2 + $0x5c0] sm:$0xf] }
 0x28d   : > { %v7499_v44 = vld [vmem:[#allocation2 + $0x508] sm:$0xf0] }
 0x28e   : > { %4049 = vmatpush.bf16.msra.mxu1 %v6139_v5  ;;  %v6559_v5 = vor.u32 %v7475_v39, %v6558_v37  ;;  %v7463_v37 = vld [vmem:[#allocation2 + $0x3e8] sm:$0xf0]  ;;  %v6642_v39 = vld [vmem:[#allocation2 + $0x4e8] sm:$0xf] }
 0x28f   : > { %4059 = vmatpush.bf16.msra.mxu2 %v6271_v18  ;;  %v6223_v18 = vor.u32 %v7391_v16, %v6222_v28  ;;  %v7496_v28 = vld [vmem:[#allocation2 + $0x4f0] sm:$0xf0]  ;;  %v6738_v16 = vld [vmem:[#allocation2 + $0x5a8] sm:$0xf] }
 0x290   : > { %4072 = vmatpush.bf16.msra.mxu3 %v6367_v10  ;;  %4035 = vmatpush.bf16.msra.mxu0 %v6055_v62  ;;  %v6546_v10 = vld [vmem:[#allocation2 + $0x428] sm:$0xf]  ;;  %v7388_v62 = vld [vmem:[#allocation2 + $0x190] sm:$0xf0] }
 0x291   : > { %v6211_v26 = vor.u32 %v7388_v62, %v6210_v52  ;;  %v6726_v52 = vld [vmem:[#allocation2 + $0x590] sm:$0xf]  ;;  %v6414_v62 = vld [vmem:[#allocation2 + $0x320] sm:$0xf] }
 0x292   : > { %4050 = vmatpush.bf16.msra.mxu1 %v6127_v63  ;;  %v7529_v63 = vld [vmem:[#allocation2 + $0x5f8] sm:$0xf0]  ;;  %v6415_v58 = vor.u32 %v7439_v2, %v6414_v62 }
 0x293   : > { %4060 = vmatpush.bf16.msra.mxu2 %v6259_v33  ;;  %v7451_v33 = vld [vmem:[#allocation2 + $0x388] sm:$0xf0]  ;;  %v6775_v30 = vor.u32 %v7529_v63, %v6774_v53  ;;  %v6618_v53 = vld [vmem:[#allocation2 + $0x4b8] sm:$0xf]  ;;  %v7490_v63 = vld [vmem:[#allocation2 + $0x4c0] sm:$0xf0] }
 0x294   : > { %4073 = vmatpush.bf16.msra.mxu3 %v6355_v41  ;;  %4036 = vmatpush.bf16.msra.mxu0 %v6043_v43  ;;  %v6547_v41 = vor.u32 %v7472_v23, %v6546_v10  ;;  %v6534_v43 = vld [vmem:[#allocation2 + $0x410] sm:$0xf]  ;;  %v6463_v4 = vor.u32 %v7451_v33, %v6462_v29  ;;  %v7493_v23 = vld [vmem:[#allocation2 + $0x4d8] sm:$0xf0]  ;;  %v6714_v29 = vld [vmem:[#allocation2 + $0x578] sm:$0xf] }
 0x295   : > { %v6535_v47 = vor.u32 %v7469_v40, %v6534_v43  ;;  %v6630_v10 = vld [vmem:[#allocation2 + $0x4d0] sm:$0xf]  ;;  %v7514_v33 = vld [vmem:[#allocation2 + $0x580] sm:$0xf0]  ;;  %v6606_v40 = vld [vmem:[#allocation2 + $0x4a0] sm:$0xf] }
 0x296   : > { %4051 = vmatpush.bf16.msra.mxu1 %v6115_v50  ;;  %v7526_v50 = vld [vmem:[#allocation2 + $0x5e0] sm:$0xf0] }
 0x297   : > { %4061 = vmatpush.bf16.msra.mxu2 %v6247_v57  ;;  %v7448_v57 = vld [vmem:[#allocation2 + $0x370] sm:$0xf0] }
 0x298   : > { %4074 = vmatpush.bf16.msra.mxu3 %v6343_v25  ;;  %4037 = vmatpush.bf16.msra.mxu0 %v6031_v9  ;;  %v7466_v25 = vld [vmem:[#allocation2 + $0x400] sm:$0xf0]  ;;  %v6763_v9 = vor.u32 %v7526_v50, %v6762_v61  ;;  %v6594_v50 = vld [vmem:[#allocation2 + $0x488] sm:$0xf] }
 0x299   : > { %4052 = vmatmul.bf16.vlgmr.msra.gmra.mxu1 %v8896_v56  ;;  %v6475_v56 = vor.u32 %v7454_v17, %v6474_v51  ;;  %v6498_v51 = vld [vmem:[#allocation2 + $0x3c8] sm:$0xf]  ;;  %v7460_v17 = vld [vmem:[#allocation2 + $0x3d0] sm:$0xf0] }
 0x29a   : > { %4096 = vmatpush.bf16.msrb.mxu1 %v6583_v55  ;;  %v6450_v55 = vld [vmem:[#allocation2 + $0x368] sm:$0xf]  ;;  %v6499_v13 = vor.u32 %v7460_v17, %v6498_v51 }
 0x29b   : > { %4062 = vmatpush.bf16.msra.mxu2 %v6235_v20  ;;  %v6451_v60 = vor.u32 %v7448_v57, %v6450_v55  ;;  %v6510_v20 = vld [vmem:[#allocation2 + $0x3e0] sm:$0xf]  ;;  %v7484_v55 = vld [vmem:[#allocation2 + $0x490] sm:$0xf0] }
 0x29c   : > { %4075 = vmatpush.bf16.msra.mxu3 %v6331_v21  ;;  %4038 = vmatpush.bf16.msra.mxu0 %v6019_v14  ;;  %v6751_v21 = vor.u32 %v7523_v12, %v6750_v7  ;;  %v6439_v14 = vor.u32 %v7445_v48, %v6438_v42  ;;  %v6511_v54 = vor.u32 %v7463_v37, %v6510_v20 }
 0x29e   : > { %4097 = vmatpush.bf16.msrb.mxu1 %v6571_v15  ;;  %v6655_v15 = vor.u32 %v7499_v44, %v6654_v27 }
 0x29f   : > { %4063 = vmatpush.bf16.msra.mxu2 %v6223_v18  ;;  %4039 = vmatmul.bf16.vlgmr.msra.gmra.mxu0 %v8909_v34  ;;  %v6522_v34 = vld [vmem:[#allocation2 + $0x3f8] sm:$0xf] }
 0x2a0   : > { %4083 = vmatpush.bf16.msrb.mxu0 %v6487_v8  ;;  %4076 = vmatpush.bf16.msra.mxu3 %v6319_v1  ;;  %v6523_v19 = vor.u32 %v7466_v25, %v6522_v34  ;;  %v7520_v8 = vld [vmem:[#allocation2 + $0x5b0] sm:$0xf0]  ;;  %v7517_v1 = vld [vmem:[#allocation2 + $0x598] sm:$0xf0]  ;;  %v6595_v34 = vor.u32 %v7484_v55, %v6594_v50 }
 0x2a1   : > { %v6727_v38 = vor.u32 %v7517_v1, %v6726_v52 }
 0x2a2   : > { %4098 = vmatpush.bf16.msrb.mxu1 %v6559_v5  ;;  %v6739_v5 = vor.u32 %v7520_v8, %v6738_v16 }
 0x2a3   : > { %4064 = vmatpush.bf16.msra.mxu2 %v6211_v26  ;;  %v7436_v26 = vld [vmem:[#allocation2 + $0x310] sm:$0xf0] }
 0x2a4   : > { %4084 = vmatpush.bf16.msrb.mxu0 %v6475_v56  ;;  %4077 = vmatpush.bf16.msra.mxu3 %v6307_v0  ;;  %v6631_v56 = vor.u32 %v7493_v23, %v6630_v10  ;;  %v6619_v0 = vor.u32 %v7490_v63, %v6618_v53 }
 0x2a6   : > { %4099 = vmatpush.bf16.msrb.mxu1 %v6547_v41  ;;  %4065 = vmatmul.bf16.vlgmr.msra.gmra.mxu2 %v8918_v6  ;;  %v6426_v6 = vld [vmem:[#allocation2 + $0x338] sm:$0xf]  ;;  %v6402_v41 = vld [vmem:[#allocation2 + $0x308] sm:$0xf] }
 0x2a7   : > { %4109 = vmatpush.bf16.msrb.mxu2 %v6679_v32  ;;  %4078 = vmatmul.bf16.vlgmr.msra.gmra.mxu3 %v8920_v45  ;;  %v6643_v45 = vor.u32 %v7496_v28, %v6642_v39  ;;  %v6427_v18 = vor.u32 %v7442_v36, %v6426_v6  ;;  %v6715_v32 = vor.u32 %v7514_v33, %v6714_v29 }
 0x2a8   : > { %4122 = vmatpush.bf16.msrb.mxu3 %v6775_v30  ;;  %4085 = vmatpush.bf16.msrb.mxu0 %v6463_v4  ;;  %v6403_v43 = vor.u32 %v7436_v26, %v6402_v41  ;;  %v7487_v30 = vld [vmem:[#allocation2 + $0x4a8] sm:$0xf0]  ;;  %v6702_v4 = vld [vmem:[#allocation2 + $0x560] sm:$0xf] }
 0x2a9   : > { %v6607_v35 = vor.u32 %v7487_v30, %v6606_v40  ;;  %v6703_v61 = vor.u32 %v7511_v3, %v6702_v4 }
 0x2aa   : > { %4100 = vmatpush.bf16.msrb.mxu1 %v6535_v47  ;;  %v6690_v47 = vld [vmem:[#allocation2 + $0x548] sm:$0xf] }
 0x2ab   : > { %4110 = vmatpush.bf16.msrb.mxu2 %v6667_v46  ;;  %v7508_v46 = vld [vmem:[#allocation2 + $0x550] sm:$0xf0] }
 0x2ac   : > { %4123 = vmatpush.bf16.msrb.mxu3 %v6763_v9  ;;  %4086 = vmatpush.bf16.msrb.mxu0 %v6451_v60  ;;  %v6691_v25 = vor.u32 %v7508_v46, %v6690_v47 }
 0x2ae   : > { %4101 = vmatpush.bf16.msrb.mxu1 %v6523_v19 }
 0x2af   : > { %4111 = vmatpush.bf16.msrb.mxu2 %v6655_v15 }
 0x2b0   : > { %4124 = vmatpush.bf16.msrb.mxu3 %v6751_v21  ;;  %4087 = vmatpush.bf16.msrb.mxu0 %v6439_v14 }
 0x2b2   : > { %4102 = vmatpush.bf16.msrb.mxu1 %v6511_v54 }
 0x2b3   : > { %4112 = vmatpush.bf16.msrb.mxu2 %v6643_v45 }
 0x2b4   : > { %4125 = vmatpush.bf16.msrb.mxu3 %v6739_v5  ;;  %4088 = vmatpush.bf16.msrb.mxu0 %v6427_v18 }
 0x2b5   : > { %v3845_v57 = vpop.f32.mrf.mxu1 }
 0x2b6   : > { %4103 = vmatpush.bf16.msrb.mxu1 %v6499_v13 }
 0x2b7   : > { %4113 = vmatpush.bf16.msrb.mxu2 %v6631_v56 }
 0x2b8   : > { %4126 = vmatpush.bf16.msrb.mxu3 %v6727_v38  ;;  %4089 = vmatpush.bf16.msrb.mxu0 %v6415_v58 }
 0x2b9   : > { %4104 = vmatmul.bf16.vlgmr.msrb.gmra.mxu1 %v8924_v31 }
 0x2bb   : > { %4114 = vmatpush.bf16.msrb.mxu2 %v6619_v0 }
 0x2bc   : > { %4127 = vmatpush.bf16.msrb.mxu3 %v6715_v32  ;;  %4090 = vmatpush.bf16.msrb.mxu0 %v6403_v43  ;;  %v3832_v31 = vpop.f32.mrf.mxu0 }
 0x2bd   : > { %v3847_v9 = vpop.f32.mrf.mxu1  ;;  %v3846_v12 = vadd.f32 %v3845_v57, %v3832_v31 }
 0x2bf   : > { %4115 = vmatpush.bf16.msrb.mxu2 %v6607_v35  ;;  %4091 = vmatmul.bf16.vlgmr.msrb.gmra.mxu0 %v8934_v49 }
 0x2c0   : > { %4128 = vmatpush.bf16.msrb.mxu3 %v6703_v61 }
 0x2c3   : > { %4116 = vmatpush.bf16.msrb.mxu2 %v6595_v34 }
 0x2c4   : > { %4129 = vmatpush.bf16.msrb.mxu3 %v6691_v25  ;;  %v3834_v60 = vpop.f32.mrf.mxu0 }
 0x2c6   : > { %4117 = vmatmul.bf16.vlgmr.msrb.gmra.mxu2 %v8939_v11  ;;  %v3897_v27 = vpop.f32.mrf.mxu1 }
 0x2c7   : > { %4130 = vmatmul.bf16.vlgmr.msrb.gmra.mxu3 %v8941_v22 }
 0x2c9   : > { %v3858_v44 = vpop.f32.mrf.mxu2 }
 0x2ca   : > { %v3871_v7 = vpop.f32.mrf.mxu3  ;;  %v3859_v42 = vadd.f32 %v3858_v44, %v3846_v12 }
 0x2cc   : > { %v3884_v48 = vpop.f32.mrf.mxu0  ;;  %v3872_v49 = vadd.f32 %v3871_v7, %v3859_v42 }
 0x2ce   : > { %v3899_v19 = vpop.f32.mrf.mxu1  ;;  %v3885_v37 = vadd.f32 %v3884_v48, %v3872_v49 }
 0x2d0   : > { %v3898_v39 = vadd.f32 %v3897_v27, %v3885_v37 }
 0x2d1   : > { %v3860_v15 = vpop.f32.mrf.mxu2 }
 0x2d2   : > { %v3873_v20 = vpop.f32.mrf.mxu3 }
 0x2d4   : > { %v3886_v21 = vpop.f32.mrf.mxu0 }
 0x2d5   : > { %v4139_v21 = vand.u32 15, %v8152_v24 }
 0x2d6   : > { %v3949_v14 = vpop.f32.mrf.mxu1 }
 0x2d7   : > { %vm8979_vm6 = vcmp.ge.s32.totalorder %v4139_v21, 1  ;;  %vm9014_vm15 = vcmp.lt.s32.totalorder %v4139_v21, 15 }
 0x2d9   : > { %v3910_v28 = vpop.f32.mrf.mxu2 }
 0x2da   : > { %v3911_v16 = vadd.f32 %v3910_v28, %v3898_v39  ;;  %v3923_v11 = vpop.f32.mrf.mxu3 }
 0x2dc   : > { %v3924_v8 = vadd.f32 %v3923_v11, %v3911_v16  ;;  %v3936_v22 = vpop.f32.mrf.mxu0 }
 0x2dd   : > { %v3950_v52 = vadd.f32 %v3949_v14, %v3936_v22 }
 0x2de   : > { %v3951_v6 = vpop.f32.mrf.mxu1  ;;  %v8961_v36 = vpack.c.bf16 %v3924_v8, %v3924_v8 }
 0x2e0   : > { %4201 = vrot.lane.b32.xlu1 %v8961_v36, %s7931_s16 }
 0x2e1   : > { %v3912_v54 = vpop.f32.mrf.mxu2 }
 0x2e2   : > { %v3925_v45 = vpop.f32.mrf.mxu3  ;;  %v7531_v54 = vld [vmem:[%s9473_s4 + $0x8] sm:$0xff] }
 0x2e4   : > { %v3938_v51 = vpop.f32.mrf.mxu0 }
 0x2e9   : > { %v3962_v17 = vpop.f32.mrf.mxu2 }
 0x2ea   : > { %v3975_v5 = vpop.f32.mrf.mxu3  ;;  %v3963_v2 = vadd.f32 %v3962_v17, %v3950_v52  ;;  %v4146_v17 = vand.u32 15, %v8208_v59 }
 0x2ec   : > { %v3976_v13 = vadd.f32 %v3975_v5, %v3963_v2  ;;  %vm9001_vm11 = vcmp.ge.s32.totalorder %v4146_v17, 1  ;;  %vm9023_vm2 = vcmp.lt.s32.totalorder %v4146_v17, 15 }
 0x2f1   : > { %v3964_v18 = vpop.f32.mrf.mxu2 }
 0x2f2   : > { %v3977_v10 = vpop.f32.mrf.mxu3 }
 0x2f6   : > { %v4001_v23 = vpop.f32.mrf.mxu1 }
 0x2fc   : > { %v3988_v1 = vpop.f32.mrf.mxu0 }
 0x2fd   : > { %v3989_v56 = vadd.f32 %v3988_v1, %v3976_v13 }
 0x2fe   : > { %v4003_v62 = vpop.f32.mrf.mxu1 }
 0x2ff   : > { %v4002_v58 = vadd.f32 %v4001_v23, %v3989_v56 }
 0x304   : > { %v3990_v38 = vpop.f32.mrf.mxu0 }
 0x309   : > { %v4014_v53 = vpop.f32.mrf.mxu2 }
 0x30a   : > { %v4027_v63 = vpop.f32.mrf.mxu3  ;;  %v4015_v29 = vadd.f32 %v4014_v53, %v4002_v58 }
 0x30c   : > { %v4028_v33 = vadd.f32 %v4027_v63, %v4015_v29 }
 0x30e   : > { %v4191_v41 = vpack.c.bf16 %v4028_v33, %v4028_v33  ;;  %v7798_v26 = vpack.i.bf16 %v4028_v33, %v3924_v8  ;;  %v4729_v8 = vld [vmem:[%s9474_s5 + $0x8] sm:$0xff] }
 0x310   : > { %4203 = vrot.lane.b32.xlu2 %v4191_v41, %s7931_s16 }
 0x311   : > { %v4016_v0 = vpop.f32.mrf.mxu2 }
 0x312   : > { %v4029_v32 = vpop.f32.mrf.mxu3 }
 0x316   : > { %v4053_v43 = vpop.f32.mrf.mxu1 }
 0x318   : > { %7789 = vrot.lane.b32.xlu2 %v7798_v26, %s7932_s20 }
 0x31c   : > { %v4040_v40 = vpop.f32.mrf.mxu0 }
 0x31d   : > { %v4054_v57 = vadd.f32 %v4053_v43, %v4040_v40 }
 0x31e   : > { %v4055_v30 = vpop.f32.mrf.mxu1 }
 0x324   : > { %v4042_v4 = vpop.f32.mrf.mxu0 }
 0x329   : > { %v4066_v3 = vpop.f32.mrf.mxu2 }
 0x32a   : > { %v4079_v35 = vpop.f32.mrf.mxu3  ;;  %v4067_v46 = vadd.f32 %v4066_v3, %v4054_v57 }
 0x32c   : > { %v4080_v25 = vadd.f32 %v4079_v35, %v4067_v46 }
 0x331   : > { %v4068_v61 = vpop.f32.mrf.mxu2 }
 0x332   : > { %v4081_v50 = vpop.f32.mrf.mxu3 }
 0x336   : > { %v4105_v55 = vpop.f32.mrf.mxu1 }
 0x33c   : > { %v4092_v47 = vpop.f32.mrf.mxu0 }
 0x33d   : > { %v4093_v31 = vadd.f32 %v4092_v47, %v4080_v25 }
 0x33e   : > { %v4107_v34 = vpop.f32.mrf.mxu1 }
 0x33f   : > { %v4106_v60 = vadd.f32 %v4105_v55, %v4093_v31  ;;  %v7533_v34 = vld [vmem:[%s9473_s4 + $0x18] sm:$0xff] }
 0x344   : > { %v4094_v9 = vpop.f32.mrf.mxu0 }
 0x349   : > { %v4118_v27 = vpop.f32.mrf.mxu2 }
 0x34a   : > { %v4119_v44 = vadd.f32 %v4118_v27, %v4106_v60  ;;  %v4131_v7 = vpop.f32.mrf.mxu3 }
 0x34c   : > { %v4132_v12 = vadd.f32 %v4131_v7, %v4119_v44  ;;  %v7532_v44 = vld [vmem:[%s9473_s4 + $0x10] sm:$0xff] }
 0x34e   : > { %4174 = vrot.lane.b32.xlu0 %v4132_v12, %s7932_s20  ;;  %4299 = vrot.lane.b32.xlu2 %v4132_v12, %s7933_s21  ;;  %v4192_v42 = vpack.c.bf16 %v4132_v12, %v4132_v12 }
 0x350   : > { %4205 = vrot.lane.b32.xlu1 %v4192_v42, %s7931_s16 }
 0x351   : > { %v4120_v48 = vpop.f32.mrf.mxu2 }
 0x352   : > { %v4133_v19 = vpop.f32.mrf.mxu3  ;;  %v4202_v49 = vpop.permute.xlu1 %4201 }
 0x356   : > { %7799 = vrot.lane.b32.xlu0 %v7798_v26, %s7921_s22  ;;  %4430 = vrot.lane.b32.xlu2 %v8961_v36, %s7920_s3 }
 0x358   : > { %7794 = vrot.lane.b32.xlu1 %v7798_v26, %s7933_s21 }
 0x35e   : > { %4432 = vrot.lane.b32.xlu0 %v4191_v41, %s7920_s3  ;;  %7804 = vrot.lane.b32.xlu2 %v7798_v26, %s7922_s24 }
 0x360   : > { %4363 = vrot.lane.b32.xlu1 %v4132_v12, %s7921_s22  ;;  %s7936_s22 = smov 79  }
 0x366   : > { %4483 = vrot.lane.b32.xlu0 %v4132_v12, %s7922_s24  ;;  %4546 = vrot.lane.b32.xlu2 %v4132_v12, %s7934_s23  ;;  %s5850_s24 = scalar_lea.hbm %s9482_s13, %s8028_s29 }
 0x367   : > { %s5854_s21 = sshll.u32 %s5850_s24, 4  ;;  %s5855_s21 = int_to_ptr.hbm [resolvable:$true] %s5854_s21 }
 0x368   : > { %4434 = vrot.lane.b32.xlu1 %v4192_v42, %s7920_s3  ;;  %s7863_s1 = sshra.s32 %s5855_s21, 4  ;;  %s7869_s3 = scalar_lea.hbm %s9482_s13, 2  ;;  %s7864_s1 = int_to_ptr.hbm [resolvable:$true] %s7863_s1 }
 0x369   : > { %s7865_s2 = scalar_lea.hbm %s7864_s1, 1  ;;  %p7870_p3 = scmp.lt.s32.totalorder %s7864_s1, %s9482_s13 }
 0x36a   : > { %v4204_v15 = vpop.permute.xlu2 %4203  ;;  %p7866_p0 = scmp.ne.s32.totalorder %s7864_s1, %s7865_s2  ;;  %p7871_p4 = scmp.lt.s32.totalorder %s7869_s3, %s7865_s2 }
 0x36b   : > { %v4208_v20 = vsel %vm4207_vm7, %v4202_v49, %v4204_v15 }
 0x36c   : > { %v4216_v37 = vsel %vm4214_vm9, %v4208_v20, 0  ;;  %p7867_p1 = pnand %p7866_p0, %p8045_p5  ;;  %p7872_p7 = por %p7871_p4, %p7870_p3 }
 0x36d   : > { %4228 = vmatpush.bf16.msra.mxu0 %v4216_v37 }
 0x36e   : > { %4614 = vrot.lane.b32.xlu0 %v8961_v36, %s7935_s30  ;;  %4618 = vrot.lane.b32.xlu2 %v4192_v42, %s7935_s30  ;;  %v7530_v36 = vld [vmem:[%s9473_s4] sm:$0xff]  ;;  %p7868_p2 = pneg %p7867_p1 }
 0x370   : > { %7809 = vrot.lane.b32.xlu1 %v7798_v26, %s7934_s23  ;;  %6782 = vmatmul.msk.bf16.vlgmr.msra.gmra.mxu0 %vm4210_vm0, %v7531_v54  ;;  %p7873_p8 = pnand %p7872_p7, %p7868_p2 }
 0x372   : > { %v7790_v14 = vpop.permute.xlu2 %7789 }
 0x373   : > { %v7792_v39 = vunpack.i.h.bf16 %v7790_v14  ;;  %v7791_v28 = vunpack.i.l.bf16 %v7790_v14 }
 0x375   : > { %v4177_v11 = vsel %vm4176_vm10, %v7791_v28, %v7792_v39 }
 0x376   : > { %7814 = vrot.lane.b32.xlu0 %v7798_v26, %s7936_s22  ;;  %v4181_v24 = vsel %vm8979_vm6, %v4177_v11, 0.0 }
 0x377   : > { %v4185_v22 = vpack.c.bf16 %v4181_v24, %v4181_v24 }
 0x378   : > { %4616 = vrot.lane.b32.xlu1 %v4191_v41, %s7935_s30  ;;  %s448_s30 = sand.u32 1, %s7907_s26  }
 0x379   : > { %v4258_v6 = vsel %vm4214_vm9, %v4185_v22, 0  ;;  %s449_s16 = scalar_lea.vmem [#allocation5], %s448_s30  ;;  %s5842_s23 = scalar_lea.sflag [#allocation4], %s448_s30 }
 0x37a   : > { %4270 = vmatpush.bf16.msra.mxu2 %v4258_v6  ;;  %v7534_v6 = vld [vmem:[%s9473_s4 + $0x20] sm:$0xff]  ;;  %s5852_s20 = sshll.u32 %s449_s16, 4  ;;  %s5853_s20 = int_to_ptr.vmem [resolvable:$true] %s5852_s20 }
 0x37d   : > { %6788 = vmatmul.msk.bf16.vlgmr.msra.gmra.mxu2 %vm4210_vm0, %v7530_v36 }
 0x37e   : > { %4737 = vperm.xlu0 %7787, %v4729_v8   ;;  %v7535_v8 = vld [vmem:[%s9473_s4 + $0x28] sm:$0xff] }
 0x380   : > { %4668 = vrot.lane.b32.xlu1 %v4132_v12, %s7936_s22 }
 0x3a8   : > { %v4300_v45 = vpop.permute.xlu2 %4299 }
 0x3b0   : > { %v4431_v51 = vpop.permute.xlu2 %4430 }
 0x3b8   : > { %v8999_v5 = vpop.permute.xlu2 %7804 }
 0x3b9   : > { %v7807_v52 = vunpack.i.h.bf16 %v8999_v5  ;;  %v7806_v1 = vunpack.i.l.bf16 %v8999_v5 }
 0x3bb   : > { %v4485_v58 = vsel %vm9600_vm12, %v7806_v1, %v7807_v52  ;;  %vm9610_vm12 = vcmask 523264  }
 0x3bc   : > { %v4489_v41 = vsel %vm9014_vm15, %v4485_v58, 0.0 }
 0x3bd   : > { %v4494_v4 = vpack.c.bf16 %v4489_v41, %v4489_v41 }
 0x3bf   : > { %v4505_v31 = vsel %vm4214_vm9, %v4494_v4, 0 }
 0x3c0   : > { %v4175_v10 = vpop.permute.xlu0 %4174  ;;  %v4547_v24 = vpop.permute.xlu2 %4546 }
 0x3c1   : > { %v4178_v23 = vsel %vm4176_vm10, %v7792_v39, %v4175_v10  ;;  %vm4620_vm10 = vcmask 654336  }
 0x3c2   : > { %v4182_v62 = vsel %vm9001_vm11, %v4178_v23, 0.0  ;;  %v4206_v2 = vpop.permute.xlu1 %4205 }
 0x3c3   : > { %v4186_v13 = vpack.c.bf16 %v4182_v62, %v4182_v62  ;;  %v4209_v59 = vsel %vm4207_vm7, %v4204_v15, %v4206_v2  ;;  %vm4670_vm7 = vcmask 646144   ;;  %v4728_v62 = vld [vmem:[%s9474_s5] sm:$0xff] }
 0x3c4   : > { %v4219_v56 = vsel %vm4214_vm9, %v4209_v59, 0  ;;  %4732 = vperm.xlu2 %7818, %v4728_v62  }
 0x3c5   : > { %4242 = vmatpush.bf16.msra.mxu1 %v4219_v56  ;;  %v4261_v38 = vsel %vm4214_vm9, %v4186_v13, 0 }
 0x3c6   : > { %4284 = vmatpush.bf16.msra.mxu3 %v4261_v38 }
 0x3c8   : > { %v7800_v63 = vpop.permute.xlu0 %7799  ;;  %6783 = vmatmul.msk.bf16.vlgmr.msra.gmra.mxu1 %vm4210_vm0, %v7531_v54  ;;  %v4619_v18 = vpop.permute.xlu2 %4618 }
 0x3c9   : > { %v7802_v29 = vunpack.i.h.bf16 %v7800_v63  ;;  %v7801_v33 = vunpack.i.l.bf16 %v7800_v63  ;;  %6789 = vmatmul.msk.bf16.vlgmr.msra.gmra.mxu3 %vm4210_vm0, %v7530_v36 }
 0x3ca   : > { %v7795_v26 = vpop.permute.xlu1 %7794 }
 0x3cb   : > { %v4365_v0 = vsel %vm9603_vm13, %v7801_v33, %v7802_v29  ;;  %v7797_v32 = vunpack.i.h.bf16 %v7795_v26  ;;  %v7796_v43 = vunpack.i.l.bf16 %v7795_v26  ;;  %vm9613_vm13 = vmmov %vm9610_vm12 }
 0x3cc   : > { %v4369_v30 = vsel %vm8979_vm6, %v4365_v0, 0.0 }
 0x3cd   : > { %v4303_v3 = vsel %vm4301_vm14, %v7797_v32, %v4300_v45  ;;  %v4302_v35 = vsel %vm4301_vm14, %v7796_v43, %v7797_v32  ;;  %v4374_v61 = vpack.c.bf16 %v4369_v30, %v4369_v30  ;;  %v7537_v32 = vld [vmem:[%s9473_s4 + $0x38] sm:$0xff]  ;;  %v7536_v43 = vld [vmem:[%s9473_s4 + $0x30] sm:$0xff]  ;;  %vm9612_vm14 = vmmov %vm9610_vm12 }
 0x3ce   : > { %v4306_v50 = vsel %vm9014_vm15, %v4302_v35, 0.0  ;;  %v4307_v55 = vsel %vm9023_vm2, %v4303_v3, 0.0 }
 0x3cf   : > { %v4385_v57 = vsel %vm4214_vm9, %v4374_v61, 0  ;;  %v4311_v47 = vpack.c.bf16 %v4306_v50, %v4306_v50  ;;  %v4312_v46 = vpack.c.bf16 %v4307_v55, %v4307_v55  ;;  %v7538_v61 = vld [vmem:[%s9473_s4 + $0x40] sm:$0xff] }
 0x3d0   : > { %v4433_v25 = vpop.permute.xlu0 %4432  ;;  %4397 = vmatpush.bf16.msrb.mxu2 %v4385_v57 }
 0x3d1   : > { %v4436_v9 = vsel %vm9606_vm1, %v4431_v51, %v4433_v25  ;;  %v4322_v60 = vsel %vm4214_vm9, %v4311_v47, 0  ;;  %v4325_v27 = vsel %vm4214_vm9, %v4312_v46, 0 }
 0x3d2   : > { %v4442_v7 = vsel %vm4214_vm9, %v4436_v9, 0  ;;  %v4364_v12 = vpop.permute.xlu1 %4363  ;;  %4334 = vmatpush.bf16.msrb.mxu0 %v4322_v60  ;;  %4348 = vmatpush.bf16.msrb.mxu1 %v4325_v27 }
 0x3d3   : > { %v4366_v42 = vsel %vm9607_vm3, %v7802_v29, %v4364_v12  ;;  %6804 = vmatmul.msk.bf16.vlgmr.msrb.gmra.mxu2 %vm4210_vm0, %v7533_v34 }
 0x3d4   : > { %4517 = vmatpush.bf16.msra.mxu2 %v4505_v31  ;;  %v4370_v48 = vsel %vm9001_vm11, %v4366_v42, 0.0  ;;  %v7546_v31 = vld [vmem:[%s9475_s6 + $0x38] sm:$0xff]  ;;  %v7553_v42 = vld [vmem:[%s9475_s6 + $0x70] sm:$0xff] }
 0x3d5   : > { %v4375_v19 = vpack.c.bf16 %v4370_v48, %v4370_v48  ;;  %6796 = vmatmul.msk.bf16.vlgmr.msrb.gmra.mxu0 %vm4210_vm0, %v7532_v44  ;;  %v7544_v48 = vld [vmem:[%s9475_s6 + $0x28] sm:$0xff] }
 0x3d6   : > { %4454 = vmatpush.bf16.msra.mxu0 %v4442_v7  ;;  %v7545_v7 = vld [vmem:[%s9475_s6 + $0x30] sm:$0xff] }
 0x3d7   : > { %v4388_v49 = vsel %vm4214_vm9, %v4375_v19, 0 }
 0x3d8   : > { %v4484_v15 = vpop.permute.xlu0 %4483  ;;  %6797 = vmatmul.msk.bf16.vlgmr.msrb.gmra.mxu1 %vm4210_vm0, %v7532_v44  ;;  %4411 = vmatpush.bf16.msrb.mxu3 %v4388_v49  ;;  %v7554_v44 = vld [vmem:[%s9475_s6 + $0x78] sm:$0xff] }
 0x3d9   : > { %v4486_v20 = vsel %vm9608_vm4, %v7807_v52, %v4484_v15 }
 0x3da   : > { %v4490_v37 = vsel %vm9023_vm2, %v4486_v20, 0.0  ;;  %v4435_v21 = vpop.permute.xlu1 %4434  ;;  %v7552_v20 = vld [vmem:[%s9475_s6 + $0x68] sm:$0xff] }
 0x3db   : > { %v4495_v14 = vpack.c.bf16 %v4490_v37, %v4490_v37  ;;  %v4437_v39 = vsel %vm9609_vm8, %v4433_v25, %v4435_v21  ;;  %6805 = vmatmul.msk.bf16.vlgmr.msrb.gmra.mxu3 %vm4210_vm0, %v7533_v34  ;;  %v7543_v37 = vld [vmem:[%s9475_s6 + $0x20] sm:$0xff] }
 0x3dc   : > { %v4445_v28 = vsel %vm4214_vm9, %v4437_v39, 0  ;;  %v7542_v39 = vld [vmem:[%s9475_s6 + $0x18] sm:$0xff] }
 0x3dd   : > { %4468 = vmatpush.bf16.msra.mxu1 %v4445_v28  ;;  %v4508_v11 = vsel %vm4214_vm9, %v4495_v14, 0  ;;  %v7551_v14 = vld [vmem:[%s9475_s6 + $0x60] sm:$0xff] }
 0x3de   : > { %4531 = vmatpush.bf16.msra.mxu3 %v4508_v11 }
 0x3e0   : > { %v4615_v22 = vpop.permute.xlu0 %4614 }
 0x3e2   : > { %v7810_v36 = vpop.permute.xlu1 %7809 }
 0x3e3   : > { %v7812_v54 = vunpack.i.h.bf16 %v7810_v36  ;;  %v7811_v45 = vunpack.i.l.bf16 %v7810_v36  ;;  %6820 = vmatmul.msk.bf16.vlgmr.msra.gmra.mxu2 %vm4210_vm0, %v7535_v8  ;;  %v7549_v36 = vld [vmem:[%s9475_s6 + $0x50] sm:$0xff] }
 0x3e5   : > { %v4550_v51 = vsel %vm4548_vm5, %v7812_v54, %v4547_v24  ;;  %v4549_v17 = vsel %vm4548_vm5, %v7811_v45, %v7812_v54  ;;  %6812 = vmatmul.msk.bf16.vlgmr.msra.gmra.mxu0 %vm4210_vm0, %v7534_v6  ;;  %v7540_v54 = vld [vmem:[%s9475_s6 + $0x8] sm:$0xff] }
 0x3e6   : > { %v4553_v5 = vsel %vm8979_vm6, %v4549_v17, 0.0  ;;  %v4554_v10 = vsel %vm9001_vm11, %v4550_v51, 0.0  ;;  %v7548_v17 = vld [vmem:[%s9475_s6 + $0x48] sm:$0xff] }
 0x3e7   : > { %v4558_v23 = vpack.c.bf16 %v4553_v5, %v4553_v5  ;;  %v4559_v52 = vpack.c.bf16 %v4554_v10, %v4554_v10  ;;  %v7539_v5 = vld [vmem:[%s9475_s6] sm:$0xff] }
 0x3e8   : > { %v7815_v1 = vpop.permute.xlu0 %7814  ;;  %6813 = vmatmul.msk.bf16.vlgmr.msra.gmra.mxu1 %vm4210_vm0, %v7534_v6 }
 0x3e9   : > { %v7817_v2 = vunpack.i.h.bf16 %v7815_v1  ;;  %v7816_v13 = vunpack.i.l.bf16 %v7815_v1  ;;  %v4569_v59 = vsel %vm4214_vm9, %v4558_v23, 0  ;;  %v4572_v16 = vsel %vm4214_vm9, %v4559_v52, 0  ;;  %v7547_v52 = vld [vmem:[%s9475_s6 + $0x40] sm:$0xff] }
 0x3ea   : > { %v4617_v56 = vpop.permute.xlu1 %4616  ;;  %4581 = vmatpush.bf16.msrb.mxu0 %v4569_v59  ;;  %4595 = vmatpush.bf16.msrb.mxu1 %v4572_v16  ;;  %v7562_v59 = vld [vmem:[%s9476_s7 + $0x38] sm:$0xff] }
 0x3eb   : > { %v4671_v38 = vsel %vm4670_vm7, %v7816_v13, %v7817_v2  ;;  %v4621_v58 = vsel %vm4620_vm10, %v4615_v22, %v4617_v56  ;;  %v4622_v63 = vsel %vm4620_vm10, %v4617_v56, %v4619_v18  ;;  %6821 = vmatmul.msk.bf16.vlgmr.msra.gmra.mxu3 %vm4210_vm0, %v7535_v8  ;;  %v7550_v8 = vld [vmem:[%s9475_s6 + $0x58] sm:$0xff]  ;;  %v7541_v22 = vld [vmem:[%s9475_s6 + $0x10] sm:$0xff] }
 0x3ec   : > { %v4627_v29 = vsel %vm4214_vm9, %v4621_v58, 0  ;;  %v4630_v33 = vsel %vm4214_vm9, %v4622_v63, 0  ;;  %v4675_v41 = vsel %vm9014_vm15, %v4671_v38, 0.0  ;;  %v7558_v13 = vld [vmem:[%s9476_s7 + $0x18] sm:$0xff]  ;;  %v7557_v38 = vld [vmem:[%s9476_s7 + $0x10] sm:$0xff]  ;;  %vm9611_vm15 = vmmov %vm9610_vm12 }
 0x3ed   : > { %4639 = vmatpush.bf16.msrb.mxu2 %v4627_v29  ;;  %4653 = vmatpush.bf16.msrb.mxu3 %v4630_v33  ;;  %v4680_v26 = vpack.c.bf16 %v4675_v41, %v4675_v41  ;;  %v4230_v40 = vpop.f32.mrf.mxu0  ;;  %v7574_v16 = vld [vmem:[%s9476_s7 + $0x98] sm:$0xff]  ;;  %v7561_v58 = vld [vmem:[%s9476_s7 + $0x30] sm:$0xff] }
 0x3ee   : > { %v7578_v18 = vld [vmem:[%s9476_s7 + $0xb8] sm:$0xff]  ;;  %v7573_v33 = vld [vmem:[%s9476_s7 + $0x90] sm:$0xff] }
 0x3ef   : > { %v4691_v0 = vsel %vm4214_vm9, %v4680_v26, 0 }
 0x3f0   : > { %4703 = vmatpush.bf16.msra.mxu0 %v4691_v0 }
 0x3f1   : > { %4886 = vmatpush.bf16.msra.mxu2 %v7546_v31  ;;  %4900 = vmatpush.bf16.msra.mxu3 %v7554_v44 }
 0x3f2   : > { %v4669_v30 = vpop.permute.xlu1 %4668 }
 0x3f3   : > { %v4672_v4 = vsel %vm4670_vm7, %v7817_v2, %v4669_v30  ;;  %6836 = vmatmul.msk.bf16.vlgmr.msrb.gmra.mxu2 %vm4210_vm0, %v7537_v32 }
 0x3f4   : > { %v4676_v53 = vsel %vm9023_vm2, %v4672_v4, 0.0  ;;  %vm9614_vm2 = vmmov %vm9610_vm12 }
 0x3f5   : > { %v4681_v3 = vpack.c.bf16 %v4676_v53, %v4676_v53  ;;  %6828 = vmatmul.msk.bf16.vlgmr.msrb.gmra.mxu0 %vm4210_vm0, %v7536_v43  ;;  %v9105_v57 = vpop.f32.mrf.mxu0  ;;  %4887 = vmatpush.bf16.msra.mxu2 %v7545_v7  ;;  %vm9615_vm1 = vmmov %vm9614_vm2 }
 0x3f6   : > { %4901 = vmatpush.bf16.msra.mxu3 %v7553_v42  ;;  %4967 = vmatpush.bf16.msrb.mxu0 %v7562_v59  ;;  %v7577_v59 = vld [vmem:[%s9476_s7 + $0xb0] sm:$0xff]  ;;  %vm9616_vm3 = vmmov %vm9615_vm1 }
 0x3f7   : > { %v4694_v35 = vsel %vm4214_vm9, %v4681_v3, 0  ;;  %vm9617_vm4 = vmmov %vm9615_vm1 }
 0x3f8   : > { %6829 = vmatmul.msk.bf16.vlgmr.msrb.gmra.mxu1 %vm4210_vm0, %v7536_v43  ;;  %vm9618_vm8 = vmmov %vm9615_vm1 }
 0x3f9   : > { %4717 = vmatpush.bf16.msra.mxu1 %v4694_v35  ;;  %4888 = vmatpush.bf16.msra.mxu2 %v7544_v48  ;;  %vm9619_vm5 = vmmov %vm9615_vm1 }
 0x3fa   : > { %4902 = vmatpush.bf16.msra.mxu3 %v7552_v20  ;;  %4968 = vmatpush.bf16.msrb.mxu0 %v7561_v58  ;;  %v7559_v58 = vld [vmem:[%s9476_s7 + $0x20] sm:$0xff]  ;;  %vm9620_vm7 = vmmov %vm9615_vm1 }
 0x3fb   : > { %6837 = vmatmul.msk.bf16.vlgmr.msrb.gmra.mxu3 %vm4210_vm0, %v7537_v32  ;;  %vm9621_vm10 = vmmov %vm9615_vm1 }
 0x3fd   : > { %4889 = vmatpush.bf16.msra.mxu2 %v7543_v37  ;;  %5006 = vmatpush.bf16.msrb.mxu1 %v7558_v13  ;;  %v7556_v13 = vld [vmem:[%s9476_s7 + $0x8] sm:$0xff] }
 0x3fe   : > { %4903 = vmatpush.bf16.msra.mxu3 %v7551_v14 }
 0x400   : > { %v4272_v50 = vpop.f32.mrf.mxu2 }
 0x401   : > { %4890 = vmatpush.bf16.msra.mxu2 %v7542_v39  ;;  %v4273_v2 = vadd.f32 %v4272_v50, %v4230_v40  ;;  %5007 = vmatpush.bf16.msrb.mxu1 %v7557_v38  ;;  %v7576_v38 = vld [vmem:[%s9476_s7 + $0xa8] sm:$0xff] }
 0x402   : > { %4904 = vmatpush.bf16.msra.mxu3 %v7550_v8  ;;  %v4738_v8 = vpop.permute.xlu0 %4737 }
 0x405   : > { %6844 = vmatmul.msk.bf16.vlgmr.msra.gmra.mxu0 %vm4210_vm0, %v7538_v61  ;;  %4891 = vmatpush.bf16.msra.mxu2 %v7541_v22 }
 0x406   : > { %4905 = vmatpush.bf16.msra.mxu3 %v7549_v36  ;;  %5008 = vmatpush.bf16.msrb.mxu1 %v7556_v13 }
 0x408   : > { %6845 = vmatmul.msk.bf16.vlgmr.msra.gmra.mxu1 %vm4210_vm0, %v7538_v61  ;;  %v9111_v34 = vpop.f32.mrf.mxu2 }
 0x409   : > { %4892 = vmatpush.bf16.msra.mxu2 %v7540_v54  ;;  %v4275_v32 = vadd.f32 %v9111_v34, %v9105_v57 }
 0x40a   : > { %4906 = vmatpush.bf16.msra.mxu3 %v7548_v17 }
 0x40d   : > { %4893 = vmatpush.bf16.msra.mxu2 %v7539_v5 }
 0x40e   : > { %4907 = vmatpush.bf16.msra.mxu3 %v7547_v52 }
 0x411   : > { %5159 = vmatpush.bf16.msrb.mxu2 %v7574_v16  ;;  %v7560_v16 = vld [vmem:[%s9476_s7 + $0x28] sm:$0xff] }
 0x412   : > { %5210 = vmatpush.bf16.msrb.mxu3 %v7578_v18  ;;  %v7572_v18 = vld [vmem:[%s9476_s7 + $0x88] sm:$0xff]  ;;  %4969 = vmatpush.bf16.msrb.mxu0 %v7560_v16 }
 0x415   : > { %5160 = vmatpush.bf16.msrb.mxu2 %v7573_v33  ;;  %v7575_v33 = vld [vmem:[%s9476_s7 + $0xa0] sm:$0xff] }
 0x416   : > { %5211 = vmatpush.bf16.msrb.mxu3 %v7577_v59  ;;  %4970 = vmatpush.bf16.msrb.mxu0 %v7559_v58  ;;  %v7614_v59 = vld [vmem:[%s9476_s7 + $0x1d8] sm:$0xff]  ;;  %v7613_v58 = vld [vmem:[%s9476_s7 + $0x1d0] sm:$0xff] }
 0x419   : > { %5161 = vmatpush.bf16.msrb.mxu2 %v7572_v18 }
 0x41a   : > { %5212 = vmatpush.bf16.msrb.mxu3 %v7576_v38 }
 0x41e   : > { %v4733_v20 = vpop.permute.xlu2 %4732  ;;  %5213 = vmatpush.bf16.msrb.mxu3 %v7575_v33  ;;  %v7615_v33 = vld [vmem:[%s9476_s7 + $0x1e0] sm:$0xff] }
 0x445   : > { %v9103_v55 = vpop.f32.mrf.mxu1 }
 0x44c   : > { %v9107_v47 = vpop.f32.mrf.mxu3 }
 0x44d   : > { %v9109_v46 = vpop.f32.mrf.mxu1  ;;  %v4287_v63 = vadd.f32 %v9107_v47, %v9103_v55 }
 0x452   : > { %v4336_v25 = vpop.f32.mrf.mxu0 }
 0x453   : > { %v4355_v56 = vadd.f32 %v4336_v25, %v4273_v2 }
 0x454   : > { %v9118_v60 = vpop.f32.mrf.mxu3 }
 0x455   : > { %v9116_v9 = vpop.f32.mrf.mxu1  ;;  %v4289_v61 = vadd.f32 %v9118_v60, %v9109_v46 }
 0x456   : > { %v4399_v27 = vpop.f32.mrf.mxu2  ;;  %v4356_v26 = vadd.f32 %v9116_v9, %v4287_v63  ;;  %v7571_v63 = vld [vmem:[%s9476_s7 + $0x80] sm:$0xff] }
 0x457   : > { %v4418_v41 = vadd.f32 %v4399_v27, %v4355_v56  ;;  %v7555_v56 = vld [vmem:[%s9476_s7] sm:$0xff]  ;;  %5162 = vmatpush.bf16.msrb.mxu2 %v7571_v63  ;;  %v7616_v63 = vld [vmem:[%s9476_s7 + $0x1e8] sm:$0xff] }
 0x458   : > { %5009 = vmatpush.bf16.msrb.mxu1 %v7555_v56  ;;  %v7617_v56 = vld [vmem:[%s9476_s7 + $0x1f0] sm:$0xff] }
 0x45a   : > { %v9126_v12 = vpop.f32.mrf.mxu0 }
 0x45b   : > { %v4357_v53 = vadd.f32 %v9126_v12, %v4275_v32  ;;  %v7594_v32 = vld [vmem:[%s9476_s7 + $0x138] sm:$0xff] }
 0x45d   : > { %v9134_v19 = vpop.f32.mrf.mxu1 }
 0x45e   : > { %v9136_v49 = vpop.f32.mrf.mxu2  ;;  %v4413_v15 = vpop.f32.mrf.mxu3  ;;  %v4358_v47 = vadd.f32 %v9134_v19, %v4289_v61  ;;  %v7567_v61 = vld [vmem:[%s9476_s7 + $0x60] sm:$0xff] }
 0x45f   : > { %v4419_v4 = vadd.f32 %v4413_v15, %v4356_v26  ;;  %v4420_v50 = vadd.f32 %v9136_v49, %v4357_v53  ;;  %v7590_v26 = vld [vmem:[%s9476_s7 + $0x118] sm:$0xff]  ;;  %v7593_v53 = vld [vmem:[%s9476_s7 + $0x130] sm:$0xff] }
 0x462   : > { %v4456_v21 = vpop.f32.mrf.mxu0 }
 0x463   : > { %v4475_v43 = vadd.f32 %v4456_v21, %v4418_v41  ;;  %v7566_v41 = vld [vmem:[%s9476_s7 + $0x58] sm:$0xff] }
 0x464   : > { %5057 = vmatpush.bf16.msra.mxu0 %v7566_v41  ;;  %v7611_v41 = vld [vmem:[%s9476_s7 + $0x1c0] sm:$0xff] }
 0x465   : > { %v4470_v28 = vpop.f32.mrf.mxu1 }
 0x466   : > { %v4415_v11 = vpop.f32.mrf.mxu3  ;;  %v4519_v24 = vpop.f32.mrf.mxu2  ;;  %v4476_v40 = vadd.f32 %v4470_v28, %v4419_v4  ;;  %v7568_v4 = vld [vmem:[%s9476_s7 + $0x68] sm:$0xff] }
 0x467   : > { %v4538_v3 = vadd.f32 %v4519_v24, %v4475_v43  ;;  %v4421_v9 = vadd.f32 %v4415_v11, %v4358_v47  ;;  %v7565_v43 = vld [vmem:[%s9476_s7 + $0x50] sm:$0xff]  ;;  %v7591_v47 = vld [vmem:[%s9476_s7 + $0x120] sm:$0xff] }
 0x468   : > { %5058 = vmatpush.bf16.msra.mxu0 %v7565_v43 }
 0x46a   : > { %v4458_v6 = vpop.f32.mrf.mxu0 }
 0x46b   : > { %v4477_v25 = vadd.f32 %v4458_v6, %v4420_v50  ;;  %v7563_v50 = vld [vmem:[%s9476_s7 + $0x40] sm:$0xff] }
 0x46d   : > { %v4472_v45 = vpop.f32.mrf.mxu1 }
 0x46e   : > { %v4533_v51 = vpop.f32.mrf.mxu3  ;;  %v4521_v10 = vpop.f32.mrf.mxu2  ;;  %v4478_v42 = vadd.f32 %v4472_v45, %v4421_v9 }
 0x46f   : > { %v4539_v57 = vadd.f32 %v4533_v51, %v4476_v40  ;;  %v4540_v44 = vadd.f32 %v4521_v10, %v4477_v25  ;;  %v7592_v40 = vld [vmem:[%s9476_s7 + $0x128] sm:$0xff] }
 0x472   : > { %v4583_v23 = vpop.f32.mrf.mxu0 }
 0x473   : > { %v4602_v55 = vadd.f32 %v4583_v23, %v4538_v3  ;;  %v7564_v3 = vld [vmem:[%s9476_s7 + $0x48] sm:$0xff] }
 0x474   : > { %5059 = vmatpush.bf16.msra.mxu0 %v7564_v3 }
 0x475   : > { %v4597_v1 = vpop.f32.mrf.mxu1 }
 0x476   : > { %v4535_v62 = vpop.f32.mrf.mxu3  ;;  %v4641_v0 = vpop.f32.mrf.mxu2  ;;  %v4603_v27 = vadd.f32 %v4597_v1, %v4539_v57 }
 0x477   : > { %v4660_v31 = vadd.f32 %v4641_v0, %v4602_v55  ;;  %v4541_v60 = vadd.f32 %v4535_v62, %v4478_v42  ;;  %v7569_v0 = vld [vmem:[%s9476_s7 + $0x70] sm:$0xff]  ;;  %v7587_v55 = vld [vmem:[%s9476_s7 + $0x100] sm:$0xff] }
 0x478   : > { %5060 = vmatpush.bf16.msra.mxu0 %v7563_v50  ;;  %v7585_v42 = vld [vmem:[%s9476_s7 + $0xf0] sm:$0xff] }
 0x47a   : > { %v4585_v29 = vpop.f32.mrf.mxu0 }
 0x47b   : > { %v4604_v46 = vadd.f32 %v4585_v29, %v4540_v44  ;;  %v7570_v29 = vld [vmem:[%s9476_s7 + $0x78] sm:$0xff] }
 0x47c   : > { %5108 = vmatpush.bf16.msra.mxu1 %v7570_v29  ;;  %v7606_v44 = vld [vmem:[%s9476_s7 + $0x198] sm:$0xff]  ;;  %v7612_v29 = vld [vmem:[%s9476_s7 + $0x1c8] sm:$0xff] }
 0x47d   : > { %v4599_v30 = vpop.f32.mrf.mxu1 }
 0x47e   : > { %v4655_v35 = vpop.f32.mrf.mxu3  ;;  %v4643_v48 = vpop.f32.mrf.mxu2  ;;  %v4605_v19 = vadd.f32 %v4599_v30, %v4541_v60  ;;  %v7589_v30 = vld [vmem:[%s9476_s7 + $0x110] sm:$0xff]  ;;  %v7584_v60 = vld [vmem:[%s9476_s7 + $0xe8] sm:$0xff] }
 0x47f   : > { %v4661_v15 = vadd.f32 %v4655_v35, %v4603_v27  ;;  %v4662_v49 = vadd.f32 %v4643_v48, %v4604_v46  ;;  %v7588_v35 = vld [vmem:[%s9476_s7 + $0x108] sm:$0xff]  ;;  %v7582_v27 = vld [vmem:[%s9476_s7 + $0xd8] sm:$0xff]  ;;  %v7605_v46 = vld [vmem:[%s9476_s7 + $0x190] sm:$0xff] }
 0x480   : > { %5109 = vmatpush.bf16.msra.mxu1 %v7569_v0  ;;  %v7610_v48 = vld [vmem:[%s9476_s7 + $0x1b8] sm:$0xff] }
 0x482   : > { %v4705_v34 = vpop.f32.mrf.mxu0 }
 0x483   : > { %v4724_v7 = vadd.f32 %v4705_v34, %v4660_v31  ;;  %v7586_v31 = vld [vmem:[%s9476_s7 + $0xf8] sm:$0xff] }
 0x484   : > { %5110 = vmatpush.bf16.msra.mxu1 %v7568_v4 }
 0x485   : > { %v4719_v12 = vpop.f32.mrf.mxu1  ;;  %v4740_v21 = vadd.f32 %v4733_v20, %v4724_v7 }
 0x486   : > { %v4725_v37 = vadd.f32 %v4719_v12, %v4661_v15  ;;  %v4657_v14 = vpop.f32.mrf.mxu3 }
 0x487   : > { %v4663_v11 = vadd.f32 %v4657_v14, %v4605_v19  ;;  %v4748_v22 = vmul.f32 0.01, %v4740_v21  ;;  %vm4744_vm9 = vcmp.ge.f32.partialorder %v4740_v21, 0.0  ;;  %v7604_v14 = vld [vmem:[%s9476_s7 + $0x188] sm:$0xff] }
 0x488   : > { %v4741_v24 = vadd.f32 %v4733_v20, %v4725_v37  ;;  %5111 = vmatpush.bf16.msra.mxu1 %v7567_v61  ;;  %v7581_v20 = vld [vmem:[%s9476_s7 + $0xd0] sm:$0xff] }
 0x489   : > { %v4752_v5 = vsel %vm4744_vm9, %v4740_v21, %v4748_v22  ;;  %v7609_v37 = vld [vmem:[%s9476_s7 + $0x1b0] sm:$0xff]  ;;  %v7580_v21 = vld [vmem:[%s9476_s7 + $0xc8] sm:$0xff]  ;;  %v7602_v22 = vld [vmem:[%s9476_s7 + $0x178] sm:$0xff] }
 0x48a   : > { %v4707_v39 = vpop.f32.mrf.mxu0  ;;  %v4749_v51 = vmul.f32 0.01, %v4741_v24  ;;  %vm4745_vm0 = vcmp.ge.f32.partialorder %v4741_v24, 0.0  ;;  %vm9622_vm9 = vmmov %vm9615_vm1 }
 0x48b   : > { %v4726_v28 = vadd.f32 %v4707_v39, %v4662_v49  ;;  %v7583_v39 = vld [vmem:[%s9476_s7 + $0xe0] sm:$0xff] }
 0x48c   : > { %v4753_v1 = vsel %vm4745_vm0, %v4741_v24, %v4749_v51  ;;  %v7579_v24 = vld [vmem:[%s9476_s7 + $0xc0] sm:$0xff]  ;;  %vm9624_vm0 = vmmov %vm9615_vm1 }
 0x48d   : > { %v4742_v6 = vadd.f32 %v4738_v8, %v4726_v28  ;;  %v4721_v36 = vpop.f32.mrf.mxu1  ;;  %v7608_v28 = vld [vmem:[%s9476_s7 + $0x1a8] sm:$0xff] }
 0x48e   : > { %v4727_v54 = vadd.f32 %v4721_v36, %v4663_v11  ;;  %v7603_v11 = vld [vmem:[%s9476_s7 + $0x180] sm:$0xff] }
 0x48f   : > { %vm4746_vm6 = vcmp.ge.f32.partialorder %v4742_v6, 0.0  ;;  %v4750_v45 = vmul.f32 0.01, %v4742_v6 }
 0x490   : > { %v4743_v17 = vadd.f32 %v4738_v8, %v4727_v54 }
 0x491   : > { %v4754_v10 = vsel %vm4746_vm6, %v4742_v6, %v4750_v45  ;;  %v7607_v6 = vld [vmem:[%s9476_s7 + $0x1a0] sm:$0xff]  ;;  %v7598_v45 = vld [vmem:[%s9476_s7 + $0x158] sm:$0xff]  ;;  %vm9623_vm6 = vmmov %vm9615_vm1 }
 0x492   : > { %v4756_v23 = vpack.c.bf16 %v4754_v10, %v4752_v5  ;;  %vm4747_vm11 = vcmp.ge.f32.partialorder %v4743_v17, 0.0  ;;  %v4751_v52 = vmul.f32 0.01, %v4743_v17  ;;  %v7597_v10 = vld [vmem:[%s9476_s7 + $0x150] sm:$0xff] }
 0x494   : > { %v4755_v62 = vsel %vm4747_vm11, %v4743_v17, %v4751_v52  ;;  %4894 = vmatmul.bf16.vlgmr.msra.gmra.mxu2 %v4756_v23  ;;  %v7601_v17 = vld [vmem:[%s9476_s7 + $0x170] sm:$0xff]  ;;  %v7600_v23 = vld [vmem:[%s9476_s7 + $0x168] sm:$0xff]  ;;  %vm9625_vm11 = vmmov %vm9624_vm0 }
 0x495   : > { %v4757_v2 = vpack.c.bf16 %v4755_v62, %v4753_v1  ;;  %5363 = vmatpush.bf16.msra.mxu2 %v7590_v26  ;;  %v7596_v52 = vld [vmem:[%s9476_s7 + $0x148] sm:$0xff]  ;;  %v7599_v1 = vld [vmem:[%s9476_s7 + $0x160] sm:$0xff] }
 0x496   : > { %v7595_v62 = vld [vmem:[%s9476_s7 + $0x140] sm:$0xff] }
 0x497   : > { %4908 = vmatmul.bf16.vlgmr.msra.gmra.mxu3 %v4757_v2  ;;  %v7618_v2 = vld [vmem:[%s9476_s7 + $0x1f8] sm:$0xff] }
 0x498   : > { %5415 = vmatpush.bf16.msra.mxu3 %v7594_v32 }
 0x499   : > { %5364 = vmatpush.bf16.msra.mxu2 %v7589_v30 }
 0x49c   : > { %5416 = vmatpush.bf16.msra.mxu3 %v7593_v53 }
 0x49d   : > { %5365 = vmatpush.bf16.msra.mxu2 %v7588_v35 }
 0x4a0   : > { %5417 = vmatpush.bf16.msra.mxu3 %v7592_v40 }
 0x4a1   : > { %5366 = vmatpush.bf16.msra.mxu2 %v7587_v55 }
 0x4a4   : > { %5418 = vmatpush.bf16.msra.mxu3 %v7591_v47 }
 0x517   : > { %v4895_v57 = vpop.f32.mrf.mxu2 }
 0x51a   : > { %v4909_v34 = vpop.f32.mrf.mxu3 }
 0x51b   : > { %v4910_v25 = vadd.f32 %v4909_v34, %v4895_v57 }
 0x51d   : > { %v9280_v9 = vpack.c.bf16 %v4910_v25, %v4910_v25 }
 0x51f   : > { %v9289_v7 = vshrl.u32 %v9280_v9, 16  ;;  %v5127_v12 = vrot.slane %v9280_v9, 2  ;;  %6951 = vmatmul.msk.bf16.vlgmr.msrb.gmra.mxu1 %vm9610_vm12, %v9280_v9  ;;  %v4897_v19 = vpop.f32.mrf.mxu2  ;;  %v5025_v51 = vrot.slane %v9280_v9, 1  ;;  %v5229_v16 = vrot.slane %v9280_v9, 3 }
 0x520   : > { %5312 = vmatpush.bf16.msrb.mxu1 %v7586_v31 }
 0x521   : > { %6934 = vmatmul.msk.bf16.vlgmr.msrb.gmra.mxu0 %vm9611_vm15, %v9289_v7  ;;  %7026 = vmatmul.msk.bf16.vlgmr.msrb.gmra.mxu2 %vm9612_vm14, %v5127_v12  ;;  %v5178_v15 = vrot.slane %v9289_v7, 2  ;;  %v5076_v54 = vrot.slane %v9289_v7, 1  ;;  %v5280_v13 = vrot.slane %v9289_v7, 3  ;;  %vm9626_vm15 = vmmov %vm9624_vm0 }
 0x522   : > { %5261 = vmatpush.bf16.msrb.mxu0 %v7582_v27  ;;  %5569 = vmatpush.bf16.msrb.mxu2 %v7606_v44  ;;  %v4911_v49 = vpop.f32.mrf.mxu3  ;;  %v7622_v44 = vld [vmem:[%s9478_s9 + $0x18] sm:$0xff] }
 0x523   : > { %7051 = vmatmul.msk.bf16.vlgmr.msrb.gmra.mxu3 %vm9613_vm13, %v5178_v15  ;;  %v4912_v8 = vadd.f32 %v4911_v49, %v4897_v19  ;;  %vm9627_vm13 = vmmov %vm9624_vm0 }
 0x524   : > { %5313 = vmatpush.bf16.msrb.mxu1 %v7585_v42  ;;  %5620 = vmatpush.bf16.msrb.mxu3 %v7610_v48 }
 0x525   : > { %v5322_v36 = vpack.c.bf16 %v4912_v8, %v4912_v8 }
 0x526   : > { %5262 = vmatpush.bf16.msrb.mxu0 %v7581_v20  ;;  %5570 = vmatpush.bf16.msrb.mxu2 %v7605_v46  ;;  %v7621_v46 = vld [vmem:[%s9478_s9 + $0x10] sm:$0xff] }
 0x527   : > { %v5382_v5 = vshrl.u32 %v5322_v36, 16  ;;  %v5537_v18 = vrot.slane %v5322_v36, 2  ;;  %v5435_v0 = vrot.slane %v5322_v36, 1  ;;  %v5639_v43 = vrot.slane %v5322_v36, 3 }
 0x528   : > { %5314 = vmatpush.bf16.msrb.mxu1 %v7584_v60  ;;  %5621 = vmatpush.bf16.msrb.mxu3 %v7609_v37  ;;  %v7620_v37 = vld [vmem:[%s9478_s9 + $0x8] sm:$0xff] }
 0x529   : > { %v5588_v38 = vrot.slane %v5382_v5, 2  ;;  %v5486_v26 = vrot.slane %v5382_v5, 1  ;;  %v5690_v32 = vrot.slane %v5382_v5, 3 }
 0x52a   : > { %5263 = vmatpush.bf16.msrb.mxu0 %v7580_v21  ;;  %5571 = vmatpush.bf16.msrb.mxu2 %v7604_v14 }
 0x52c   : > { %5315 = vmatpush.bf16.msrb.mxu1 %v7583_v39  ;;  %5622 = vmatpush.bf16.msrb.mxu3 %v7608_v28  ;;  %v7619_v28 = vld [vmem:[%s9478_s9] sm:$0xff] }
 0x52e   : > { %5264 = vmatpush.bf16.msrb.mxu0 %v7579_v24  ;;  %5572 = vmatpush.bf16.msrb.mxu2 %v7603_v11  ;;  %v7626_v24 = vld [vmem:[%s9480_s11 + $0x18] sm:$0xff] }
 0x52f   : > { %7001 = vmatmul.msk.bf16.vlgmr.msra.gmra.mxu1 %vm9614_vm2, %v5076_v54 }
 0x530   : > { %5518 = vmatpush.bf16.msra.mxu1 %v7602_v22  ;;  %5623 = vmatpush.bf16.msrb.mxu3 %v7607_v6 }
 0x531   : > { %6976 = vmatmul.msk.bf16.vlgmr.msra.gmra.mxu0 %vm9615_vm1, %v5025_v51  ;;  %7126 = vmatmul.msk.bf16.vlgmr.msra.gmra.mxu2 %vm9616_vm3, %v5322_v36  ;;  %v7625_v36 = vld [vmem:[%s9480_s11 + $0x10] sm:$0xff] }
 0x532   : > { %5467 = vmatpush.bf16.msra.mxu0 %v7598_v45  ;;  %5778 = vmatpush.bf16.msra.mxu2 %v7622_v44 }
 0x533   : > { %7151 = vmatmul.msk.bf16.vlgmr.msra.gmra.mxu3 %vm9617_vm4, %v5382_v5 }
 0x534   : > { %5519 = vmatpush.bf16.msra.mxu1 %v7601_v17  ;;  %5831 = vmatpush.bf16.msra.mxu3 %v7626_v24 }
 0x536   : > { %5468 = vmatpush.bf16.msra.mxu0 %v7597_v10  ;;  %5779 = vmatpush.bf16.msra.mxu2 %v7621_v46 }
 0x538   : > { %5520 = vmatpush.bf16.msra.mxu1 %v7600_v23  ;;  %5832 = vmatpush.bf16.msra.mxu3 %v7625_v36 }
 0x53a   : > { %5469 = vmatpush.bf16.msra.mxu0 %v7596_v52  ;;  %5780 = vmatpush.bf16.msra.mxu2 %v7620_v37 }
 0x53c   : > { %5521 = vmatpush.bf16.msra.mxu1 %v7599_v1 }
 0x53e   : > { %5470 = vmatpush.bf16.msra.mxu0 %v7595_v62  ;;  %5781 = vmatpush.bf16.msra.mxu2 %v7619_v28 }
 0x53f   : > { %7101 = vmatmul.msk.bf16.vlgmr.msrb.gmra.mxu1 %vm9618_vm8, %v5280_v13 }
 0x540   : > { %5722 = vmatpush.bf16.msrb.mxu1 %v7618_v2 }
 0x541   : > { %7076 = vmatmul.msk.bf16.vlgmr.msrb.gmra.mxu0 %vm9619_vm5, %v5229_v16  ;;  %7226 = vmatmul.msk.bf16.vlgmr.msrb.gmra.mxu2 %vm9620_vm7, %v5537_v18 }
 0x542   : > { %5671 = vmatpush.bf16.msrb.mxu0 %v7614_v59  ;;  %v5732_v59 = vld [vmem:[%s9477_s8] sm:$0x1] }
 0x543   : > { %7251 = vmatmul.msk.bf16.vlgmr.msrb.gmra.mxu3 %vm9621_vm10, %v5588_v38 }
 0x544   : > { %5723 = vmatpush.bf16.msrb.mxu1 %v7617_v56 }
 0x546   : > { %5672 = vmatpush.bf16.msrb.mxu0 %v7613_v58 }
 0x548   : > { %5724 = vmatpush.bf16.msrb.mxu1 %v7616_v63 }
 0x54a   : > { %5673 = vmatpush.bf16.msrb.mxu0 %v7612_v29 }
 0x54c   : > { %5725 = vmatpush.bf16.msrb.mxu1 %v7615_v33  ;;  %v7624_v33 = vld [vmem:[%s9480_s11 + $0x8] sm:$0xff] }
 0x54d   : > { %5833 = vmatpush.bf16.msra.mxu3 %v7624_v33 }
 0x54e   : > { %5674 = vmatpush.bf16.msrb.mxu0 %v7611_v41  ;;  %v7623_v41 = vld [vmem:[%s9480_s11] sm:$0xff] }
 0x54f   : > { %7201 = vmatmul.msk.bf16.vlgmr.msra.gmra.mxu1 %vm9622_vm9, %v5486_v26  ;;  %v5746_v26 = vld [vmem:[%s9479_s10] sm:$0x1] }
 0x551   : > { %7176 = vmatmul.msk.bf16.vlgmr.msra.gmra.mxu0 %vm9623_vm6, %v5435_v0  ;;  %5834 = vmatpush.bf16.msra.mxu3 %v7623_v41 }
 0x55f   : > { %7301 = vmatmul.msk.bf16.vlgmr.msrb.gmra.mxu1 %vm9624_vm0, %v5690_v32 }
 0x561   : > { %7276 = vmatmul.msk.bf16.vlgmr.msrb.gmra.mxu0 %vm9625_vm11, %v5639_v43 }
 0x59c   : > { %v5011_v30 = vpop.f32.mrf.mxu1 }
 0x59e   : > { %v4972_v4 = vpop.f32.mrf.mxu0 }
 0x59f   : > { %v5012_v57 = vadd.f32 %v5011_v30, %v4972_v4 }
 0x5a4   : > { %v5013_v53 = vpop.f32.mrf.mxu1  ;;  %v5164_v3 = vpop.f32.mrf.mxu2 }
 0x5a6   : > { %v4974_v35 = vpop.f32.mrf.mxu0  ;;  %v5215_v61 = vpop.f32.mrf.mxu3 }
 0x5ac   : > { %v5113_v40 = vpop.f32.mrf.mxu1  ;;  %v5166_v50 = vpop.f32.mrf.mxu2 }
 0x5ae   : > { %v5062_v55 = vpop.f32.mrf.mxu0  ;;  %v5217_v47 = vpop.f32.mrf.mxu3 }
 0x5af   : > { %v5066_v31 = vadd.f32 %v5062_v55, %v5012_v57 }
 0x5b1   : > { %v5117_v7 = vadd.f32 %v5113_v40, %v5066_v31 }
 0x5b3   : > { %v5168_v48 = vadd.f32 %v5164_v3, %v5117_v7  ;;  %v5799_v3 = vld [vmem:[%s9481_s12] sm:$0x1] }
 0x5b4   : > { %v5115_v34 = vpop.f32.mrf.mxu1  ;;  %v5368_v25 = vpop.f32.mrf.mxu2 }
 0x5b5   : > { %v5219_v60 = vadd.f32 %v5215_v61, %v5168_v48 }
 0x5b6   : > { %v5064_v9 = vpop.f32.mrf.mxu0  ;;  %v5420_v27 = vpop.f32.mrf.mxu3 }
 0x5bc   : > { %v5317_v12 = vpop.f32.mrf.mxu1  ;;  %v5370_v42 = vpop.f32.mrf.mxu2 }
 0x5be   : > { %v5266_v15 = vpop.f32.mrf.mxu0  ;;  %v5422_v20 = vpop.f32.mrf.mxu3 }
 0x5bf   : > { %v5270_v49 = vadd.f32 %v5266_v15, %v5219_v60 }
 0x5c1   : > { %v5321_v8 = vadd.f32 %v5317_v12, %v5270_v49 }
 0x5c3   : > { %v5372_v11 = vadd.f32 %v5368_v25, %v5321_v8 }
 0x5c4   : > { %v5319_v21 = vpop.f32.mrf.mxu1  ;;  %v5574_v14 = vpop.f32.mrf.mxu2 }
 0x5c5   : > { %v5424_v51 = vadd.f32 %v5420_v27, %v5372_v11 }
 0x5c6   : > { %v5268_v19 = vpop.f32.mrf.mxu0  ;;  %v5625_v39 = vpop.f32.mrf.mxu3 }
 0x5cc   : > { %v5523_v22 = vpop.f32.mrf.mxu1  ;;  %v5576_v6 = vpop.f32.mrf.mxu2 }
 0x5ce   : > { %v5472_v54 = vpop.f32.mrf.mxu0  ;;  %v5627_v45 = vpop.f32.mrf.mxu3 }
 0x5cf   : > { %v5476_v17 = vadd.f32 %v5472_v54, %v5424_v51 }
 0x5d1   : > { %v5527_v10 = vadd.f32 %v5523_v22, %v5476_v17 }
 0x5d3   : > { %v5578_v52 = vadd.f32 %v5574_v14, %v5527_v10 }
 0x5d4   : > { %v5525_v5 = vpop.f32.mrf.mxu1 }
 0x5d5   : > { %v5629_v62 = vadd.f32 %v5625_v39, %v5578_v52 }
 0x5d6   : > { %v5474_v23 = vpop.f32.mrf.mxu0 }
 0x5dc   : > { %v5727_v1 = vpop.f32.mrf.mxu1 }
 0x5de   : > { %v5676_v2 = vpop.f32.mrf.mxu0 }
 0x5df   : > { %v5680_v13 = vadd.f32 %v5676_v2, %v5629_v62 }
 0x5e1   : > { %v5731_v16 = vadd.f32 %v5727_v1, %v5680_v13 }
 0x5e3   : > { %v5733_v18 = vadd.f32 %v5732_v59, %v5731_v16 }
 0x5e4   : > { %v5729_v56 = vpop.f32.mrf.mxu1 }
 0x5e5   : > { %vm5734_vm12 = vcmp.ge.f32.partialorder %v5733_v18, 0.0  ;;  %v5735_v38 = vmul.f32 0.01, %v5733_v18 }
 0x5e6   : > { %v5678_v58 = vpop.f32.mrf.mxu0 }
 0x5e7   : > { %v5736_v63 = vsel %vm5734_vm12, %v5733_v18, %v5735_v38 }
 0x5e8   : > { %v5737_v29 = vpack.c.bf16 %v5736_v63, %v5736_v63 }
 0x5ea   : > { %7318 = vmatmul.msk.bf16.vlgmr.msra.gmra.mxu2 %vm9626_vm15, %v5737_v29 }
 0x66d   : > { %v5783_v0 = vpop.f32.mrf.mxu2 }
 0x66e   : > { %v5784_v32 = vadd.f32 %v5783_v0, %v5746_v26 }
 0x670   : > { %vm5787_vm14 = vcmp.ge.f32.partialorder %v5784_v32, 0.0  ;;  %v5788_v43 = vmul.f32 0.01, %v5784_v32 }
 0x672   : > { %v5789_v30 = vsel %vm5787_vm14, %v5784_v32, %v5788_v43 }
 0x673   : > { %v5790_v4 = vpack.c.bf16 %v5789_v30, %v5789_v30 }
 0x675   : > { %v5785_v53 = vpop.f32.mrf.mxu2  ;;  %7335 = vmatmul.msk.bf16.vlgmr.msra.gmra.mxu3 %vm9627_vm13, %v5790_v4 }
 0x6f8   : > { %v5836_v35 = vpop.f32.mrf.mxu3 }
 0x6f9   : > { %v5837_v61 = vadd.f32 %v5836_v35, %v5799_v3 }
 0x6fb   : > { %5840 = vst [vmem:[%s449_s16] sm:$0x1] %v5837_v61 }
 0x6fc   : > { %7876 = shalt.err (!%p7873_p8)
}
 0x6fd   : > { %7632 = dma.vmem_to_hbm [thread:$0]  (%p8045_p5), %s5853_s20, 16, %s5855_s21, %s5842_s23  }
 0x700   : > { %v5838_v40 = vpop.f32.mrf.mxu3 }
 0x701 PF: > { %p7644_p9 = scmp.ge.s32.totalorder %s7915_s28, 2  ;;  %s5866_s30 = sand.u32 1, %s7903_s25  }
 0x702   : > { %s5867_s24 = scalar_lea.sflag [#allocation4], %s5866_s30 }
 0x703   : > { %p7639_p10 = pnand %p7644_p9, %p8049_p6 }
 0x705   : > { %p7640_p11 = pneg %p7639_p10 }
 0x707   : > { %7898 = dma.done.wait (%p7640_p11), %s5867_s24, 16  }
 0x708   : > { %7900 = vsyncadd (%p7640_p11), %s5867_s24, 4294967280  ;;  %p24_p12 = scmp.ge.s32.totalorder %s8032_s14, 4   ;;  %s9628_s25 = smov %s7907_s26 }
 0x709   : > { %s9629_s26 = smov %s7911_s27  ;;  %s9630_s27 = smov %s8043_s17 }
 0x70a   : > { %s9631_s28 = smov %s8032_s14  ;;  %26 = sbr.rel (!%p24_p12) target bundleno = 9 (0x9), region = 170 }
 0x70f   :  { %5872 = vsyncpa [#allocation3], 1 }
 0x710   :  { %5874 = vsyncpa [#allocation3 + $0x1], 1 }
 0x711   :  { %5875 = vsyncpa [#allocation4], 1 }
 0x712   :  { %5877 = vsyncpa [#allocation4 + $0x1], 1 }

</bundles_post_ra>
